<compile_context>
chip_gen: v6e
topology: v6e:2x2x1
jax: 0.10.0
libtpu: 0.0.40
codegen_flags: <defaults>
</compile_context>

<pallas_src>
import jax
import jax.numpy as jnp
from jax.experimental import pallas as pl
from jax.experimental.pallas import tpu as pltpu


_RESULT_NAMES = ("realRgbPred", "fakeRgbPred", "realDepthPred", "fakeDepthPred",
                 "pred", "frrdPred", "rrfdPred")

_BF16 = jnp.bfloat16
_F32 = jnp.float32


# ----------------------------------------------------------------------------
# Fused Pallas kernel: encoders -> generators -> decoders -> classifiers
# ----------------------------------------------------------------------------
def _fused_forward_kernel(
    # activations
    rgb_ref, dep_ref,
    # encoder RGB / Depth : Linear(·,512) -> ReLU -> Linear(512, dim)
    er_w1, er_b1, er_w2, er_b2,
    ed_w1, ed_b1, ed_w2, ed_b2,
    # generator RGB2Dep / Dep2RGB (BN already folded into w1/b1 on the host)
    gr_w1, gr_b1, gr_w2, gr_b2, gr_w3, gr_b3,
    gd_w1, gd_b1, gd_w2, gd_b2, gd_w3, gd_b3,
    # decoder RGB / Depth : Linear(dim,256) -> ReLU -> [Dropout=id] -> Linear(256,C)
    dr_w1, dr_b1, dr_w2, dr_b2,
    dd_w1, dd_b1, dd_w2, dd_b2,
    # classifier: cat([a,d],1) @ W + b  split host-side into Wa (C,C), Wd (C,C)
    cls_wa, cls_wd, cls_b,
    # packed lane-dense output slab (B, 7*C)
    out_ref,
):
    def linear(x, w_ref, b_ref):
        # bf16 x bf16 MXU matmul with f32 accumulation; bias added in f32.
        return (jnp.dot(x.astype(_BF16), w_ref[...],
                        preferred_element_type=_F32) + b_ref[...])

    def relu(x):
        return jnp.maximum(x, 0.0)

    def lrelu(x):                       # PyTorch default negative_slope = 0.01
        return jnp.where(x >= 0.0, x, 0.01 * x)

    B = rgb_ref.shape[0]
    C = cls_b.shape[-1]

    # ---- Encoders ----------------------------------------------------------
    real_rgb = linear(relu(linear(rgb_ref[...], er_w1, er_b1)), er_w2, er_b2)
    real_dep = linear(relu(linear(dep_ref[...], ed_w1, ed_b1)), ed_w2, ed_b2)

    # ---- Generators: Linear(+folded BN) -> LReLU -> [Dropout=id]
    #                  -> Linear -> LReLU -> Linear --------------------------
    fake_dep = linear(
        lrelu(linear(lrelu(linear(real_rgb, gr_w1, gr_b1)), gr_w2, gr_b2)),
        gr_w3, gr_b3)
    fake_rgb = linear(
        lrelu(linear(lrelu(linear(real_dep, gd_w1, gd_b1)), gd_w2, gd_b2)),
        gd_w3, gd_b3)

    # ---- Decoders: real/fake share weights -> stack rows once to (2B, dim) -
    rgb_in = jnp.concatenate([real_rgb, fake_rgb], axis=0)
    dep_in = jnp.concatenate([real_dep, fake_dep], axis=0)
    rgb_pred = linear(relu(linear(rgb_in, dr_w1, dr_b1)), dr_w2, dr_b2)   # (2B, C)
    dep_pred = linear(relu(linear(dep_in, dd_w1, dd_b1)), dd_w2, dd_b2)   # (2B, C)

    real_rgb_pred, fake_rgb_pred = rgb_pred[:B], rgb_pred[B:]
    real_dep_pred, fake_dep_pred = dep_pred[:B], dep_pred[B:]

    # ---- Classifier: cat([a, d], 1) @ W == a @ Wa + d @ Wd
    # Compute each half ONCE on the existing 2B stacks (no 3B restack),
    # then combine the three (real/real, fake/real, real/fake) pairs on the VPU.
    a_part = jnp.dot(rgb_pred.astype(_BF16), cls_wa[...],
                     preferred_element_type=_F32)                          # (2B, C)
    d_part = jnp.dot(dep_pred.astype(_BF16), cls_wd[...],
                     preferred_element_type=_F32)                          # (2B, C)
    bias = cls_b[...]

    a_real, a_fake = a_part[:B], a_part[B:]
    d_real, d_fake = d_part[:B], d_part[B:]

    pred = (a_real + d_real + bias) * (real_rgb_pred + real_dep_pred)
    frrd = (a_fake + d_real + bias) * (fake_rgb_pred + real_dep_pred)
    rrfd = (a_real + d_fake + bias) * (real_rgb_pred + fake_dep_pred)

    # ---- Direct slice writes into the lane-packed (B, 7*C) output ----------
    out_ref[:, 0 * C:1 * C] = real_rgb_pred
    out_ref[:, 1 * C:2 * C] = fake_rgb_pred
    out_ref[:, 2 * C:3 * C] = real_dep_pred
    out_ref[:, 3 * C:4 * C] = fake_dep_pred
    out_ref[:, 4 * C:5 * C] = pred
    out_ref[:, 5 * C:6 * C] = frrd
    out_ref[:, 6 * C:7 * C] = rrfd


# ----------------------------------------------------------------------------
# Wrapper: host-side BN fold + bf16 weight cast + one pallas_call
# ----------------------------------------------------------------------------
def _bias_row(b):
    return b.reshape(1, -1).astype(_F32)


def _w(w):
    return w.astype(_BF16)


def _fold_generator(g, eps=1e-5):
    """Fold eval-mode BatchNorm1d (running stats) into the first Linear (f32),
    then round the folded weights to bf16 once."""
    scale = (g["bn_gamma"] / jnp.sqrt(g["bn_var"] + eps)).astype(_F32)
    w1 = g["l1"]["w"].astype(_F32) * scale[None, :]
    b1 = (g["l1"]["b"].astype(_F32) - g["bn_mean"]) * scale + g["bn_beta"]
    return [_w(w1), _bias_row(b1),
            _w(g["l2"]["w"]), _bias_row(g["l2"]["b"]),
            _w(g["l3"]["w"]), _bias_row(g["l3"]["b"])]


def _mm_flops(m, k, n):
    return 2 * m * k * n


def network_forward(params, rgb, depth):
    B = rgb.shape[0]
    C = params["cls"]["b"].shape[0]

    def lin(p):
        return [_w(p["w"]), _bias_row(p["b"])]

    cls_w = params["cls"]["w"].astype(_F32)
    operands = (
        [rgb.astype(_F32), depth.astype(_F32)]
        + lin(params["enc_rgb_1"]) + lin(params["enc_rgb_2"])
        + lin(params["enc_dep_1"]) + lin(params["enc_dep_2"])
        + _fold_generator(params["gen_rgb2dep"])
        + _fold_generator(params["gen_dep2rgb"])
        + lin(params["dec_rgb_1"]) + lin(params["dec_rgb_2"])
        + lin(params["dec_dep_1"]) + lin(params["dec_dep_2"])
        + [_w(cls_w[:C]), _w(cls_w[C:]), _bias_row(params["cls"]["b"])]
    )

    # ---- cost estimate (helps XLA overlap this small custom call) ----------
    rgb_feat, h_enc = params["enc_rgb_1"]["w"].shape
    rgb_dim = params["enc_rgb_2"]["w"].shape[1]
    d_feat = params["enc_dep_1"]["w"].shape[0]
    dep_dim = params["enc_dep_2"]["w"].shape[1]
    h_gen = params["gen_rgb2dep"]["l1"]["w"].shape[1]
    h_dec = params["dec_rgb_1"]["w"].shape[1]
    flops = (
        _mm_flops(B, rgb_feat, h_enc) + _mm_flops(B, h_enc, rgb_dim)
        + _mm_flops(B, d_feat, h_enc) + _mm_flops(B, h_enc, dep_dim)
        + _mm_flops(B, rgb_dim, h_gen) + _mm_flops(B, h_gen, h_gen) + _mm_flops(B, h_gen, dep_dim)
        + _mm_flops(B, dep_dim, h_gen) + _mm_flops(B, h_gen, h_gen) + _mm_flops(B, h_gen, rgb_dim)
        + _mm_flops(2 * B, rgb_dim, h_dec) + _mm_flops(2 * B, h_dec, C)
        + _mm_flops(2 * B, dep_dim, h_dec) + _mm_flops(2 * B, h_dec, C)
        + 2 * _mm_flops(2 * B, C, C)
    )
    bytes_accessed = (sum(int(x.size) * x.dtype.itemsize for x in operands)
                      + 7 * B * C * 4)

    vmem_spec = pl.BlockSpec(memory_space=pltpu.MemorySpace.VMEM)
    out = pl.pallas_call(
        _fused_forward_kernel,
        out_shape=jax.ShapeDtypeStruct((B, 7 * C), _F32),
        in_specs=[vmem_spec] * len(operands),
        out_specs=vmem_spec,
        cost_estimate=pl.CostEstimate(flops=flops, transcendentals=0,
                                      bytes_accessed=bytes_accessed),
    )(*operands)

    return {name: out[:, i * C:(i + 1) * C]
            for i, name in enumerate(_RESULT_NAMES)}


# ----------------------------------------------------------------------------
# Deterministic parameter construction (shapes match the PyTorch __init__;
# Linear weights stored pre-transposed as (in_features, out_features)).
# ----------------------------------------------------------------------------
def _lin_params(key, fan_in, fan_out):
    kw, kb = jax.random.split(key)
    w = jax.random.normal(kw, (fan_in, fan_out), _F32) * 0.05
    b = jax.random.normal(kb, (fan_out,), _F32) * 0.05
    return {"w": w, "b": b}


def init_params(key, rgb_feat, d_feat, class_num, rgb_dim=128, dep_dim=128):
    keys = jax.random.split(key, 16)
    p = {}
    p["enc_rgb_1"] = _lin_params(keys[0], rgb_feat, 512)
    p["enc_rgb_2"] = _lin_params(keys[1], 512, rgb_dim)
    p["enc_dep_1"] = _lin_params(keys[2], d_feat, 512)
    p["enc_dep_2"] = _lin_params(keys[3], 512, dep_dim)
    p["dec_rgb_1"] = _lin_params(keys[4], rgb_dim, 256)
    p["dec_rgb_2"] = _lin_params(keys[5], 256, class_num)
    p["dec_dep_1"] = _lin_params(keys[6], dep_dim, 256)
    p["dec_dep_2"] = _lin_params(keys[7], 256, class_num)

    def gen(k0, k1, k2, in_dim, out_dim):
        kk = jax.random.split(k0, 5)
        return {
            "l1": _lin_params(kk[0], in_dim, 512),
            "bn_gamma": 1.0 + 0.1 * jax.random.normal(kk[1], (512,), _F32),
            "bn_beta": 0.1 * jax.random.normal(kk[2], (512,), _F32),
            "bn_mean": 0.1 * jax.random.normal(kk[3], (512,), _F32),
            "bn_var": 1.0 + 0.1 * jax.random.uniform(kk[4], (512,), _F32),
            "l2": _lin_params(k1, 512, 512),
            "l3": _lin_params(k2, 512, out_dim),
        }

    p["gen_rgb2dep"] = gen(keys[8], keys[9], keys[10], rgb_dim, dep_dim)
    p["gen_dep2rgb"] = gen(keys[11], keys[12], keys[13], dep_dim, rgb_dim)
    p["cls"] = _lin_params(keys[14], 2 * class_num, class_num)
    # NOTE: discriminator submodules exist in the PyTorch __init__ but are
    # never used in forward(), so they are omitted here.
    return p


# ----------------------------------------------------------------------------
# Pure-JAX f32 reference (mirrors the PyTorch eval-mode forward) for validation
# ----------------------------------------------------------------------------
def reference_forward(params, rgb, depth):
    def lin(p, x):
        return x @ p["w"] + p["b"]

    def relu(x):
        return jnp.maximum(x, 0.0)

    def lrelu(x):
        return jnp.where(x >= 0.0, x, 0.01 * x)

    def encoder(p1, p2, x):
        return lin(p2, relu(lin(p1, x)))

    def decoder(p1, p2, x):
        return lin(p2, relu(lin(p1, x)))            # Dropout = identity (eval)

    def generator(g, x, eps=1e-5):
        z = lin(g["l1"], x)
        z = (z - g["bn_mean"]) / jnp.sqrt(g["bn_var"] + eps) * g["bn_gamma"] + g["bn_beta"]
        h = lrelu(z)                                # Dropout(0.2) = identity (eval)
        h = lrelu(lin(g["l2"], h))
        return lin(g["l3"], h)

    def classifier(a, d):
        att = jnp.concatenate([a, d], axis=1) @ params["cls"]["w"] + params["cls"]["b"]
        return att * (a + d)

    results = {}
    real_rgb = encoder(params["enc_rgb_1"], params["enc_rgb_2"], rgb)
    real_dep = encoder(params["enc_dep_1"], params["enc_dep_2"], depth)
    fake_rgb = generator(params["gen_dep2rgb"], real_dep)
    fake_dep = generator(params["gen_rgb2dep"], real_rgb)
    results["realRgbPred"] = decoder(params["dec_rgb_1"], params["dec_rgb_2"], real_rgb)
    results["fakeRgbPred"] = decoder(params["dec_rgb_1"], params["dec_rgb_2"], fake_rgb)
    results["realDepthPred"] = decoder(params["dec_dep_1"], params["dec_dep_2"], real_dep)
    results["fakeDepthPred"] = decoder(params["dec_dep_1"], params["dec_dep_2"], fake_dep)
    results["pred"] = classifier(results["realRgbPred"], results["realDepthPred"])
    results["frrdPred"] = classifier(results["fakeRgbPred"], results["realDepthPred"])
    results["rrfdPred"] = classifier(results["realRgbPred"], results["fakeDepthPred"])
    return results


# ----------------------------------------------------------------------------
if __name__ == "__main__":
    B = 8
    RGB_FEAT = 40
    D_FEAT = 48
    CLASS_NUM = 16

    key = jax.random.PRNGKey(0)
    k_param, k_rgb, k_dep = jax.random.split(key, 3)

    params = init_params(k_param, RGB_FEAT, D_FEAT, CLASS_NUM)
    rgb = jax.random.normal(k_rgb, (B, RGB_FEAT), _F32)
    depth = jax.random.normal(k_dep, (B, D_FEAT), _F32)

    fwd = jax.jit(network_forward)
    results = fwd(params, rgb, depth)
    jax.block_until_ready(results)

    ref = jax.jit(reference_forward)(params, rgb, depth)
    jax.block_until_ready(ref)

    # bf16 weights + f32 accumulation vs f32 reference: loose-but-meaningful tol.
    for name in _RESULT_NAMES:
        got = results[name]
        assert got.shape == (B, CLASS_NUM), (name, got.shape)
        assert bool(jnp.all(jnp.isfinite(got))), name
        assert bool(jnp.allclose(got, ref[name], rtol=1e-1, atol=1e-2)), name

    print("KERNEL_OK")
</pallas_src>

<mosaic_0001>
module attributes {stable_mosaic.version = 11 : i64} {
  func.func @_fused_forward_kernel(%arg0: memref<8x40xf32, #tpu.memory_space<vmem>>, %arg1: memref<8x48xf32, #tpu.memory_space<vmem>>, %arg2: memref<40x512xbf16, #tpu.memory_space<vmem>>, %arg3: memref<1x512xf32, #tpu.memory_space<vmem>>, %arg4: memref<512x128xbf16, #tpu.memory_space<vmem>>, %arg5: memref<1x128xf32, #tpu.memory_space<vmem>>, %arg6: memref<48x512xbf16, #tpu.memory_space<vmem>>, %arg7: memref<1x512xf32, #tpu.memory_space<vmem>>, %arg8: memref<512x128xbf16, #tpu.memory_space<vmem>>, %arg9: memref<1x128xf32, #tpu.memory_space<vmem>>, %arg10: memref<128x512xbf16, #tpu.memory_space<vmem>>, %arg11: memref<1x512xf32, #tpu.memory_space<vmem>>, %arg12: memref<512x512xbf16, #tpu.memory_space<vmem>>, %arg13: memref<1x512xf32, #tpu.memory_space<vmem>>, %arg14: memref<512x128xbf16, #tpu.memory_space<vmem>>, %arg15: memref<1x128xf32, #tpu.memory_space<vmem>>, %arg16: memref<128x512xbf16, #tpu.memory_space<vmem>>, %arg17: memref<1x512xf32, #tpu.memory_space<vmem>>, %arg18: memref<512x512xbf16, #tpu.memory_space<vmem>>, %arg19: memref<1x512xf32, #tpu.memory_space<vmem>>, %arg20: memref<512x128xbf16, #tpu.memory_space<vmem>>, %arg21: memref<1x128xf32, #tpu.memory_space<vmem>>, %arg22: memref<128x256xbf16, #tpu.memory_space<vmem>>, %arg23: memref<1x256xf32, #tpu.memory_space<vmem>>, %arg24: memref<256x16xbf16, #tpu.memory_space<vmem>>, %arg25: memref<1x16xf32, #tpu.memory_space<vmem>>, %arg26: memref<128x256xbf16, #tpu.memory_space<vmem>>, %arg27: memref<1x256xf32, #tpu.memory_space<vmem>>, %arg28: memref<256x16xbf16, #tpu.memory_space<vmem>>, %arg29: memref<1x16xf32, #tpu.memory_space<vmem>>, %arg30: memref<16x16xbf16, #tpu.memory_space<vmem>>, %arg31: memref<16x16xbf16, #tpu.memory_space<vmem>>, %arg32: memref<1x16xf32, #tpu.memory_space<vmem>>, %arg33: memref<8x112xf32, #tpu.memory_space<vmem>>) attributes {dimension_semantics = [], scalar_prefetch = 0 : i64, scratch_operands = 0 : i64, tpu.core_type = #tpu.core_type<tc>} {
    %c0 = arith.constant 0 : index
    %c0_0 = arith.constant 0 : index
    %0 = vector.load %arg0[%c0, %c0_0] : memref<8x40xf32, #tpu.memory_space<vmem>>, vector<8x40xf32>
    %1 = arith.truncf %0 : vector<8x40xf32> to vector<8x40xbf16>
    %c0_1 = arith.constant 0 : index
    %c0_2 = arith.constant 0 : index
    %2 = vector.load %arg2[%c0_1, %c0_2] : memref<40x512xbf16, #tpu.memory_space<vmem>>, vector<40x512xbf16>
    %cst = arith.constant dense<0.000000e+00> : vector<8x512xf32>
    %3 = tpu.matmul %1, %2, %cst {dimension_numbers = #tpu.dot_dimension_numbers<[1], [0], [0], [1], [0, 0, 1, 1], [], []>} : vector<8x40xbf16>, vector<40x512xbf16>, vector<8x512xf32> -> vector<8x512xf32>
    %c0_3 = arith.constant 0 : index
    %c0_4 = arith.constant 0 : index
    %4 = vector.load %arg3[%c0_3, %c0_4] : memref<1x512xf32, #tpu.memory_space<vmem>>, vector<1x512xf32>
    %5 = vector.broadcast %4 : vector<1x512xf32> to vector<8x512xf32>
    %6 = arith.addf %3, %5 : vector<8x512xf32>
    %cst_5 = arith.constant 0.000000e+00 : f32
    %7 = vector.broadcast %cst_5 : f32 to vector<8x512xf32>
    %8 = arith.maximumf %6, %7 : vector<8x512xf32>
    %9 = arith.truncf %8 : vector<8x512xf32> to vector<8x512xbf16>
    %c0_6 = arith.constant 0 : index
    %c0_7 = arith.constant 0 : index
    %10 = vector.load %arg4[%c0_6, %c0_7] : memref<512x128xbf16, #tpu.memory_space<vmem>>, vector<512x128xbf16>
    %cst_8 = arith.constant dense<0.000000e+00> : vector<8x128xf32>
    %11 = tpu.matmul %9, %10, %cst_8 {dimension_numbers = #tpu.dot_dimension_numbers<[1], [0], [0], [1], [0, 0, 1, 1], [], []>} : vector<8x512xbf16>, vector<512x128xbf16>, vector<8x128xf32> -> vector<8x128xf32>
    %c0_9 = arith.constant 0 : index
    %c0_10 = arith.constant 0 : index
    %12 = vector.load %arg5[%c0_9, %c0_10] : memref<1x128xf32, #tpu.memory_space<vmem>>, vector<1x128xf32>
    %13 = vector.broadcast %12 : vector<1x128xf32> to vector<8x128xf32>
    %14 = arith.addf %11, %13 : vector<8x128xf32>
    %c0_11 = arith.constant 0 : index
    %c0_12 = arith.constant 0 : index
    %15 = vector.load %arg1[%c0_11, %c0_12] : memref<8x48xf32, #tpu.memory_space<vmem>>, vector<8x48xf32>
    %16 = arith.truncf %15 : vector<8x48xf32> to vector<8x48xbf16>
    %c0_13 = arith.constant 0 : index
    %c0_14 = arith.constant 0 : index
    %17 = vector.load %arg6[%c0_13, %c0_14] : memref<48x512xbf16, #tpu.memory_space<vmem>>, vector<48x512xbf16>
    %cst_15 = arith.constant dense<0.000000e+00> : vector<8x512xf32>
    %18 = tpu.matmul %16, %17, %cst_15 {dimension_numbers = #tpu.dot_dimension_numbers<[1], [0], [0], [1], [0, 0, 1, 1], [], []>} : vector<8x48xbf16>, vector<48x512xbf16>, vector<8x512xf32> -> vector<8x512xf32>
    %c0_16 = arith.constant 0 : index
    %c0_17 = arith.constant 0 : index
    %19 = vector.load %arg7[%c0_16, %c0_17] : memref<1x512xf32, #tpu.memory_space<vmem>>, vector<1x512xf32>
    %20 = vector.broadcast %19 : vector<1x512xf32> to vector<8x512xf32>
    %21 = arith.addf %18, %20 : vector<8x512xf32>
    %cst_18 = arith.constant 0.000000e+00 : f32
    %22 = vector.broadcast %cst_18 : f32 to vector<8x512xf32>
    %23 = arith.maximumf %21, %22 : vector<8x512xf32>
    %24 = arith.truncf %23 : vector<8x512xf32> to vector<8x512xbf16>
    %c0_19 = arith.constant 0 : index
    %c0_20 = arith.constant 0 : index
    %25 = vector.load %arg8[%c0_19, %c0_20] : memref<512x128xbf16, #tpu.memory_space<vmem>>, vector<512x128xbf16>
    %cst_21 = arith.constant dense<0.000000e+00> : vector<8x128xf32>
    %26 = tpu.matmul %24, %25, %cst_21 {dimension_numbers = #tpu.dot_dimension_numbers<[1], [0], [0], [1], [0, 0, 1, 1], [], []>} : vector<8x512xbf16>, vector<512x128xbf16>, vector<8x128xf32> -> vector<8x128xf32>
    %c0_22 = arith.constant 0 : index
    %c0_23 = arith.constant 0 : index
    %27 = vector.load %arg9[%c0_22, %c0_23] : memref<1x128xf32, #tpu.memory_space<vmem>>, vector<1x128xf32>
    %28 = vector.broadcast %27 : vector<1x128xf32> to vector<8x128xf32>
    %29 = arith.addf %26, %28 : vector<8x128xf32>
    %30 = arith.truncf %14 : vector<8x128xf32> to vector<8x128xbf16>
    %c0_24 = arith.constant 0 : index
    %c0_25 = arith.constant 0 : index
    %31 = vector.load %arg10[%c0_24, %c0_25] : memref<128x512xbf16, #tpu.memory_space<vmem>>, vector<128x512xbf16>
    %cst_26 = arith.constant dense<0.000000e+00> : vector<8x512xf32>
    %32 = tpu.matmul %30, %31, %cst_26 {dimension_numbers = #tpu.dot_dimension_numbers<[1], [0], [0], [1], [0, 0, 1, 1], [], []>} : vector<8x128xbf16>, vector<128x512xbf16>, vector<8x512xf32> -> vector<8x512xf32>
    %c0_27 = arith.constant 0 : index
    %c0_28 = arith.constant 0 : index
    %33 = vector.load %arg11[%c0_27, %c0_28] : memref<1x512xf32, #tpu.memory_space<vmem>>, vector<1x512xf32>
    %34 = vector.broadcast %33 : vector<1x512xf32> to vector<8x512xf32>
    %35 = arith.addf %32, %34 : vector<8x512xf32>
    %cst_29 = arith.constant 0.000000e+00 : f32
    %36 = vector.broadcast %cst_29 : f32 to vector<8x512xf32>
    %37 = arith.cmpf oge, %35, %36 : vector<8x512xf32>
    %cst_30 = arith.constant 0.00999999977 : f32
    %38 = vector.broadcast %cst_30 : f32 to vector<8x512xf32>
    %39 = arith.mulf %38, %35 : vector<8x512xf32>
    %40 = arith.select %37, %35, %39 : vector<8x512xi1>, vector<8x512xf32>
    %41 = arith.truncf %40 : vector<8x512xf32> to vector<8x512xbf16>
    %c0_31 = arith.constant 0 : index
    %c0_32 = arith.constant 0 : index
    %42 = vector.load %arg12[%c0_31, %c0_32] : memref<512x512xbf16, #tpu.memory_space<vmem>>, vector<512x512xbf16>
    %cst_33 = arith.constant dense<0.000000e+00> : vector<8x512xf32>
    %43 = tpu.matmul %41, %42, %cst_33 {dimension_numbers = #tpu.dot_dimension_numbers<[1], [0], [0], [1], [0, 0, 1, 1], [], []>} : vector<8x512xbf16>, vector<512x512xbf16>, vector<8x512xf32> -> vector<8x512xf32>
    %c0_34 = arith.constant 0 : index
    %c0_35 = arith.constant 0 : index
    %44 = vector.load %arg13[%c0_34, %c0_35] : memref<1x512xf32, #tpu.memory_space<vmem>>, vector<1x512xf32>
    %45 = vector.broadcast %44 : vector<1x512xf32> to vector<8x512xf32>
    %46 = arith.addf %43, %45 : vector<8x512xf32>
    %cst_36 = arith.constant 0.000000e+00 : f32
    %47 = vector.broadcast %cst_36 : f32 to vector<8x512xf32>
    %48 = arith.cmpf oge, %46, %47 : vector<8x512xf32>
    %cst_37 = arith.constant 0.00999999977 : f32
    %49 = vector.broadcast %cst_37 : f32 to vector<8x512xf32>
    %50 = arith.mulf %49, %46 : vector<8x512xf32>
    %51 = arith.select %48, %46, %50 : vector<8x512xi1>, vector<8x512xf32>
    %52 = arith.truncf %51 : vector<8x512xf32> to vector<8x512xbf16>
    %c0_38 = arith.constant 0 : index
    %c0_39 = arith.constant 0 : index
    %53 = vector.load %arg14[%c0_38, %c0_39] : memref<512x128xbf16, #tpu.memory_space<vmem>>, vector<512x128xbf16>
    %cst_40 = arith.constant dense<0.000000e+00> : vector<8x128xf32>
    %54 = tpu.matmul %52, %53, %cst_40 {dimension_numbers = #tpu.dot_dimension_numbers<[1], [0], [0], [1], [0, 0, 1, 1], [], []>} : vector<8x512xbf16>, vector<512x128xbf16>, vector<8x128xf32> -> vector<8x128xf32>
    %c0_41 = arith.constant 0 : index
    %c0_42 = arith.constant 0 : index
    %55 = vector.load %arg15[%c0_41, %c0_42] : memref<1x128xf32, #tpu.memory_space<vmem>>, vector<1x128xf32>
    %56 = vector.broadcast %55 : vector<1x128xf32> to vector<8x128xf32>
    %57 = arith.addf %54, %56 : vector<8x128xf32>
    %58 = arith.truncf %29 : vector<8x128xf32> to vector<8x128xbf16>
    %c0_43 = arith.constant 0 : index
    %c0_44 = arith.constant 0 : index
    %59 = vector.load %arg16[%c0_43, %c0_44] : memref<128x512xbf16, #tpu.memory_space<vmem>>, vector<128x512xbf16>
    %cst_45 = arith.constant dense<0.000000e+00> : vector<8x512xf32>
    %60 = tpu.matmul %58, %59, %cst_45 {dimension_numbers = #tpu.dot_dimension_numbers<[1], [0], [0], [1], [0, 0, 1, 1], [], []>} : vector<8x128xbf16>, vector<128x512xbf16>, vector<8x512xf32> -> vector<8x512xf32>
    %c0_46 = arith.constant 0 : index
    %c0_47 = arith.constant 0 : index
    %61 = vector.load %arg17[%c0_46, %c0_47] : memref<1x512xf32, #tpu.memory_space<vmem>>, vector<1x512xf32>
    %62 = vector.broadcast %61 : vector<1x512xf32> to vector<8x512xf32>
    %63 = arith.addf %60, %62 : vector<8x512xf32>
    %cst_48 = arith.constant 0.000000e+00 : f32
    %64 = vector.broadcast %cst_48 : f32 to vector<8x512xf32>
    %65 = arith.cmpf oge, %63, %64 : vector<8x512xf32>
    %cst_49 = arith.constant 0.00999999977 : f32
    %66 = vector.broadcast %cst_49 : f32 to vector<8x512xf32>
    %67 = arith.mulf %66, %63 : vector<8x512xf32>
    %68 = arith.select %65, %63, %67 : vector<8x512xi1>, vector<8x512xf32>
    %69 = arith.truncf %68 : vector<8x512xf32> to vector<8x512xbf16>
    %c0_50 = arith.constant 0 : index
    %c0_51 = arith.constant 0 : index
    %70 = vector.load %arg18[%c0_50, %c0_51] : memref<512x512xbf16, #tpu.memory_space<vmem>>, vector<512x512xbf16>
    %cst_52 = arith.constant dense<0.000000e+00> : vector<8x512xf32>
    %71 = tpu.matmul %69, %70, %cst_52 {dimension_numbers = #tpu.dot_dimension_numbers<[1], [0], [0], [1], [0, 0, 1, 1], [], []>} : vector<8x512xbf16>, vector<512x512xbf16>, vector<8x512xf32> -> vector<8x512xf32>
    %c0_53 = arith.constant 0 : index
    %c0_54 = arith.constant 0 : index
    %72 = vector.load %arg19[%c0_53, %c0_54] : memref<1x512xf32, #tpu.memory_space<vmem>>, vector<1x512xf32>
    %73 = vector.broadcast %72 : vector<1x512xf32> to vector<8x512xf32>
    %74 = arith.addf %71, %73 : vector<8x512xf32>
    %cst_55 = arith.constant 0.000000e+00 : f32
    %75 = vector.broadcast %cst_55 : f32 to vector<8x512xf32>
    %76 = arith.cmpf oge, %74, %75 : vector<8x512xf32>
    %cst_56 = arith.constant 0.00999999977 : f32
    %77 = vector.broadcast %cst_56 : f32 to vector<8x512xf32>
    %78 = arith.mulf %77, %74 : vector<8x512xf32>
    %79 = arith.select %76, %74, %78 : vector<8x512xi1>, vector<8x512xf32>
    %80 = arith.truncf %79 : vector<8x512xf32> to vector<8x512xbf16>
    %c0_57 = arith.constant 0 : index
    %c0_58 = arith.constant 0 : index
    %81 = vector.load %arg20[%c0_57, %c0_58] : memref<512x128xbf16, #tpu.memory_space<vmem>>, vector<512x128xbf16>
    %cst_59 = arith.constant dense<0.000000e+00> : vector<8x128xf32>
    %82 = tpu.matmul %80, %81, %cst_59 {dimension_numbers = #tpu.dot_dimension_numbers<[1], [0], [0], [1], [0, 0, 1, 1], [], []>} : vector<8x512xbf16>, vector<512x128xbf16>, vector<8x128xf32> -> vector<8x128xf32>
    %c0_60 = arith.constant 0 : index
    %c0_61 = arith.constant 0 : index
    %83 = vector.load %arg21[%c0_60, %c0_61] : memref<1x128xf32, #tpu.memory_space<vmem>>, vector<1x128xf32>
    %84 = vector.broadcast %83 : vector<1x128xf32> to vector<8x128xf32>
    %85 = arith.addf %82, %84 : vector<8x128xf32>
    %86 = tpu.concatenate %14, %85 in 0 : vector<8x128xf32>, vector<8x128xf32> -> vector<16x128xf32>
    %87 = tpu.concatenate %29, %57 in 0 : vector<8x128xf32>, vector<8x128xf32> -> vector<16x128xf32>
    %88 = arith.truncf %86 : vector<16x128xf32> to vector<16x128xbf16>
    %c0_62 = arith.constant 0 : index
    %c0_63 = arith.constant 0 : index
    %89 = vector.load %arg22[%c0_62, %c0_63] : memref<128x256xbf16, #tpu.memory_space<vmem>>, vector<128x256xbf16>
    %cst_64 = arith.constant dense<0.000000e+00> : vector<16x256xf32>
    %90 = tpu.matmul %88, %89, %cst_64 {dimension_numbers = #tpu.dot_dimension_numbers<[1], [0], [0], [1], [0, 0, 1, 1], [], []>} : vector<16x128xbf16>, vector<128x256xbf16>, vector<16x256xf32> -> vector<16x256xf32>
    %c0_65 = arith.constant 0 : index
    %c0_66 = arith.constant 0 : index
    %91 = vector.load %arg23[%c0_65, %c0_66] : memref<1x256xf32, #tpu.memory_space<vmem>>, vector<1x256xf32>
    %92 = vector.broadcast %91 : vector<1x256xf32> to vector<16x256xf32>
    %93 = arith.addf %90, %92 : vector<16x256xf32>
    %cst_67 = arith.constant 0.000000e+00 : f32
    %94 = vector.broadcast %cst_67 : f32 to vector<16x256xf32>
    %95 = arith.maximumf %93, %94 : vector<16x256xf32>
    %96 = arith.truncf %95 : vector<16x256xf32> to vector<16x256xbf16>
    %c0_68 = arith.constant 0 : index
    %c0_69 = arith.constant 0 : index
    %97 = vector.load %arg24[%c0_68, %c0_69] : memref<256x16xbf16, #tpu.memory_space<vmem>>, vector<256x16xbf16>
    %cst_70 = arith.constant dense<0.000000e+00> : vector<16x16xf32>
    %98 = tpu.matmul %96, %97, %cst_70 {dimension_numbers = #tpu.dot_dimension_numbers<[1], [0], [0], [1], [0, 0, 1, 1], [], []>} : vector<16x256xbf16>, vector<256x16xbf16>, vector<16x16xf32> -> vector<16x16xf32>
    %c0_71 = arith.constant 0 : index
    %c0_72 = arith.constant 0 : index
    %99 = vector.load %arg25[%c0_71, %c0_72] : memref<1x16xf32, #tpu.memory_space<vmem>>, vector<1x16xf32>
    %100 = vector.broadcast %99 : vector<1x16xf32> to vector<16x16xf32>
    %101 = arith.addf %98, %100 : vector<16x16xf32>
    %102 = arith.truncf %87 : vector<16x128xf32> to vector<16x128xbf16>
    %c0_73 = arith.constant 0 : index
    %c0_74 = arith.constant 0 : index
    %103 = vector.load %arg26[%c0_73, %c0_74] : memref<128x256xbf16, #tpu.memory_space<vmem>>, vector<128x256xbf16>
    %cst_75 = arith.constant dense<0.000000e+00> : vector<16x256xf32>
    %104 = tpu.matmul %102, %103, %cst_75 {dimension_numbers = #tpu.dot_dimension_numbers<[1], [0], [0], [1], [0, 0, 1, 1], [], []>} : vector<16x128xbf16>, vector<128x256xbf16>, vector<16x256xf32> -> vector<16x256xf32>
    %c0_76 = arith.constant 0 : index
    %c0_77 = arith.constant 0 : index
    %105 = vector.load %arg27[%c0_76, %c0_77] : memref<1x256xf32, #tpu.memory_space<vmem>>, vector<1x256xf32>
    %106 = vector.broadcast %105 : vector<1x256xf32> to vector<16x256xf32>
    %107 = arith.addf %104, %106 : vector<16x256xf32>
    %cst_78 = arith.constant 0.000000e+00 : f32
    %108 = vector.broadcast %cst_78 : f32 to vector<16x256xf32>
    %109 = arith.maximumf %107, %108 : vector<16x256xf32>
    %110 = arith.truncf %109 : vector<16x256xf32> to vector<16x256xbf16>
    %c0_79 = arith.constant 0 : index
    %c0_80 = arith.constant 0 : index
    %111 = vector.load %arg28[%c0_79, %c0_80] : memref<256x16xbf16, #tpu.memory_space<vmem>>, vector<256x16xbf16>
    %cst_81 = arith.constant dense<0.000000e+00> : vector<16x16xf32>
    %112 = tpu.matmul %110, %111, %cst_81 {dimension_numbers = #tpu.dot_dimension_numbers<[1], [0], [0], [1], [0, 0, 1, 1], [], []>} : vector<16x256xbf16>, vector<256x16xbf16>, vector<16x16xf32> -> vector<16x16xf32>
    %c0_82 = arith.constant 0 : index
    %c0_83 = arith.constant 0 : index
    %113 = vector.load %arg29[%c0_82, %c0_83] : memref<1x16xf32, #tpu.memory_space<vmem>>, vector<1x16xf32>
    %114 = vector.broadcast %113 : vector<1x16xf32> to vector<16x16xf32>
    %115 = arith.addf %112, %114 : vector<16x16xf32>
    %116 = vector.extract_strided_slice %101 {offsets = [0, 0], sizes = [8, 16], strides = [1, 1]} : vector<16x16xf32> to vector<8x16xf32>
    %117 = vector.extract_strided_slice %101 {offsets = [8, 0], sizes = [8, 16], strides = [1, 1]} : vector<16x16xf32> to vector<8x16xf32>
    %118 = vector.extract_strided_slice %115 {offsets = [0, 0], sizes = [8, 16], strides = [1, 1]} : vector<16x16xf32> to vector<8x16xf32>
    %119 = vector.extract_strided_slice %115 {offsets = [8, 0], sizes = [8, 16], strides = [1, 1]} : vector<16x16xf32> to vector<8x16xf32>
    %120 = arith.truncf %101 : vector<16x16xf32> to vector<16x16xbf16>
    %c0_84 = arith.constant 0 : index
    %c0_85 = arith.constant 0 : index
    %121 = vector.load %arg30[%c0_84, %c0_85] : memref<16x16xbf16, #tpu.memory_space<vmem>>, vector<16x16xbf16>
    %cst_86 = arith.constant dense<0.000000e+00> : vector<16x16xf32>
    %122 = tpu.matmul %120, %121, %cst_86 {dimension_numbers = #tpu.dot_dimension_numbers<[1], [0], [0], [1], [0, 0, 1, 1], [], []>} : vector<16x16xbf16>, vector<16x16xbf16>, vector<16x16xf32> -> vector<16x16xf32>
    %123 = arith.truncf %115 : vector<16x16xf32> to vector<16x16xbf16>
    %c0_87 = arith.constant 0 : index
    %c0_88 = arith.constant 0 : index
    %124 = vector.load %arg31[%c0_87, %c0_88] : memref<16x16xbf16, #tpu.memory_space<vmem>>, vector<16x16xbf16>
    %cst_89 = arith.constant dense<0.000000e+00> : vector<16x16xf32>
    %125 = tpu.matmul %123, %124, %cst_89 {dimension_numbers = #tpu.dot_dimension_numbers<[1], [0], [0], [1], [0, 0, 1, 1], [], []>} : vector<16x16xbf16>, vector<16x16xbf16>, vector<16x16xf32> -> vector<16x16xf32>
    %c0_90 = arith.constant 0 : index
    %c0_91 = arith.constant 0 : index
    %126 = vector.load %arg32[%c0_90, %c0_91] : memref<1x16xf32, #tpu.memory_space<vmem>>, vector<1x16xf32>
    %127 = vector.extract_strided_slice %122 {offsets = [0, 0], sizes = [8, 16], strides = [1, 1]} : vector<16x16xf32> to vector<8x16xf32>
    %128 = vector.extract_strided_slice %122 {offsets = [8, 0], sizes = [8, 16], strides = [1, 1]} : vector<16x16xf32> to vector<8x16xf32>
    %129 = vector.extract_strided_slice %125 {offsets = [0, 0], sizes = [8, 16], strides = [1, 1]} : vector<16x16xf32> to vector<8x16xf32>
    %130 = vector.extract_strided_slice %125 {offsets = [8, 0], sizes = [8, 16], strides = [1, 1]} : vector<16x16xf32> to vector<8x16xf32>
    %131 = arith.addf %127, %129 : vector<8x16xf32>
    %132 = vector.broadcast %126 : vector<1x16xf32> to vector<8x16xf32>
    %133 = arith.addf %131, %132 : vector<8x16xf32>
    %134 = arith.addf %116, %118 : vector<8x16xf32>
    %135 = arith.mulf %133, %134 : vector<8x16xf32>
    %136 = arith.addf %128, %129 : vector<8x16xf32>
    %137 = vector.broadcast %126 : vector<1x16xf32> to vector<8x16xf32>
    %138 = arith.addf %136, %137 : vector<8x16xf32>
    %139 = arith.addf %117, %118 : vector<8x16xf32>
    %140 = arith.mulf %138, %139 : vector<8x16xf32>
    %141 = arith.addf %127, %130 : vector<8x16xf32>
    %142 = vector.broadcast %126 : vector<1x16xf32> to vector<8x16xf32>
    %143 = arith.addf %141, %142 : vector<8x16xf32>
    %144 = arith.addf %116, %119 : vector<8x16xf32>
    %145 = arith.mulf %143, %144 : vector<8x16xf32>
    %c0_92 = arith.constant 0 : index
    %c0_93 = arith.constant 0 : index
    %146 = vector.load %arg33[%c0_92, %c0_93] : memref<8x112xf32, #tpu.memory_space<vmem>>, vector<8x16xf32>
    tpu.vector_store %arg33[%c0_92, %c0_93], %116 {strides = array<i32>} : memref<8x112xf32, #tpu.memory_space<vmem>>, vector<8x16xf32>,
    %c0_94 = arith.constant 0 : index
    %c16 = arith.constant 16 : index
    %147 = vector.load %arg33[%c0_94, %c16] : memref<8x112xf32, #tpu.memory_space<vmem>>, vector<8x16xf32>
    tpu.vector_store %arg33[%c0_94, %c16], %117 {strides = array<i32>} : memref<8x112xf32, #tpu.memory_space<vmem>>, vector<8x16xf32>,
    %c0_95 = arith.constant 0 : index
    %c32 = arith.constant 32 : index
    %148 = vector.load %arg33[%c0_95, %c32] : memref<8x112xf32, #tpu.memory_space<vmem>>, vector<8x16xf32>
    tpu.vector_store %arg33[%c0_95, %c32], %118 {strides = array<i32>} : memref<8x112xf32, #tpu.memory_space<vmem>>, vector<8x16xf32>,
    %c0_96 = arith.constant 0 : index
    %c48 = arith.constant 48 : index
    %149 = vector.load %arg33[%c0_96, %c48] : memref<8x112xf32, #tpu.memory_space<vmem>>, vector<8x16xf32>
    tpu.vector_store %arg33[%c0_96, %c48], %119 {strides = array<i32>} : memref<8x112xf32, #tpu.memory_space<vmem>>, vector<8x16xf32>,
    %c0_97 = arith.constant 0 : index
    %c64 = arith.constant 64 : index
    %150 = vector.load %arg33[%c0_97, %c64] : memref<8x112xf32, #tpu.memory_space<vmem>>, vector<8x16xf32>
    tpu.vector_store %arg33[%c0_97, %c64], %135 {strides = array<i32>} : memref<8x112xf32, #tpu.memory_space<vmem>>, vector<8x16xf32>,
    %c0_98 = arith.constant 0 : index
    %c80 = arith.constant 80 : index
    %151 = vector.load %arg33[%c0_98, %c80] : memref<8x112xf32, #tpu.memory_space<vmem>>, vector<8x16xf32>
    tpu.vector_store %arg33[%c0_98, %c80], %140 {strides = array<i32>} : memref<8x112xf32, #tpu.memory_space<vmem>>, vector<8x16xf32>,
    %c0_99 = arith.constant 0 : index
    %c96 = arith.constant 96 : index
    %152 = vector.load %arg33[%c0_99, %c96] : memref<8x112xf32, #tpu.memory_space<vmem>>, vector<8x16xf32>
    tpu.vector_store %arg33[%c0_99, %c96], %145 {strides = array<i32>} : memref<8x112xf32, #tpu.memory_space<vmem>>, vector<8x16xf32>,
    return
  }
}

</mosaic_0001>

<bundles_post_ra>
// kernel: network_forward.1
= control target key start
LH: loop header
LB: loop body
LE: loop exit
PB: predicated region body
PF: predicated region fallthrough
CT: control target
= control target key end

     0   :  { %s6879_s3 = smov 2   ;;  %v6880_v0 = vmov 0   ;;  %vm227_vm0 = vcmask 1043456   ;;  %s6881_s10 = smov 4   ;;  %vm223_vm1 = vcmask 326656   ;;  %v153_v53 = vlaneseq  ;;  %s7693_s0 = inlined_call_operand.smem [shape: u32[34], index: -1, kind: input, shape index: {}] }
   0x1   :  { %s5294_s6 = sld [smem:[%s7693_s0 + %s6879_s3]]   ;;  %272 = vmatprep.mubr.bf16.mxu0 %v6880_v0  ;;  %313 = vmatprep.mubr.bf16.mxu1 %v6880_v0  ;;  %s6882_s14 = smov 6   ;;  %vm769_vm2 = vcmask 392192  }
   0x2   :  { %s1_s9 = sld [smem:[%s7693_s0]]   ;;  %s6883_s18 = smov 8   ;;  %v154_v54 = vshrl.u32 %v153_v53, 7 }
   0x3   :  { %s6935_s13 = sld [smem:[%s7693_s0 + %s6881_s10]]   ;;  %s6884_s22 = smov 3  }
   0x4   :  { %s6968_s17 = sld [smem:[%s7693_s0 + %s6882_s14]]   ;;  %v6984_v55 = vsub.s32 0, %v154_v54  ;;  %v6986_v56 = vsub.s32 2, %v154_v54  ;;  %v6988_v58 = vsub.s32 1, %v154_v54  ;;  %v6990_v59 = vsub.s32 3, %v154_v54  ;;  %s6885_s26 = smov 1  }
   0x5   :  { %s6979_s21 = sld [smem:[%s7693_s0 + %s6883_s18]]   ;;  %s6886_s30 = smov 10  }
   0x6   :  { %s5295_s25 = sld [smem:[%s7693_s0 + %s6884_s22]]   ;;  %s6887_s4 = smov 12  }
   0x7   :  { %v149_v1 = vld [vmem:[%s5294_s6 + $0x40] sm:$0xff]  ;;  %v150_v2 = vld [vmem:[%s5294_s6 + $0x48] sm:$0xff]  ;;  %s5293_s29 = sld [smem:[%s7693_s0 + %s6885_s26]]   ;;  %s6888_s8 = smov 7  }
   0x8   :  { %v5335_v3 = vcombine.high %v149_v1, %v149_v1  ;;  %v5337_v4 = vcombine.high %v150_v2, %v150_v2  ;;  %v5334_v5 = vcombine.low %v149_v1, %v149_v1  ;;  %v5336_v6 = vcombine.low %v150_v2, %v150_v2  ;;  %v6159_v7 = vld [vmem:[%s5294_s6 + $0x24] ss:$16 sps:$4 sm:$0xff]   ;;  %v6161_v8 = vld [vmem:[%s5294_s6 + $0x2c] ss:$16 sps:$4 sm:$0xff]   ;;  %v6163_v11 = vld [vmem:[%s5294_s6 + $0x20] ss:$16 sps:$4 sm:$0xff]   ;;  %s7042_s3 = sld [smem:[%s7693_s0 + %s6886_s30]]  }
   0x9   :  { %v6164_v12 = vld [vmem:[%s5294_s6 + $0x28] ss:$16 sps:$4 sm:$0xff]   ;;  %v6165_v13 = vld [vmem:[%s5294_s6 + $0x4] ss:$16 sps:$4 sm:$0xff]   ;;  %v6167_v14 = vld [vmem:[%s5294_s6 + $0xc] ss:$16 sps:$4 sm:$0xff]   ;;  %s7053_s7 = sld [smem:[%s7693_s0 + %s6887_s4]]  }
   0xa   :  { %5338 = vmatprep.subr.msk.bf16.mxu0 %vm227_vm0, %v5335_v3  ;;  %5340 = vmatprep.subr.msk.bf16.mxu1 %vm227_vm0, %v5337_v4  ;;  %v229_v9 = vsel %vm227_vm0, %v5334_v5, 0  ;;  %v235_v10 = vsel %vm227_vm0, %v5336_v6, 0  ;;  %v6169_v15 = vld [vmem:[%s5294_s6] ss:$16 sps:$4 sm:$0xff]   ;;  %v6170_v16 = vld [vmem:[%s5294_s6 + $0x8] ss:$16 sps:$4 sm:$0xff]   ;;  %s5299_s11 = sld [smem:[%s7693_s0 + %s6888_s8]]  }
   0xb   :  { %251 = vmatpush1.bf16.msra.mxu0 %v229_v9  ;;  %292 = vmatpush1.bf16.msra.mxu1 %v235_v10  ;;  %v139_v17 = vld [vmem:[%s1_s9] sm:$0xff]  ;;  %v6171_v18 = vld [vmem:[%s6935_s13 + $0x78] sm:$0xff]   ;;  %v6175_v23 = vld [vmem:[%s6935_s13 + $0x70] sm:$0xff]   ;;  %s6889_s12 = smov 5   ;;  %s6890_s16 = smov 14  }
   0xc   :  { %252 = vmatprep.subr.bf16.mxu0 %v6159_v7  ;;  %293 = vmatprep.subr.bf16.mxu1 %v6161_v8  ;;  %v6172_v19 = vld [vmem:[%s6935_s13 + $0xf8] sm:$0xff]   ;;  %v140_v21 = vpack.c.bf16 %v139_v17, %v139_v17  ;;  %v6176_v24 = vld [vmem:[%s6935_s13 + $0xf0] sm:$0xff]   ;;  %v6179_v27 = vld [vmem:[%s6935_s13 + $0x68] sm:$0xff]   ;;  %s5297_s15 = sld [smem:[%s7693_s0 + %s6889_s12]]   ;;  %s6891_s20 = smov 9  }
   0xd   :  { %v6173_v20 = vld [vmem:[%s6935_s13 + $0x38] sm:$0xff]   ;;  %v6177_v25 = vld [vmem:[%s6935_s13 + $0x30] sm:$0xff]   ;;  %v6180_v28 = vld [vmem:[%s6935_s13 + $0xe8] sm:$0xff]   ;;  %s7182_s19 = sld [smem:[%s7693_s0 + %s6890_s16]]   ;;  %s6892_s24 = smov 11  }
   0xe   :  { %v6174_v22 = vld [vmem:[%s6935_s13 + $0xb8] sm:$0xff]   ;;  %v6178_v26 = vld [vmem:[%s6935_s13 + $0xb0] sm:$0xff]   ;;  %v6181_v29 = vld [vmem:[%s6935_s13 + $0x28] sm:$0xff]   ;;  %s5301_s23 = sld [smem:[%s7693_s0 + %s6891_s20]]   ;;  %s6893_s28 = smov 16  }
   0xf   :  { %253 = vmatpush1.bf16.msra.mxu0 %v6163_v11  ;;  %294 = vmatpush1.bf16.msra.mxu1 %v6164_v12  ;;  %v6182_v30 = vld [vmem:[%s6935_s13 + $0xa8] sm:$0xff]   ;;  %v6183_v31 = vld [vmem:[%s6935_s13 + $0x60] sm:$0xff]   ;;  %v6187_v35 = vld [vmem:[%s6935_s13 + $0x58] sm:$0xff]   ;;  %s5303_s27 = sld [smem:[%s7693_s0 + %s6892_s24]]   ;;  %s6894_s2 = smov 18  }
  0x10   :  { %254 = vmatprep.subr.bf16.mxu0 %v6165_v13  ;;  %295 = vmatprep.subr.bf16.mxu1 %v6167_v14  ;;  %v6184_v32 = vld [vmem:[%s6935_s13 + $0xe0] sm:$0xff]   ;;  %v6188_v36 = vld [vmem:[%s6935_s13 + $0xd8] sm:$0xff]   ;;  %v6191_v39 = vld [vmem:[%s6935_s13 + $0x50] sm:$0xff]   ;;  %s7277_s1 = sld [smem:[%s7693_s0 + %s6893_s28]]   ;;  %s6895_s6 = smov 13  }
  0x11   :  { %v6185_v33 = vld [vmem:[%s6935_s13 + $0x20] sm:$0xff]   ;;  %v6189_v37 = vld [vmem:[%s6935_s13 + $0x18] sm:$0xff]   ;;  %v6192_v40 = vld [vmem:[%s6935_s13 + $0xd0] sm:$0xff]   ;;  %s7309_s5 = sld [smem:[%s7693_s0 + %s6894_s2]]   ;;  %s6896_s10 = smov 17  }
  0x12   :  { %v6186_v34 = vld [vmem:[%s6935_s13 + $0xa0] sm:$0xff]   ;;  %v6190_v38 = vld [vmem:[%s6935_s13 + $0x98] sm:$0xff]   ;;  %v6193_v41 = vld [vmem:[%s6935_s13 + $0x10] sm:$0xff]   ;;  %s5305_s9 = sld [smem:[%s7693_s0 + %s6895_s6]]   ;;  %s6897_s14 = smov 15  }
  0x13   :  { %255 = vmatpush1.bf16.msra.mxu0 %v6169_v15  ;;  %296 = vmatpush1.bf16.msra.mxu1 %v6170_v16  ;;  %v6194_v42 = vld [vmem:[%s6935_s13 + $0x90] sm:$0xff]   ;;  %v6195_v43 = vld [vmem:[%s6935_s13 + $0x48] sm:$0xff]   ;;  %v6199_v47 = vld [vmem:[%s6935_s13 + $0x40] sm:$0xff]   ;;  %s6898_s18 = smov 20   ;;  %s6899_s22 = smov 19  }
  0x14   :  { %5879 = vmatprep.subr.bf16.mxu0 %v6171_v18  ;;  %5901 = vmatprep.subr.bf16.mxu1 %v6172_v19  ;;  %v6196_v44 = vld [vmem:[%s6935_s13 + $0xc8] sm:$0xff]   ;;  %v6200_v48 = vld [vmem:[%s6935_s13 + $0xc0] sm:$0xff]   ;;  %v6241_v53 = vld [vmem:[%s6979_s21 + $0x50] sm:$0xff]   ;;  %s6900_s26 = smov 22  }
  0x15   :  { %v6197_v45 = vld [vmem:[%s6935_s13 + $0x8] sm:$0xff]   ;;  %v6201_v49 = vld [vmem:[%s6935_s13] sm:$0xff]   ;;  %v6242_v54 = vld [vmem:[%s6979_s21 + $0xd0] sm:$0xff]   ;;  %s7564_s30 = sld [smem:[%s7693_s0 + %s6900_s26]]  }
  0x16   :  { %5339 = vmatmul.mubr.msk.bf16.vlgmr.msra.gmra.mxu0 %vm223_vm1, %v140_v21  ;;  %5341 = vmatmul.mubr.msk.bf16.vlgmr.msra.gmra.mxu1 %vm223_vm1, %v140_v21  ;;  %v6198_v46 = vld [vmem:[%s6935_s13 + $0x88] sm:$0xff]   ;;  %v6202_v50 = vld [vmem:[%s6935_s13 + $0x80] sm:$0xff]   ;;  %s5309_s13 = sld [smem:[%s7693_s0 + %s6896_s10]]  }
  0x17   :  { %5880 = vmatpush3.bf16.msra.mxu0 %v6173_v20  ;;  %5902 = vmatpush3.bf16.msra.mxu1 %v6174_v22  ;;  %v6205_v51 = vld [vmem:[%s6968_s17 + $0x44] ss:$16 sps:$4 sm:$0xff]   ;;  %v6208_v52 = vld [vmem:[%s6968_s17 + $0x4c] ss:$16 sps:$4 sm:$0xff]   ;;  %v151_v57 = vld [vmem:[%s5295_s25] sm:$0xf]  ;;  %s5311_s25 = sld [smem:[%s7693_s0 + %s6899_s22]]  }
  0x18   :  { %5881 = vmatprep.subr.bf16.mxu0 %v6175_v23  ;;  %5903 = vmatprep.subr.bf16.mxu1 %v6176_v24  ;;  %v156_v60 = vrot.slane %v151_v57, %v6984_v55  ;;  %v164_v61 = vrot.slane %v151_v57, %v6986_v56  ;;  %v160_v62 = vrot.slane %v151_v57, %v6988_v58  ;;  %v6203_v20 = vld [vmem:[%s6968_s17 + $0x40] ss:$16 sps:$4 sm:$0xff]   ;;  %v6206_v21 = vld [vmem:[%s6968_s17 + $0x48] ss:$16 sps:$4 sm:$0xff]   ;;  %v6211_v23 = vld [vmem:[%s6968_s17 + $0x24] ss:$16 sps:$4 sm:$0xff]  }
  0x19   :  { %v168_v63 = vrot.slane %v151_v57, %v6990_v59  ;;  %v6214_v24 = vld [vmem:[%s6968_s17 + $0x2c] ss:$16 sps:$4 sm:$0xff]   ;;  %v6243_v57 = vld [vmem:[%s6979_s21 + $0x10] sm:$0xff]  }
  0x1b   :  { %5882 = vmatpush3.bf16.msra.mxu0 %v6177_v25  ;;  %5904 = vmatpush3.bf16.msra.mxu1 %v6178_v26  ;;  %v6209_v25 = vld [vmem:[%s6968_s17 + $0x20] ss:$16 sps:$4 sm:$0xff]   ;;  %v6212_v26 = vld [vmem:[%s6968_s17 + $0x28] ss:$16 sps:$4 sm:$0xff]  }
  0x1c   :  { %5883 = vmatprep.subr.bf16.mxu0 %v6179_v27  ;;  %5905 = vmatprep.subr.bf16.mxu1 %v6180_v28  ;;  %v6217_v27 = vld [vmem:[%s6968_s17 + $0x4] ss:$16 sps:$4 sm:$0xff]   ;;  %v6220_v28 = vld [vmem:[%s6968_s17 + $0xc] ss:$16 sps:$4 sm:$0xff]  }
  0x1f   :  { %5884 = vmatpush3.bf16.msra.mxu0 %v6181_v29  ;;  %5906 = vmatpush3.bf16.msra.mxu1 %v6182_v30  ;;  %v6215_v29 = vld [vmem:[%s6968_s17] ss:$16 sps:$4 sm:$0xff]   ;;  %v6218_v30 = vld [vmem:[%s6968_s17 + $0x8] ss:$16 sps:$4 sm:$0xff]   ;;  %s5307_s17 = sld [smem:[%s7693_s0 + %s6897_s14]]  }
  0x20   :  { %5885 = vmatprep.subr.bf16.mxu0 %v6183_v31  ;;  %5907 = vmatprep.subr.bf16.mxu1 %v6184_v32  ;;  %v673_v31 = vld [vmem:[%s5293_s29] sm:$0xff]  ;;  %v6221_v32 = vld [vmem:[%s6979_s21 + $0x78] sm:$0xff]  }
  0x23   :  { %5886 = vmatpush3.bf16.msra.mxu0 %v6185_v33  ;;  %5908 = vmatpush3.bf16.msra.mxu1 %v6186_v34  ;;  %v6222_v33 = vld [vmem:[%s6979_s21 + $0xf8] sm:$0xff]   ;;  %v674_v34 = vpack.c.bf16 %v673_v31, %v673_v31 }
  0x24   :  { %5887 = vmatprep.subr.bf16.mxu0 %v6187_v35  ;;  %5909 = vmatprep.subr.bf16.mxu1 %v6188_v36  ;;  %v6223_v35 = vld [vmem:[%s6979_s21 + $0x38] sm:$0xff]  }
  0x25   :  { %v6224_v36 = vld [vmem:[%s6979_s21 + $0xb8] sm:$0xff]  }
  0x27   :  { %5888 = vmatpush3.bf16.msra.mxu0 %v6189_v37  ;;  %5910 = vmatpush3.bf16.msra.mxu1 %v6190_v38  ;;  %v6225_v37 = vld [vmem:[%s6979_s21 + $0x70] sm:$0xff]  }
  0x28   :  { %5889 = vmatprep.subr.bf16.mxu0 %v6191_v39  ;;  %5911 = vmatprep.subr.bf16.mxu1 %v6192_v40  ;;  %v6226_v38 = vld [vmem:[%s6979_s21 + $0xf0] sm:$0xff]  }
  0x29   :  { %v6227_v39 = vld [vmem:[%s6979_s21 + $0x30] sm:$0xff]  }
  0x2a   :  { %v6228_v40 = vld [vmem:[%s6979_s21 + $0xb0] sm:$0xff]  }
  0x2b   :  { %5890 = vmatpush3.bf16.msra.mxu0 %v6193_v41  ;;  %5912 = vmatpush3.bf16.msra.mxu1 %v6194_v42  ;;  %v6229_v41 = vld [vmem:[%s6979_s21 + $0x68] sm:$0xff]  }
  0x2c   :  { %5891 = vmatprep.subr.bf16.mxu0 %v6195_v43  ;;  %5913 = vmatprep.subr.bf16.mxu1 %v6196_v44  ;;  %v6230_v42 = vld [vmem:[%s6979_s21 + $0xe8] sm:$0xff]  }
  0x2d   :  { %v6231_v43 = vld [vmem:[%s6979_s21 + $0x28] sm:$0xff]  }
  0x2e   :  { %v6232_v44 = vld [vmem:[%s6979_s21 + $0xa8] sm:$0xff]  }
  0x2f   :  { %5892 = vmatpush3.bf16.msra.mxu0 %v6197_v45  ;;  %5914 = vmatpush3.bf16.msra.mxu1 %v6198_v46  ;;  %v6233_v45 = vld [vmem:[%s6979_s21 + $0x60] sm:$0xff]  }
  0x30   :  { %5893 = vmatprep.subr.bf16.mxu0 %v6199_v47  ;;  %5915 = vmatprep.subr.bf16.mxu1 %v6200_v48  ;;  %v6234_v46 = vld [vmem:[%s6979_s21 + $0xe0] sm:$0xff]  }
  0x31   :  { %v6235_v47 = vld [vmem:[%s6979_s21 + $0x20] sm:$0xff]  }
  0x32   :  { %v6236_v48 = vld [vmem:[%s6979_s21 + $0xa0] sm:$0xff]  }
  0x33   :  { %5894 = vmatpush3.bf16.msra.mxu0 %v6201_v49  ;;  %5916 = vmatpush3.bf16.msra.mxu1 %v6202_v50  ;;  %v6237_v49 = vld [vmem:[%s6979_s21 + $0x58] sm:$0xff]  }
  0x34   :  { %783 = vmatprep.subr.bf16.mxu0 %v6205_v51  ;;  %824 = vmatprep.subr.bf16.mxu1 %v6208_v52  ;;  %v6238_v50 = vld [vmem:[%s6979_s21 + $0xd8] sm:$0xff]  }
  0x35   :  { %v6239_v51 = vld [vmem:[%s6979_s21 + $0x18] sm:$0xff]  }
  0x36   :  { %v6240_v52 = vld [vmem:[%s6979_s21 + $0x98] sm:$0xff]  }
  0xd6   :  { %v274_v1 = vpop.f32.mrf.mxu0  ;;  %v315_v2 = vpop.f32.mrf.mxu1 }
  0xd7   :  { %v275_v3 = vadd.f32 %v274_v1, %v156_v60  ;;  %v316_v4 = vadd.f32 %v315_v2, %v164_v61  ;;  %v6244_v60 = vld [vmem:[%s6979_s21 + $0x90] sm:$0xff]   ;;  %v6245_v61 = vld [vmem:[%s6979_s21 + $0x48] sm:$0xff]   ;;  %v6249_v2 = vld [vmem:[%s6979_s21 + $0x40] sm:$0xff]  }
  0xd8   :  { %v276_v5 = vpop.f32.mrf.mxu0  ;;  %v317_v6 = vpop.f32.mrf.mxu1  ;;  %v6248_v1 = vld [vmem:[%s6979_s21 + $0x88] sm:$0xff]  }
  0xd9   :  { %v324_v7 = vmax.f32 %v316_v4, 0.0  ;;  %v277_v8 = vadd.f32 %v276_v5, %v160_v62  ;;  %v318_v9 = vadd.f32 %v317_v6, %v168_v63  ;;  %v322_v10 = vmax.f32 %v275_v3, 0.0  ;;  %v6246_v62 = vld [vmem:[%s6979_s21 + $0xc8] sm:$0xff]   ;;  %v6250_v3 = vld [vmem:[%s6979_s21 + $0xc0] sm:$0xff]  }
  0xda   :  { %v278_v11 = vpop.f32.mrf.mxu0  ;;  %v319_v12 = vpop.f32.mrf.mxu1  ;;  %v6247_v63 = vld [vmem:[%s6979_s21 + $0x8] sm:$0xff]   ;;  %v6251_v4 = vld [vmem:[%s6979_s21] sm:$0xff]  }
  0xdb   :  { %v323_v13 = vmax.f32 %v277_v8, 0.0  ;;  %v325_v14 = vmax.f32 %v318_v9, 0.0  ;;  %v328_v15 = vpack.c.bf16 %v324_v7, %v324_v7  ;;  %v326_v22 = vpack.c.bf16 %v322_v10, %v322_v10  ;;  %v6252_v5 = vld [vmem:[%s6979_s21 + $0x80] sm:$0xff]   ;;  %v6258_v7 = vld [vmem:[%s7042_s3 + $0xec] ss:$16 sps:$4 sm:$0xff]   ;;  %s7493_s21 = sld [smem:[%s7693_s0 + %s6898_s18]]  }
  0xdc   :  { %v279_v16 = vpop.f32.mrf.mxu0  ;;  %v320_v17 = vpop.f32.mrf.mxu1  ;;  %v6255_v6 = vld [vmem:[%s7042_s3 + $0xe4] ss:$16 sps:$4 sm:$0xff]  }
  0xdd   :  { %v327_v18 = vpack.c.bf16 %v323_v13, %v323_v13  ;;  %v329_v19 = vpack.c.bf16 %v325_v14, %v325_v14  ;;  %v687_v16 = vld [vmem:[%s5299_s11] sm:$0xf] }
  0xde   :  { %v692_v17 = vrot.slane %v687_v16, %v6984_v55 }
  0xdf   :  { %625 = vmatprep.mubr.bf16.mxu0 %v327_v18  ;;  %665 = vmatprep.mubr.bf16.mxu1 %v329_v19  ;;  %v700_v18 = vrot.slane %v687_v16, %v6986_v56  ;;  %v696_v19 = vrot.slane %v687_v16, %v6988_v58 }
  0xe0   :  { %626 = vmatmul.mubr.bf16.vlgmr.msra.gmra.mxu0 %v326_v22  ;;  %666 = vmatmul.mubr.bf16.vlgmr.msra.gmra.mxu1 %v328_v15 }
  0xe1   :  { %784 = vmatpush1.bf16.msra.mxu0 %v6203_v20  ;;  %825 = vmatpush1.bf16.msra.mxu1 %v6206_v21  ;;  %v704_v20 = vrot.slane %v687_v16, %v6990_v59  ;;  %v6295_v16 = vld [vmem:[%s7042_s3] ss:$16 sps:$4 sm:$0xff]  }
  0xe2   :  { %785 = vmatprep.subr.bf16.mxu0 %v6211_v23  ;;  %826 = vmatprep.subr.bf16.mxu1 %v6214_v24 }
  0xe3   :  { %805 = vmatprep.mubr.bf16.mxu0 %v6880_v0  ;;  %846 = vmatprep.mubr.bf16.mxu1 %v6880_v0 }
  0xe5   :  { %786 = vmatpush1.bf16.msra.mxu0 %v6209_v25  ;;  %827 = vmatpush1.bf16.msra.mxu1 %v6212_v26 }
  0xe6   :  { %787 = vmatprep.subr.bf16.mxu0 %v6217_v27  ;;  %828 = vmatprep.subr.bf16.mxu1 %v6220_v28 }
  0xe9   :  { %788 = vmatpush1.bf16.msra.mxu0 %v6215_v29  ;;  %829 = vmatpush1.bf16.msra.mxu1 %v6218_v30 }
  0xea   :  { %5923 = vmatprep.subr.bf16.mxu0 %v6221_v32  ;;  %5945 = vmatprep.subr.bf16.mxu1 %v6222_v33 }
  0xec   :  { %5387 = vmatmul.mubr.msk.bf16.vlgmr.msra.gmra.mxu0 %vm769_vm2, %v674_v34  ;;  %5388 = vmatmul.mubr.msk.bf16.vlgmr.msra.gmra.mxu1 %vm769_vm2, %v674_v34 }
  0xed   :  { %5924 = vmatpush3.bf16.msra.mxu0 %v6223_v35  ;;  %5946 = vmatpush3.bf16.msra.mxu1 %v6224_v36 }
  0xee   :  { %5925 = vmatprep.subr.bf16.mxu0 %v6225_v37  ;;  %5947 = vmatprep.subr.bf16.mxu1 %v6226_v38 }
  0xf1   :  { %5926 = vmatpush3.bf16.msra.mxu0 %v6227_v39  ;;  %5948 = vmatpush3.bf16.msra.mxu1 %v6228_v40  ;;  %v6253_v40 = vld [vmem:[%s7042_s3 + $0xe0] ss:$16 sps:$4 sm:$0xff]  }
  0xf2   :  { %5927 = vmatprep.subr.bf16.mxu0 %v6229_v41  ;;  %5949 = vmatprep.subr.bf16.mxu1 %v6230_v42  ;;  %v6256_v41 = vld [vmem:[%s7042_s3 + $0xe8] ss:$16 sps:$4 sm:$0xff]  }
  0xf5   :  { %5928 = vmatpush3.bf16.msra.mxu0 %v6231_v43  ;;  %5950 = vmatpush3.bf16.msra.mxu1 %v6232_v44  ;;  %v6261_v43 = vld [vmem:[%s7042_s3 + $0xc4] ss:$16 sps:$4 sm:$0xff]   ;;  %v6264_v44 = vld [vmem:[%s7042_s3 + $0xcc] ss:$16 sps:$4 sm:$0xff]  }
  0xf6   :  { %5929 = vmatprep.subr.bf16.mxu0 %v6233_v45  ;;  %5951 = vmatprep.subr.bf16.mxu1 %v6234_v46  ;;  %v6259_v45 = vld [vmem:[%s7042_s3 + $0xc0] ss:$16 sps:$4 sm:$0xff]   ;;  %v6262_v46 = vld [vmem:[%s7042_s3 + $0xc8] ss:$16 sps:$4 sm:$0xff]  }
  0xf9   :  { %5930 = vmatpush3.bf16.msra.mxu0 %v6235_v47  ;;  %5952 = vmatpush3.bf16.msra.mxu1 %v6236_v48  ;;  %v6267_v47 = vld [vmem:[%s7042_s3 + $0xa4] ss:$16 sps:$4 sm:$0xff]   ;;  %v6270_v48 = vld [vmem:[%s7042_s3 + $0xac] ss:$16 sps:$4 sm:$0xff]  }
  0xfa   :  { %5931 = vmatprep.subr.bf16.mxu0 %v6237_v49  ;;  %5953 = vmatprep.subr.bf16.mxu1 %v6238_v50  ;;  %v6265_v49 = vld [vmem:[%s7042_s3 + $0xa0] ss:$16 sps:$4 sm:$0xff]   ;;  %v6268_v50 = vld [vmem:[%s7042_s3 + $0xa8] ss:$16 sps:$4 sm:$0xff]  }
  0xfd   :  { %5932 = vmatpush3.bf16.msra.mxu0 %v6239_v51  ;;  %5954 = vmatpush3.bf16.msra.mxu1 %v6240_v52  ;;  %v6273_v51 = vld [vmem:[%s7042_s3 + $0x84] ss:$16 sps:$4 sm:$0xff]   ;;  %v6276_v52 = vld [vmem:[%s7042_s3 + $0x8c] ss:$16 sps:$4 sm:$0xff]  }
  0xfe   :  { %5933 = vmatprep.subr.bf16.mxu0 %v6241_v53  ;;  %5955 = vmatprep.subr.bf16.mxu1 %v6242_v54  ;;  %v6271_v53 = vld [vmem:[%s7042_s3 + $0x80] ss:$16 sps:$4 sm:$0xff]   ;;  %v6274_v54 = vld [vmem:[%s7042_s3 + $0x88] ss:$16 sps:$4 sm:$0xff]  }
 0x101   :  { %5934 = vmatpush3.bf16.msra.mxu0 %v6243_v57  ;;  %5956 = vmatpush3.bf16.msra.mxu1 %v6244_v60  ;;  %v6279_v57 = vld [vmem:[%s7042_s3 + $0x64] ss:$16 sps:$4 sm:$0xff]   ;;  %v6282_v60 = vld [vmem:[%s7042_s3 + $0x6c] ss:$16 sps:$4 sm:$0xff]  }
 0x102   :  { %5935 = vmatprep.subr.bf16.mxu0 %v6245_v61  ;;  %5957 = vmatprep.subr.bf16.mxu1 %v6246_v62  ;;  %v6277_v61 = vld [vmem:[%s7042_s3 + $0x60] ss:$16 sps:$4 sm:$0xff]   ;;  %v6280_v62 = vld [vmem:[%s7042_s3 + $0x68] ss:$16 sps:$4 sm:$0xff]  }
 0x105   :  { %5936 = vmatpush3.bf16.msra.mxu0 %v6247_v63  ;;  %5958 = vmatpush3.bf16.msra.mxu1 %v6248_v1  ;;  %v6285_v63 = vld [vmem:[%s7042_s3 + $0x44] ss:$16 sps:$4 sm:$0xff]   ;;  %v6288_v1 = vld [vmem:[%s7042_s3 + $0x4c] ss:$16 sps:$4 sm:$0xff]  }
 0x106   :  { %5937 = vmatprep.subr.bf16.mxu0 %v6249_v2  ;;  %5959 = vmatprep.subr.bf16.mxu1 %v6250_v3  ;;  %v6283_v2 = vld [vmem:[%s7042_s3 + $0x40] ss:$16 sps:$4 sm:$0xff]   ;;  %v6286_v3 = vld [vmem:[%s7042_s3 + $0x48] ss:$16 sps:$4 sm:$0xff]  }
 0x109   :  { %5938 = vmatpush3.bf16.msra.mxu0 %v6251_v4  ;;  %5960 = vmatpush3.bf16.msra.mxu1 %v6252_v5  ;;  %v6291_v5 = vld [vmem:[%s7042_s3 + $0x24] ss:$16 sps:$4 sm:$0xff]  }
 0x10a   :  { %1421 = vmatprep.subr.bf16.mxu0 %v6255_v6  ;;  %1462 = vmatprep.subr.bf16.mxu1 %v6258_v7  ;;  %v6294_v6 = vld [vmem:[%s7042_s3 + $0x2c] ss:$16 sps:$4 sm:$0xff]   ;;  %v5342_v7 = vld [vmem:[%s5297_s15] ss:$0 sm:$0xff] }
 0x1a0   :  { %v7058_v8 = vpop.f32.mrf.mxu0  ;;  %v7060_v9 = vpop.f32.mrf.mxu1 }
 0x1a2   :  { %v7062_v10 = vpop.f32.mrf.mxu0  ;;  %v7064_v11 = vpop.f32.mrf.mxu1 }
 0x1a3   :  { %v5897_v4 = vadd.f32 %v7062_v10, %v7058_v8  ;;  %v6300_v8 = vld [vmem:[%s7042_s3 + $0xc] ss:$16 sps:$4 sm:$0xff]   ;;  %v5919_v10 = vadd.f32 %v7064_v11, %v7060_v9  ;;  %v6304_v9 = vld [vmem:[%s7053_s7 + $0x2e0] ss:$16 sps:$4 sm:$0xff]  }
 0x1a4   :  { %v5898_v12 = vpop.f32.mrf.mxu0  ;;  %v5920_v13 = vpop.f32.mrf.mxu1 }
 0x1a5   :  { %v6289_v12 = vld [vmem:[%s7042_s3 + $0x20] ss:$16 sps:$4 sm:$0xff]   ;;  %v6292_v13 = vld [vmem:[%s7042_s3 + $0x28] ss:$16 sps:$4 sm:$0xff]  }
 0x1a6   :  { %v5899_v14 = vpop.f32.mrf.mxu0  ;;  %v5921_v15 = vpop.f32.mrf.mxu1 }
 0x1a7   :  { %v628_v14 = vadd.f32 %v5897_v4, %v5342_v7  ;;  %v6297_v15 = vld [vmem:[%s7042_s3 + $0x4] ss:$16 sps:$4 sm:$0xff]  }
 0x1a8   :  { %v6372_v4 = vld [vmem:[%s7053_s7 + $0x384] ss:$16 sps:$4 sm:$0xff]  }
 0x1a9   :  { %v6375_v7 = vld [vmem:[%s7053_s7 + $0x164] ss:$16 sps:$4 sm:$0xff]  }
 0x1ac   :  { %v807_v21 = vpop.f32.mrf.mxu0  ;;  %v848_v22 = vpop.f32.mrf.mxu1 }
 0x1ad   :  { %v808_v23 = vadd.f32 %v807_v21, %v692_v17  ;;  %v849_v24 = vadd.f32 %v848_v22, %v700_v18  ;;  %v6298_v17 = vld [vmem:[%s7042_s3 + $0x8] ss:$16 sps:$4 sm:$0xff]   ;;  %v7109_v18 = vadd.f32 %v5919_v10, %v628_v14  ;;  %v6301_v21 = vld [vmem:[%s7053_s7 + $0xe0] ss:$16 sps:$4 sm:$0xff]   ;;  %v6309_v22 = vld [vmem:[%s7053_s7 + $0xc4] ss:$16 sps:$4 sm:$0xff]  }
 0x1ae   :  { %v809_v25 = vpop.f32.mrf.mxu0  ;;  %v850_v26 = vpop.f32.mrf.mxu1  ;;  %v6376_v14 = vld [vmem:[%s7053_s7 + $0x360] ss:$16 sps:$4 sm:$0xff]  }
 0x1af   :  { %v857_v27 = vmax.f32 %v849_v24, 0.0  ;;  %v810_v28 = vadd.f32 %v809_v25, %v696_v19  ;;  %v851_v29 = vadd.f32 %v850_v26, %v704_v20  ;;  %v855_v30 = vmax.f32 %v808_v23, 0.0  ;;  %v6303_v19 = vld [vmem:[%s7053_s7 + $0xe4] ss:$16 sps:$4 sm:$0xff]   ;;  %v6307_v24 = vld [vmem:[%s7053_s7 + $0xc0] ss:$16 sps:$4 sm:$0xff]  }
 0x1b0   :  { %v811_v31 = vpop.f32.mrf.mxu0  ;;  %v852_v32 = vpop.f32.mrf.mxu1  ;;  %v6306_v20 = vld [vmem:[%s7053_s7 + $0x2e4] ss:$16 sps:$4 sm:$0xff]   ;;  %v1206_v11 = vpack.c.bf16 %v7109_v18, %v7109_v18  ;;  %v6310_v25 = vld [vmem:[%s7053_s7 + $0x2c0] ss:$16 sps:$4 sm:$0xff]  }
 0x1b1   :  { %v856_v33 = vmax.f32 %v810_v28, 0.0  ;;  %v858_v34 = vmax.f32 %v851_v29, 0.0  ;;  %v861_v35 = vpack.c.bf16 %v857_v27, %v857_v27  ;;  %v859_v42 = vpack.c.bf16 %v855_v30, %v855_v30  ;;  %v6312_v23 = vld [vmem:[%s7053_s7 + $0x2c4] ss:$16 sps:$4 sm:$0xff]   ;;  %v6313_v28 = vld [vmem:[%s7053_s7 + $0xa0] ss:$16 sps:$4 sm:$0xff]  }
 0x1b2   :  { %v812_v36 = vpop.f32.mrf.mxu0  ;;  %v853_v37 = vpop.f32.mrf.mxu1  ;;  %v6315_v26 = vld [vmem:[%s7053_s7 + $0xa4] ss:$16 sps:$4 sm:$0xff]   ;;  %v6316_v29 = vld [vmem:[%s7053_s7 + $0x2a0] ss:$16 sps:$4 sm:$0xff]  }
 0x1b3   :  { %v860_v38 = vpack.c.bf16 %v856_v33, %v856_v33  ;;  %v862_v39 = vpack.c.bf16 %v858_v34, %v858_v34  ;;  %v6318_v27 = vld [vmem:[%s7053_s7 + $0x2a4] ss:$16 sps:$4 sm:$0xff]   ;;  %v6319_v32 = vld [vmem:[%s7053_s7 + $0x80] ss:$16 sps:$4 sm:$0xff]  }
 0x1b4   :  { %v6321_v30 = vld [vmem:[%s7053_s7 + $0x84] ss:$16 sps:$4 sm:$0xff]   ;;  %v6322_v33 = vld [vmem:[%s7053_s7 + $0x280] ss:$16 sps:$4 sm:$0xff]  }
 0x1b5   :  { %1158 = vmatprep.mubr.bf16.mxu0 %v860_v38  ;;  %1198 = vmatprep.mubr.bf16.mxu1 %v862_v39  ;;  %v6324_v31 = vld [vmem:[%s7053_s7 + $0x284] ss:$16 sps:$4 sm:$0xff]   ;;  %v6325_v36 = vld [vmem:[%s7053_s7 + $0x60] ss:$16 sps:$4 sm:$0xff]  }
 0x1b6   :  { %1159 = vmatmul.mubr.bf16.vlgmr.msra.gmra.mxu0 %v859_v42  ;;  %1199 = vmatmul.mubr.bf16.vlgmr.msra.gmra.mxu1 %v861_v35  ;;  %v6327_v34 = vld [vmem:[%s7053_s7 + $0x64] ss:$16 sps:$4 sm:$0xff]   ;;  %v6328_v37 = vld [vmem:[%s7053_s7 + $0x260] ss:$16 sps:$4 sm:$0xff]  }
 0x1b7   :  { %1422 = vmatpush1.bf16.msra.mxu0 %v6253_v40  ;;  %1463 = vmatpush1.bf16.msra.mxu1 %v6256_v41  ;;  %v6330_v35 = vld [vmem:[%s7053_s7 + $0x264] ss:$16 sps:$4 sm:$0xff]   ;;  %v6331_v40 = vld [vmem:[%s7053_s7 + $0x40] ss:$16 sps:$4 sm:$0xff]  }
 0x1b8   :  { %1423 = vmatprep.subr.bf16.mxu0 %v6261_v43  ;;  %1464 = vmatprep.subr.bf16.mxu1 %v6264_v44  ;;  %v6333_v38 = vld [vmem:[%s7053_s7 + $0x44] ss:$16 sps:$4 sm:$0xff]   ;;  %v6334_v41 = vld [vmem:[%s7053_s7 + $0x240] ss:$16 sps:$4 sm:$0xff]  }
 0x1b9   :  { %1453 = vmatprep.mubr.bf16.mxu0 %v6880_v0  ;;  %1494 = vmatprep.mubr.bf16.mxu1 %v6880_v0  ;;  %v6336_v39 = vld [vmem:[%s7053_s7 + $0x244] ss:$16 sps:$4 sm:$0xff]   ;;  %v6337_v42 = vld [vmem:[%s7053_s7 + $0x20] ss:$16 sps:$4 sm:$0xff]  }
 0x1ba   :  { %v6339_v43 = vld [vmem:[%s7053_s7 + $0x24] ss:$16 sps:$4 sm:$0xff]   ;;  %v6340_v44 = vld [vmem:[%s7053_s7 + $0x220] ss:$16 sps:$4 sm:$0xff]  }
 0x1bb   :  { %1424 = vmatpush1.bf16.msra.mxu0 %v6259_v45  ;;  %1465 = vmatpush1.bf16.msra.mxu1 %v6262_v46  ;;  %v6342_v45 = vld [vmem:[%s7053_s7 + $0x224] ss:$16 sps:$4 sm:$0xff]   ;;  %v6379_v10 = vld [vmem:[%s7053_s7 + $0x140] ss:$16 sps:$4 sm:$0xff]  }
 0x1bc   :  { %1425 = vmatprep.subr.bf16.mxu0 %v6267_v47  ;;  %1466 = vmatprep.subr.bf16.mxu1 %v6270_v48  ;;  %v6345_v46 = vld [vmem:[%s7053_s7 + $0x4] ss:$16 sps:$4 sm:$0xff]   ;;  %v6343_v48 = vld [vmem:[%s7053_s7] ss:$16 sps:$4 sm:$0xff]  }
 0x1bd   :  { %v6348_v47 = vld [vmem:[%s7053_s7 + $0x204] ss:$16 sps:$4 sm:$0xff]  }
 0x1bf   :  { %1426 = vmatpush1.bf16.msra.mxu0 %v6265_v49  ;;  %1467 = vmatpush1.bf16.msra.mxu1 %v6268_v50  ;;  %v6346_v49 = vld [vmem:[%s7053_s7 + $0x200] ss:$16 sps:$4 sm:$0xff]   ;;  %v6351_v50 = vld [vmem:[%s7053_s7 + $0x1e4] ss:$16 sps:$4 sm:$0xff]  }
 0x1c0   :  { %1427 = vmatprep.subr.bf16.mxu0 %v6273_v51  ;;  %1468 = vmatprep.subr.bf16.mxu1 %v6276_v52  ;;  %v6354_v51 = vld [vmem:[%s7053_s7 + $0x3e4] ss:$16 sps:$4 sm:$0xff]   ;;  %v6349_v52 = vld [vmem:[%s7053_s7 + $0x1e0] ss:$16 sps:$4 sm:$0xff]  }
 0x1c3   :  { %1428 = vmatpush1.bf16.msra.mxu0 %v6271_v53  ;;  %1469 = vmatpush1.bf16.msra.mxu1 %v6274_v54  ;;  %v6352_v53 = vld [vmem:[%s7053_s7 + $0x3e0] ss:$16 sps:$4 sm:$0xff]   ;;  %v6357_v54 = vld [vmem:[%s7053_s7 + $0x1c4] ss:$16 sps:$4 sm:$0xff]  }
 0x1c4   :  { %1429 = vmatprep.subr.bf16.mxu0 %v6279_v57  ;;  %1470 = vmatprep.subr.bf16.mxu1 %v6282_v60  ;;  %v6360_v57 = vld [vmem:[%s7053_s7 + $0x3c4] ss:$16 sps:$4 sm:$0xff]   ;;  %v6355_v60 = vld [vmem:[%s7053_s7 + $0x1c0] ss:$16 sps:$4 sm:$0xff]  }
 0x1c7   :  { %1430 = vmatpush1.bf16.msra.mxu0 %v6277_v61  ;;  %1471 = vmatpush1.bf16.msra.mxu1 %v6280_v62  ;;  %v6358_v61 = vld [vmem:[%s7053_s7 + $0x3c0] ss:$16 sps:$4 sm:$0xff]   ;;  %v6363_v62 = vld [vmem:[%s7053_s7 + $0x1a4] ss:$16 sps:$4 sm:$0xff]  }
 0x1c8   :  { %1431 = vmatprep.subr.bf16.mxu0 %v6285_v63  ;;  %1472 = vmatprep.subr.bf16.mxu1 %v6288_v1  ;;  %v6366_v63 = vld [vmem:[%s7053_s7 + $0x3a4] ss:$16 sps:$4 sm:$0xff]   ;;  %v6361_v1 = vld [vmem:[%s7053_s7 + $0x1a0] ss:$16 sps:$4 sm:$0xff]  }
 0x1cb   :  { %1432 = vmatpush1.bf16.msra.mxu0 %v6283_v2  ;;  %1473 = vmatpush1.bf16.msra.mxu1 %v6286_v3  ;;  %v6364_v2 = vld [vmem:[%s7053_s7 + $0x3a0] ss:$16 sps:$4 sm:$0xff]   ;;  %v6369_v3 = vld [vmem:[%s7053_s7 + $0x184] ss:$16 sps:$4 sm:$0xff]  }
 0x1cc   :  { %1433 = vmatprep.subr.bf16.mxu0 %v6291_v5  ;;  %1474 = vmatprep.subr.bf16.mxu1 %v6294_v6  ;;  %v6367_v5 = vld [vmem:[%s7053_s7 + $0x180] ss:$16 sps:$4 sm:$0xff]  }
 0x1cd   :  { %v6370_v6 = vld [vmem:[%s7053_s7 + $0x380] ss:$16 sps:$4 sm:$0xff]  }
 0x1cf   :  { %1434 = vmatpush1.bf16.msra.mxu0 %v6289_v12  ;;  %1475 = vmatpush1.bf16.msra.mxu1 %v6292_v13  ;;  %v6378_v12 = vld [vmem:[%s7053_s7 + $0x364] ss:$16 sps:$4 sm:$0xff]   ;;  %v6373_v13 = vld [vmem:[%s7053_s7 + $0x160] ss:$16 sps:$4 sm:$0xff]  }
 0x1d0   :  { %1435 = vmatprep.subr.bf16.mxu0 %v6297_v15  ;;  %1476 = vmatprep.subr.bf16.mxu1 %v6300_v8  ;;  %v6381_v15 = vld [vmem:[%s7053_s7 + $0x144] ss:$16 sps:$4 sm:$0xff]  }
 0x1d1   :  { %v6384_v8 = vld [vmem:[%s7053_s7 + $0x344] ss:$16 sps:$4 sm:$0xff]  }
 0x1d3   :  { %1436 = vmatpush1.bf16.msra.mxu0 %v6295_v16  ;;  %1477 = vmatpush1.bf16.msra.mxu1 %v6298_v17  ;;  %v6382_v16 = vld [vmem:[%s7053_s7 + $0x340] ss:$16 sps:$4 sm:$0xff]   ;;  %v6387_v17 = vld [vmem:[%s7053_s7 + $0x124] ss:$16 sps:$4 sm:$0xff]  }
 0x1d4   :  { %2309 = vmatprep.subr.bf16.mxu0 %v6303_v19  ;;  %2350 = vmatprep.subr.bf16.mxu1 %v6306_v20  ;;  %v6390_v19 = vld [vmem:[%s7053_s7 + $0x324] ss:$16 sps:$4 sm:$0xff]   ;;  %v6385_v20 = vld [vmem:[%s7053_s7 + $0x120] ss:$16 sps:$4 sm:$0xff]  }
 0x1d6   :  { %1454 = vmatmul.mubr.bf16.vlgmr.msra.gmra.mxu0 %v1206_v11  ;;  %1495 = vmatmul.mubr.bf16.vlgmr.msra.gmra.mxu1 %v1206_v11  ;;  %v6396_v11 = vld [vmem:[%s7053_s7 + $0x304] ss:$16 sps:$4 sm:$0xff]  }
 0x1d7   :  { %2310 = vmatpush1.bf16.msra.mxu0 %v6301_v21  ;;  %2351 = vmatpush1.bf16.msra.mxu1 %v6304_v9  ;;  %v6388_v21 = vld [vmem:[%s7053_s7 + $0x320] ss:$16 sps:$4 sm:$0xff]   ;;  %v6393_v9 = vld [vmem:[%s7053_s7 + $0x104] ss:$16 sps:$4 sm:$0xff]  }
 0x1d8   :  { %2311 = vmatprep.subr.bf16.mxu0 %v6309_v22  ;;  %2352 = vmatprep.subr.bf16.mxu1 %v6312_v23  ;;  %v6391_v22 = vld [vmem:[%s7053_s7 + $0x100] ss:$16 sps:$4 sm:$0xff]  }
 0x1d9   :  { %v6394_v23 = vld [vmem:[%s7053_s7 + $0x300] ss:$16 sps:$4 sm:$0xff]  }
 0x1db   :  { %2312 = vmatpush1.bf16.msra.mxu0 %v6307_v24  ;;  %2353 = vmatpush1.bf16.msra.mxu1 %v6310_v25  ;;  %v6399_v24 = vld [vmem:[%s7053_s7 + $0xec] ss:$16 sps:$4 sm:$0xff]  }
 0x1dc   :  { %2313 = vmatprep.subr.bf16.mxu0 %v6315_v26  ;;  %2354 = vmatprep.subr.bf16.mxu1 %v6318_v27  ;;  %v6402_v25 = vld [vmem:[%s7053_s7 + $0x2ec] ss:$16 sps:$4 sm:$0xff]  }
 0x1df   :  { %2314 = vmatpush1.bf16.msra.mxu0 %v6313_v28  ;;  %2355 = vmatpush1.bf16.msra.mxu1 %v6316_v29  ;;  %v5389_v28 = vld [vmem:[%s5301_s23] ss:$0 sm:$0xff] }
 0x1e0   :  { %2315 = vmatprep.subr.bf16.mxu0 %v6321_v30  ;;  %2356 = vmatprep.subr.bf16.mxu1 %v6324_v31 }
 0x1e3   :  { %2316 = vmatpush1.bf16.msra.mxu0 %v6319_v32  ;;  %2357 = vmatpush1.bf16.msra.mxu1 %v6322_v33 }
 0x1e4   :  { %2317 = vmatprep.subr.bf16.mxu0 %v6327_v34  ;;  %2358 = vmatprep.subr.bf16.mxu1 %v6330_v35 }
 0x1e7   :  { %2318 = vmatpush1.bf16.msra.mxu0 %v6325_v36  ;;  %2359 = vmatpush1.bf16.msra.mxu1 %v6328_v37 }
 0x1e8   :  { %2319 = vmatprep.subr.bf16.mxu0 %v6333_v38  ;;  %2360 = vmatprep.subr.bf16.mxu1 %v6336_v39  ;;  %v1239_v39 = vld [vmem:[%s5303_s27] sm:$0xf] }
 0x1eb   :  { %2320 = vmatpush1.bf16.msra.mxu0 %v6331_v40  ;;  %2361 = vmatpush1.bf16.msra.mxu1 %v6334_v41  ;;  %v1244_v40 = vrot.slane %v1239_v39, %v6984_v55  ;;  %v1252_v41 = vrot.slane %v1239_v39, %v6986_v56 }
 0x1ec   :  { %2321 = vmatprep.subr.bf16.mxu0 %v6339_v43  ;;  %2362 = vmatprep.subr.bf16.mxu1 %v6342_v45  ;;  %v1256_v45 = vrot.slane %v1239_v39, %v6990_v59 }
 0x1ef   :  { %2322 = vmatpush1.bf16.msra.mxu0 %v6337_v42  ;;  %2363 = vmatpush1.bf16.msra.mxu1 %v6340_v44  ;;  %v1248_v44 = vrot.slane %v1239_v39, %v6988_v58  ;;  %v6439_v39 = vld [vmem:[%s7053_s7 + $0x8] ss:$16 sps:$4 sm:$0xff]  }
 0x1f0   :  { %2323 = vmatprep.subr.bf16.mxu0 %v6345_v46  ;;  %2364 = vmatprep.subr.bf16.mxu1 %v6348_v47 }
 0x1f3   :  { %2324 = vmatpush1.bf16.msra.mxu0 %v6343_v48  ;;  %2365 = vmatpush1.bf16.msra.mxu1 %v6346_v49 }
 0x1f4   :  { %2325 = vmatprep.subr.bf16.mxu0 %v6351_v50  ;;  %2366 = vmatprep.subr.bf16.mxu1 %v6354_v51 }
 0x1f7   :  { %2326 = vmatpush2.bf16.msra.mxu0 %v6349_v52  ;;  %2367 = vmatpush2.bf16.msra.mxu1 %v6352_v53 }
 0x1f8   :  { %2327 = vmatprep.subr.bf16.mxu0 %v6357_v54  ;;  %2368 = vmatprep.subr.bf16.mxu1 %v6360_v57 }
 0x1fb   :  { %2328 = vmatpush2.bf16.msra.mxu0 %v6355_v60  ;;  %2369 = vmatpush2.bf16.msra.mxu1 %v6358_v61 }
 0x1fc   :  { %2329 = vmatprep.subr.bf16.mxu0 %v6363_v62  ;;  %2370 = vmatprep.subr.bf16.mxu1 %v6366_v63 }
 0x1ff   :  { %2330 = vmatpush2.bf16.msra.mxu0 %v6361_v1  ;;  %2371 = vmatpush2.bf16.msra.mxu1 %v6364_v2 }
 0x200   :  { %2331 = vmatprep.subr.bf16.mxu0 %v6369_v3  ;;  %2372 = vmatprep.subr.bf16.mxu1 %v6372_v4 }
 0x203   :  { %2332 = vmatpush2.bf16.msra.mxu0 %v6367_v5  ;;  %2373 = vmatpush2.bf16.msra.mxu1 %v6370_v6  ;;  %v6397_v6 = vld [vmem:[%s7053_s7 + $0xe8] ss:$16 sps:$4 sm:$0xff]  }
 0x204   :  { %2333 = vmatprep.subr.bf16.mxu0 %v6375_v7  ;;  %2374 = vmatprep.subr.bf16.mxu1 %v6378_v12 }
 0x207   :  { %2334 = vmatpush2.bf16.msra.mxu0 %v6373_v13  ;;  %2375 = vmatpush2.bf16.msra.mxu1 %v6376_v14  ;;  %v6400_v13 = vld [vmem:[%s7053_s7 + $0x2e8] ss:$16 sps:$4 sm:$0xff]  }
 0x208   :  { %2335 = vmatprep.subr.bf16.mxu0 %v6381_v15  ;;  %2376 = vmatprep.subr.bf16.mxu1 %v6384_v8  ;;  %v6405_v15 = vld [vmem:[%s7053_s7 + $0xcc] ss:$16 sps:$4 sm:$0xff]  }
 0x209   :  { %v6408_v8 = vld [vmem:[%s7053_s7 + $0x2cc] ss:$16 sps:$4 sm:$0xff]  }
 0x20b   :  { %2336 = vmatpush2.bf16.msra.mxu0 %v6379_v10  ;;  %2377 = vmatpush2.bf16.msra.mxu1 %v6382_v16  ;;  %v6403_v10 = vld [vmem:[%s7053_s7 + $0xc8] ss:$16 sps:$4 sm:$0xff]  }
 0x20c   :  { %2337 = vmatprep.subr.bf16.mxu0 %v6387_v17  ;;  %2378 = vmatprep.subr.bf16.mxu1 %v6390_v19  ;;  %v6406_v16 = vld [vmem:[%s7053_s7 + $0x2c8] ss:$16 sps:$4 sm:$0xff]   ;;  %v6411_v17 = vld [vmem:[%s7053_s7 + $0xac] ss:$16 sps:$4 sm:$0xff]  }
 0x20d   :  { %v6414_v19 = vld [vmem:[%s7053_s7 + $0x2ac] ss:$16 sps:$4 sm:$0xff]  }
 0x20f   :  { %2338 = vmatpush2.bf16.msra.mxu0 %v6385_v20  ;;  %2379 = vmatpush2.bf16.msra.mxu1 %v6388_v21  ;;  %v6409_v20 = vld [vmem:[%s7053_s7 + $0xa8] ss:$16 sps:$4 sm:$0xff]  }
 0x210   :  { %2339 = vmatprep.subr.bf16.mxu0 %v6393_v9  ;;  %2380 = vmatprep.subr.bf16.mxu1 %v6396_v11  ;;  %v6412_v21 = vld [vmem:[%s7053_s7 + $0x2a8] ss:$16 sps:$4 sm:$0xff]   ;;  %v6417_v9 = vld [vmem:[%s7053_s7 + $0x8c] ss:$16 sps:$4 sm:$0xff]  }
 0x211   :  { %v6420_v11 = vld [vmem:[%s7053_s7 + $0x28c] ss:$16 sps:$4 sm:$0xff]  }
 0x213   :  { %2340 = vmatpush2.bf16.msra.mxu0 %v6391_v22  ;;  %2381 = vmatpush2.bf16.msra.mxu1 %v6394_v23  ;;  %v6415_v22 = vld [vmem:[%s7053_s7 + $0x88] ss:$16 sps:$4 sm:$0xff]  }
 0x214   :  { %2391 = vmatprep.subr.bf16.mxu0 %v6399_v24  ;;  %2432 = vmatprep.subr.bf16.mxu1 %v6402_v25  ;;  %v6418_v23 = vld [vmem:[%s7053_s7 + $0x288] ss:$16 sps:$4 sm:$0xff]   ;;  %v6423_v24 = vld [vmem:[%s7053_s7 + $0x6c] ss:$16 sps:$4 sm:$0xff]  }
 0x215   :  { %v6426_v25 = vld [vmem:[%s7053_s7 + $0x26c] ss:$16 sps:$4 sm:$0xff]  }
 0x276   :  { %v5939_v26 = vpop.f32.mrf.mxu0  ;;  %v5961_v27 = vpop.f32.mrf.mxu1 }
 0x278   :  { %v5940_v29 = vpop.f32.mrf.mxu0  ;;  %v5962_v30 = vpop.f32.mrf.mxu1 }
 0x279   :  { %v5941_v31 = vadd.f32 %v5940_v29, %v5939_v26  ;;  %v5963_v32 = vadd.f32 %v5962_v30, %v5961_v27  ;;  %v6421_v26 = vld [vmem:[%s7053_s7 + $0x68] ss:$16 sps:$4 sm:$0xff]   ;;  %v6432_v29 = vld [vmem:[%s7053_s7 + $0x24c] ss:$16 sps:$4 sm:$0xff]  }
 0x27a   :  { %v5942_v33 = vpop.f32.mrf.mxu0  ;;  %v5964_v34 = vpop.f32.mrf.mxu1  ;;  %v6424_v27 = vld [vmem:[%s7053_s7 + $0x268] ss:$16 sps:$4 sm:$0xff]  }
 0x27b   :  { %v1161_v35 = vadd.f32 %v5941_v31, %v5389_v28  ;;  %v6429_v28 = vld [vmem:[%s7053_s7 + $0x4c] ss:$16 sps:$4 sm:$0xff]   ;;  %v6427_v30 = vld [vmem:[%s7053_s7 + $0x48] ss:$16 sps:$4 sm:$0xff]  }
 0x27c   :  { %v5943_v36 = vpop.f32.mrf.mxu0  ;;  %v5965_v37 = vpop.f32.mrf.mxu1  ;;  %v6430_v31 = vld [vmem:[%s7053_s7 + $0x248] ss:$16 sps:$4 sm:$0xff]   ;;  %v6438_v33 = vld [vmem:[%s7053_s7 + $0x22c] ss:$16 sps:$4 sm:$0xff]  }
 0x27d   :  { %v7187_v38 = vadd.f32 %v5963_v32, %v1161_v35  ;;  %v6435_v32 = vld [vmem:[%s7053_s7 + $0x2c] ss:$16 sps:$4 sm:$0xff]   ;;  %v6433_v34 = vld [vmem:[%s7053_s7 + $0x28] ss:$16 sps:$4 sm:$0xff]  }
 0x27e   :  { %v6436_v35 = vld [vmem:[%s7053_s7 + $0x228] ss:$16 sps:$4 sm:$0xff]   ;;  %v6441_v36 = vld [vmem:[%s7053_s7 + $0xc] ss:$16 sps:$4 sm:$0xff]  }
 0x27f   :  { %v6444_v37 = vld [vmem:[%s7053_s7 + $0x20c] ss:$16 sps:$4 sm:$0xff]  }
 0x296   :  { %v1455_v42 = vpop.f32.mrf.mxu0  ;;  %v1496_v43 = vpop.f32.mrf.mxu1 }
 0x297   :  { %v1456_v46 = vadd.f32 %v1455_v42, %v1244_v40  ;;  %v1497_v47 = vadd.f32 %v1496_v43, %v1252_v41  ;;  %v6442_v40 = vld [vmem:[%s7053_s7 + $0x208] ss:$16 sps:$4 sm:$0xff]   ;;  %v6447_v41 = vld [vmem:[%s7053_s7 + $0x1ec] ss:$16 sps:$4 sm:$0xff]  }
 0x298   :  { %v1457_v48 = vpop.f32.mrf.mxu0  ;;  %v1498_v49 = vpop.f32.mrf.mxu1  ;;  %v6450_v42 = vld [vmem:[%s7053_s7 + $0x3ec] ss:$16 sps:$4 sm:$0xff]   ;;  %v6445_v43 = vld [vmem:[%s7053_s7 + $0x1e8] ss:$16 sps:$4 sm:$0xff]  }
 0x299   :  { %v1507_v50 = vmul.f32 0.01, %v1456_v46  ;;  %vm1503_vm3 = vcmp.ge.f32.partialorder %v1456_v46, 0.0  ;;  %v1509_v51 = vmul.f32 0.01, %v1497_v47  ;;  %v1458_v52 = vadd.f32 %v1457_v48, %v1248_v44 }
 0x29a   :  { %v1499_v53 = vadd.f32 %v1498_v49, %v1256_v45  ;;  %v1459_v54 = vpop.f32.mrf.mxu0  ;;  %v1500_v57 = vpop.f32.mrf.mxu1  ;;  %vm1505_vm4 = vcmp.ge.f32.partialorder %v1497_v47, 0.0  ;;  %v6448_v44 = vld [vmem:[%s7053_s7 + $0x3e8] ss:$16 sps:$4 sm:$0xff]   ;;  %v6453_v45 = vld [vmem:[%s7053_s7 + $0x1cc] ss:$16 sps:$4 sm:$0xff]  }
 0x29b   :  { %vm1504_vm5 = vcmp.ge.f32.partialorder %v1458_v52, 0.0  ;;  %v1508_v60 = vmul.f32 0.01, %v1458_v52  ;;  %v1511_v63 = vsel %vm1503_vm3, %v1456_v46, %v1507_v50  ;;  %v1513_v2 = vsel %vm1505_vm4, %v1497_v47, %v1509_v51  ;;  %v6456_v46 = vld [vmem:[%s7053_s7 + $0x3cc] ss:$16 sps:$4 sm:$0xff]  }
 0x29c   :  { %v1460_v61 = vpop.f32.mrf.mxu0  ;;  %v1501_v62 = vpop.f32.mrf.mxu1  ;;  %vm1506_vm6 = vcmp.ge.f32.partialorder %v1499_v53, 0.0  ;;  %v1510_v1 = vmul.f32 0.01, %v1499_v53  ;;  %v7197_v7 = vpack.c.bf16 %v1511_v63, %v1511_v63  ;;  %v7200_v14 = vpack.c.bf16 %v1513_v2, %v1513_v2  ;;  %v6451_v47 = vld [vmem:[%s7053_s7 + $0x1c8] ss:$16 sps:$4 sm:$0xff]  }
 0x29d   :  { %v1512_v3 = vsel %vm1504_vm5, %v1458_v52, %v1508_v60  ;;  %v6454_v48 = vld [vmem:[%s7053_s7 + $0x3c8] ss:$16 sps:$4 sm:$0xff]   ;;  %v6459_v49 = vld [vmem:[%s7053_s7 + $0x1ac] ss:$16 sps:$4 sm:$0xff]   ;;  %vm6909_vm3 = vmmov 0   ;;  %vm5135_vm4 = vcmask 130048  }
 0x29e   :  { %v1516_v4 = vpack.c.bf16 %v1512_v3, %v1512_v3  ;;  %v1514_v5 = vsel %vm1506_vm6, %v1499_v53, %v1510_v1  ;;  %v6462_v50 = vld [vmem:[%s7053_s7 + $0x3ac] ss:$16 sps:$4 sm:$0xff]   ;;  %v6457_v51 = vld [vmem:[%s7053_s7 + $0x1a8] ss:$16 sps:$4 sm:$0xff]   ;;  %vm5257_vm5 = vcmask 261248   ;;  %vm5263_vm6 = vcmask 392448  }
 0x29f   :  { %v1518_v12 = vpack.c.bf16 %v1514_v5, %v1514_v5  ;;  %v6460_v52 = vld [vmem:[%s7053_s7 + $0x3a8] ss:$16 sps:$4 sm:$0xff]   ;;  %v6465_v53 = vld [vmem:[%s7053_s7 + $0x18c] ss:$16 sps:$4 sm:$0xff]  }
 0x2a0   :  { %2341 = vmatprep.mubr.bf16.mxu0 %v1516_v4  ;;  %v6468_v54 = vld [vmem:[%s7053_s7 + $0x38c] ss:$16 sps:$4 sm:$0xff]   ;;  %v6463_v57 = vld [vmem:[%s7053_s7 + $0x188] ss:$16 sps:$4 sm:$0xff]  }
 0x2a1   :  { %2382 = vmatprep.mubr.bf16.mxu1 %v1518_v12  ;;  %2342 = vmatmul.mubr.bf16.vlgmr.msra.gmra.mxu0 %v7197_v7  ;;  %v6466_v60 = vld [vmem:[%s7053_s7 + $0x388] ss:$16 sps:$4 sm:$0xff]   ;;  %v6471_v61 = vld [vmem:[%s7053_s7 + $0x16c] ss:$16 sps:$4 sm:$0xff]  }
 0x2a2   :  { %2383 = vmatmul.mubr.bf16.vlgmr.msra.gmra.mxu1 %v7200_v14  ;;  %2392 = vmatpush1.bf16.msra.mxu0 %v6397_v6  ;;  %v6474_v62 = vld [vmem:[%s7053_s7 + $0x36c] ss:$16 sps:$4 sm:$0xff]   ;;  %v6469_v63 = vld [vmem:[%s7053_s7 + $0x168] ss:$16 sps:$4 sm:$0xff]  }
 0x2a3   :  { %2433 = vmatpush1.bf16.msra.mxu1 %v6400_v13  ;;  %2423 = vmatprep.mubr.bf16.mxu0 %v1516_v4  ;;  %v6472_v1 = vld [vmem:[%s7053_s7 + $0x368] ss:$16 sps:$4 sm:$0xff]   ;;  %v6477_v2 = vld [vmem:[%s7053_s7 + $0x14c] ss:$16 sps:$4 sm:$0xff]  }
 0x2a4   :  { %2464 = vmatprep.mubr.bf16.mxu1 %v1518_v12  ;;  %2393 = vmatprep.subr.bf16.mxu0 %v6405_v15  ;;  %v6480_v3 = vld [vmem:[%s7053_s7 + $0x34c] ss:$16 sps:$4 sm:$0xff]   ;;  %v6475_v4 = vld [vmem:[%s7053_s7 + $0x148] ss:$16 sps:$4 sm:$0xff]  }
 0x2a5   :  { %2434 = vmatprep.subr.bf16.mxu1 %v6408_v8  ;;  %v6478_v5 = vld [vmem:[%s7053_s7 + $0x348] ss:$16 sps:$4 sm:$0xff]   ;;  %v6483_v6 = vld [vmem:[%s7053_s7 + $0x12c] ss:$16 sps:$4 sm:$0xff]  }
 0x2a6   :  { %2394 = vmatpush1.bf16.msra.mxu0 %v6403_v10  ;;  %v6486_v12 = vld [vmem:[%s7053_s7 + $0x32c] ss:$16 sps:$4 sm:$0xff]   ;;  %v6481_v13 = vld [vmem:[%s7053_s7 + $0x128] ss:$16 sps:$4 sm:$0xff]  }
 0x2a7   :  { %2435 = vmatpush1.bf16.msra.mxu1 %v6406_v16  ;;  %2395 = vmatprep.subr.bf16.mxu0 %v6411_v17  ;;  %v6484_v15 = vld [vmem:[%s7053_s7 + $0x328] ss:$16 sps:$4 sm:$0xff]   ;;  %v6489_v8 = vld [vmem:[%s7053_s7 + $0x10c] ss:$16 sps:$4 sm:$0xff]  }
 0x2a8   :  { %2436 = vmatprep.subr.bf16.mxu1 %v6414_v19  ;;  %v6492_v10 = vld [vmem:[%s7053_s7 + $0x30c] ss:$16 sps:$4 sm:$0xff]   ;;  %v6487_v16 = vld [vmem:[%s7053_s7 + $0x108] ss:$16 sps:$4 sm:$0xff]  }
 0x2a9   :  { %v6490_v17 = vld [vmem:[%s7053_s7 + $0x308] ss:$16 sps:$4 sm:$0xff]  }
 0x2aa   :  { %2396 = vmatpush1.bf16.msra.mxu0 %v6409_v20  ;;  %v6493_v19 = vld [vmem:[%s7182_s19 + $0x78] sm:$0xff]  }
 0x2ab   :  { %2437 = vmatpush1.bf16.msra.mxu1 %v6412_v21  ;;  %2397 = vmatprep.subr.bf16.mxu0 %v6417_v9  ;;  %v6494_v20 = vld [vmem:[%s7182_s19 + $0x38] sm:$0xff]   ;;  %v6495_v21 = vld [vmem:[%s7182_s19 + $0x70] sm:$0xff]  }
 0x2ac   :  { %2438 = vmatprep.subr.bf16.mxu1 %v6420_v11  ;;  %v6496_v9 = vld [vmem:[%s7182_s19 + $0x30] sm:$0xff]   ;;  %v6497_v11 = vld [vmem:[%s7182_s19 + $0x68] sm:$0xff]  }
 0x2ae   :  { %2398 = vmatpush1.bf16.msra.mxu0 %v6415_v22  ;;  %v6498_v22 = vld [vmem:[%s7182_s19 + $0x28] sm:$0xff]  }
 0x2af   :  { %2439 = vmatpush1.bf16.msra.mxu1 %v6418_v23  ;;  %2399 = vmatprep.subr.bf16.mxu0 %v6423_v24  ;;  %v6499_v23 = vld [vmem:[%s7182_s19 + $0x60] sm:$0xff]   ;;  %v6502_v24 = vld [vmem:[%s7182_s19 + $0x18] sm:$0xff]  }
 0x2b0   :  { %2440 = vmatprep.subr.bf16.mxu1 %v6426_v25  ;;  %v6503_v25 = vld [vmem:[%s7182_s19 + $0x50] sm:$0xff]  }
 0x2b2   :  { %2400 = vmatpush1.bf16.msra.mxu0 %v6421_v26  ;;  %v6504_v26 = vld [vmem:[%s7182_s19 + $0x10] sm:$0xff]  }
 0x2b3   :  { %2441 = vmatpush1.bf16.msra.mxu1 %v6424_v27  ;;  %2401 = vmatprep.subr.bf16.mxu0 %v6429_v28  ;;  %v6505_v27 = vld [vmem:[%s7182_s19 + $0x48] sm:$0xff]  }
 0x2b4   :  { %2442 = vmatprep.subr.bf16.mxu1 %v6432_v29  ;;  %v6506_v28 = vld [vmem:[%s7182_s19 + $0x8] sm:$0xff]   ;;  %v6507_v29 = vld [vmem:[%s7182_s19 + $0x40] sm:$0xff]  }
 0x2b6   :  { %2402 = vmatpush1.bf16.msra.mxu0 %v6427_v30  ;;  %v6508_v30 = vld [vmem:[%s7182_s19] sm:$0xff]  }
 0x2b7   :  { %2443 = vmatpush1.bf16.msra.mxu1 %v6430_v31  ;;  %2403 = vmatprep.subr.bf16.mxu0 %v6435_v32  ;;  %v6511_v31 = vld [vmem:[%s7277_s1 + $0xe4] ss:$16 sps:$4 sm:$0xff]   ;;  %v6533_v32 = vld [vmem:[%s7182_s19 + $0xf8] sm:$0xff]  }
 0x2b8   :  { %2444 = vmatprep.subr.bf16.mxu1 %v6438_v33  ;;  %v6534_v33 = vld [vmem:[%s7182_s19 + $0xb8] sm:$0xff]  }
 0x2ba   :  { %2404 = vmatpush1.bf16.msra.mxu0 %v6433_v34  ;;  %v6535_v34 = vld [vmem:[%s7182_s19 + $0xf0] sm:$0xff]  }
 0x2bb   :  { %2445 = vmatpush1.bf16.msra.mxu1 %v6436_v35  ;;  %2405 = vmatprep.subr.bf16.mxu0 %v6441_v36  ;;  %v6536_v35 = vld [vmem:[%s7182_s19 + $0xb0] sm:$0xff]   ;;  %v6537_v36 = vld [vmem:[%s7182_s19 + $0xe8] sm:$0xff]  }
 0x2bc   :  { %2446 = vmatprep.subr.bf16.mxu1 %v6444_v37  ;;  %v6538_v37 = vld [vmem:[%s7182_s19 + $0xa8] sm:$0xff]  }
 0x2be   :  { %2406 = vmatpush1.bf16.msra.mxu0 %v6439_v39  ;;  %v6539_v39 = vld [vmem:[%s7182_s19 + $0xe0] sm:$0xff]  }
 0x2bf   :  { %2447 = vmatpush1.bf16.msra.mxu1 %v6442_v40  ;;  %2407 = vmatprep.subr.bf16.mxu0 %v6447_v41  ;;  %v6540_v40 = vld [vmem:[%s7182_s19 + $0xa0] sm:$0xff]   ;;  %v6541_v41 = vld [vmem:[%s7182_s19 + $0xd8] sm:$0xff]  }
 0x2c0   :  { %2448 = vmatprep.subr.bf16.mxu1 %v6450_v42  ;;  %v6542_v42 = vld [vmem:[%s7182_s19 + $0x98] sm:$0xff]  }
 0x2c2   :  { %2408 = vmatpush2.bf16.msra.mxu0 %v6445_v43  ;;  %v6543_v43 = vld [vmem:[%s7182_s19 + $0xd0] sm:$0xff]  }
 0x2c3   :  { %2449 = vmatpush2.bf16.msra.mxu1 %v6448_v44  ;;  %2409 = vmatprep.subr.bf16.mxu0 %v6453_v45  ;;  %v6544_v44 = vld [vmem:[%s7182_s19 + $0x90] sm:$0xff]   ;;  %v6545_v45 = vld [vmem:[%s7182_s19 + $0xc8] sm:$0xff]  }
 0x2c4   :  { %2450 = vmatprep.subr.bf16.mxu1 %v6456_v46  ;;  %v6546_v46 = vld [vmem:[%s7182_s19 + $0x88] sm:$0xff]  }
 0x2c6   :  { %2410 = vmatpush2.bf16.msra.mxu0 %v6451_v47  ;;  %v6547_v47 = vld [vmem:[%s7182_s19 + $0xc0] sm:$0xff]  }
 0x2c7   :  { %2451 = vmatpush2.bf16.msra.mxu1 %v6454_v48  ;;  %2411 = vmatprep.subr.bf16.mxu0 %v6459_v49  ;;  %v6548_v48 = vld [vmem:[%s7182_s19 + $0x80] sm:$0xff]   ;;  %v6551_v49 = vld [vmem:[%s7277_s1 + $0xec] ss:$16 sps:$4 sm:$0xff]  }
 0x2c8   :  { %2452 = vmatprep.subr.bf16.mxu1 %v6462_v50  ;;  %v7314_v50 = vld [vmem:[%s5305_s9] sm:$0xf]  ;;  %s6903_s9 = smov 21  }
 0x2c9   :  { %s5313_s12 = sld [smem:[%s7693_s0 + %s6903_s9]]  }
 0x2ca   :  { %2412 = vmatpush2.bf16.msra.mxu0 %v6457_v51  ;;  %v1652_v51 = vrot.slane %v7314_v50, %v6984_v55 }
 0x2cb   :  { %2453 = vmatpush2.bf16.msra.mxu1 %v6460_v52  ;;  %2413 = vmatprep.subr.bf16.mxu0 %v6465_v53  ;;  %v1656_v52 = vrot.slane %v7314_v50, %v6988_v58 }
 0x2cc   :  { %2454 = vmatprep.subr.bf16.mxu1 %v6468_v54 }
 0x2ce   :  { %2414 = vmatpush2.bf16.msra.mxu0 %v6463_v57 }
 0x2cf   :  { %2455 = vmatpush2.bf16.msra.mxu1 %v6466_v60  ;;  %2415 = vmatprep.subr.bf16.mxu0 %v6471_v61 }
 0x2d0   :  { %2456 = vmatprep.subr.bf16.mxu1 %v6474_v62 }
 0x2d2   :  { %2416 = vmatpush2.bf16.msra.mxu0 %v6469_v63 }
 0x2d3   :  { %2457 = vmatpush2.bf16.msra.mxu1 %v6472_v1  ;;  %2417 = vmatprep.subr.bf16.mxu0 %v6477_v2 }
 0x2d4   :  { %2458 = vmatprep.subr.bf16.mxu1 %v6480_v3 }
 0x2d6   :  { %2418 = vmatpush2.bf16.msra.mxu0 %v6475_v4 }
 0x2d7   :  { %2459 = vmatpush2.bf16.msra.mxu1 %v6478_v5  ;;  %2419 = vmatprep.subr.bf16.mxu0 %v6483_v6 }
 0x2d8   :  { %2460 = vmatprep.subr.bf16.mxu1 %v6486_v12 }
 0x2da   :  { %2420 = vmatpush2.bf16.msra.mxu0 %v6481_v13 }
 0x2db   :  { %2461 = vmatpush2.bf16.msra.mxu1 %v6484_v15  ;;  %2421 = vmatprep.subr.bf16.mxu0 %v6489_v8  ;;  %v6509_v15 = vld [vmem:[%s7277_s1 + $0xe0] ss:$16 sps:$4 sm:$0xff]  }
 0x2dc   :  { %2462 = vmatprep.subr.bf16.mxu1 %v6492_v10  ;;  %v6514_v10 = vld [vmem:[%s7277_s1 + $0xc4] ss:$16 sps:$4 sm:$0xff]  }
 0x2de   :  { %2422 = vmatpush2.bf16.msra.mxu0 %v6487_v16 }
 0x2df   :  { %2463 = vmatpush2.bf16.msra.mxu1 %v6490_v17  ;;  %5967 = vmatprep.subr.bf16.mxu0 %v6493_v19  ;;  %v6512_v19 = vld [vmem:[%s7277_s1 + $0xc0] ss:$16 sps:$4 sm:$0xff]  }
 0x2e0   :  { %5989 = vmatprep.subr.bf16.mxu1 %v6533_v32  ;;  %v6576_v32 = vld [vmem:[%s7309_s5 + $0xc0] ss:$16 sps:$4 sm:$0xff]  }
 0x2e1   :  { %2424 = vmatmul.mubr.bf16.vlgmr.msra.gmra.mxu0 %v7197_v7  ;;  %v6500_v7 = vld [vmem:[%s7182_s19 + $0x20] sm:$0xff]  }
 0x2e2   :  { %2465 = vmatmul.mubr.bf16.vlgmr.msra.gmra.mxu1 %v7200_v14  ;;  %5968 = vmatpush3.bf16.msra.mxu0 %v6494_v20  ;;  %v6501_v14 = vld [vmem:[%s7182_s19 + $0x58] sm:$0xff]   ;;  %v6517_v20 = vld [vmem:[%s7277_s1 + $0xa4] ss:$16 sps:$4 sm:$0xff]  }
 0x2e3   :  { %5969 = vmatprep.subr.bf16.mxu0 %v6495_v21  ;;  %5990 = vmatpush3.bf16.msra.mxu1 %v6534_v33  ;;  %v6515_v21 = vld [vmem:[%s7277_s1 + $0xa0] ss:$16 sps:$4 sm:$0xff]   ;;  %v6581_v33 = vld [vmem:[%s7309_s5 + $0xa4] ss:$16 sps:$4 sm:$0xff]  }
 0x2e4   :  { %5991 = vmatprep.subr.bf16.mxu1 %v6535_v34  ;;  %v6579_v34 = vld [vmem:[%s7309_s5 + $0xa0] ss:$16 sps:$4 sm:$0xff]  }
 0x2e6   :  { %5970 = vmatpush3.bf16.msra.mxu0 %v6496_v9  ;;  %v6520_v9 = vld [vmem:[%s7277_s1 + $0x84] ss:$16 sps:$4 sm:$0xff]  }
 0x2e7   :  { %5971 = vmatprep.subr.bf16.mxu0 %v6497_v11  ;;  %5992 = vmatpush3.bf16.msra.mxu1 %v6536_v35  ;;  %v6518_v11 = vld [vmem:[%s7277_s1 + $0x80] ss:$16 sps:$4 sm:$0xff]   ;;  %v6584_v35 = vld [vmem:[%s7309_s5 + $0x84] ss:$16 sps:$4 sm:$0xff]  }
 0x2e8   :  { %5993 = vmatprep.subr.bf16.mxu1 %v6537_v36  ;;  %v6582_v36 = vld [vmem:[%s7309_s5 + $0x80] ss:$16 sps:$4 sm:$0xff]  }
 0x2ea   :  { %5972 = vmatpush3.bf16.msra.mxu0 %v6498_v22  ;;  %v6523_v22 = vld [vmem:[%s7277_s1 + $0x64] ss:$16 sps:$4 sm:$0xff]  }
 0x2eb   :  { %5973 = vmatprep.subr.bf16.mxu0 %v6499_v23  ;;  %5994 = vmatpush3.bf16.msra.mxu1 %v6538_v37  ;;  %v6521_v23 = vld [vmem:[%s7277_s1 + $0x60] ss:$16 sps:$4 sm:$0xff]   ;;  %v6587_v37 = vld [vmem:[%s7309_s5 + $0x64] ss:$16 sps:$4 sm:$0xff]  }
 0x2ec   :  { %5995 = vmatprep.subr.bf16.mxu1 %v6539_v39  ;;  %v6585_v39 = vld [vmem:[%s7309_s5 + $0x60] ss:$16 sps:$4 sm:$0xff]  }
 0x2ee   :  { %5974 = vmatpush3.bf16.msra.mxu0 %v6500_v7  ;;  %v6526_v7 = vld [vmem:[%s7277_s1 + $0x44] ss:$16 sps:$4 sm:$0xff]  }
 0x2ef   :  { %5975 = vmatprep.subr.bf16.mxu0 %v6501_v14  ;;  %5996 = vmatpush3.bf16.msra.mxu1 %v6540_v40  ;;  %v6524_v14 = vld [vmem:[%s7277_s1 + $0x40] ss:$16 sps:$4 sm:$0xff]   ;;  %v6590_v40 = vld [vmem:[%s7309_s5 + $0x44] ss:$16 sps:$4 sm:$0xff]  }
 0x2f0   :  { %5997 = vmatprep.subr.bf16.mxu1 %v6541_v41  ;;  %v1660_v41 = vrot.slane %v7314_v50, %v6986_v56 }
 0x2f2   :  { %5976 = vmatpush3.bf16.msra.mxu0 %v6502_v24  ;;  %v6529_v24 = vld [vmem:[%s7277_s1 + $0x24] ss:$16 sps:$4 sm:$0xff]  }
 0x2f3   :  { %5977 = vmatprep.subr.bf16.mxu0 %v6503_v25  ;;  %5998 = vmatpush3.bf16.msra.mxu1 %v6542_v42  ;;  %v6527_v25 = vld [vmem:[%s7277_s1 + $0x20] ss:$16 sps:$4 sm:$0xff]  }
 0x2f4   :  { %5999 = vmatprep.subr.bf16.mxu1 %v6543_v43  ;;  %v6588_v42 = vld [vmem:[%s7309_s5 + $0x40] ss:$16 sps:$4 sm:$0xff]   ;;  %v1664_v43 = vrot.slane %v7314_v50, %v6990_v59 }
 0x2f6   :  { %5978 = vmatpush3.bf16.msra.mxu0 %v6504_v26  ;;  %v6532_v26 = vld [vmem:[%s7277_s1 + $0x4] ss:$16 sps:$4 sm:$0xff]  }
 0x2f7   :  { %5979 = vmatprep.subr.bf16.mxu0 %v6505_v27  ;;  %6000 = vmatpush3.bf16.msra.mxu1 %v6544_v44  ;;  %v6530_v27 = vld [vmem:[%s7277_s1] ss:$16 sps:$4 sm:$0xff]  }
 0x2f8   :  { %6001 = vmatprep.subr.bf16.mxu1 %v6545_v45 }
 0x2fa   :  { %5980 = vmatpush3.bf16.msra.mxu0 %v6506_v28  ;;  %v6575_v28 = vld [vmem:[%s7309_s5 + $0xe4] ss:$16 sps:$4 sm:$0xff]  }
 0x2fb   :  { %5981 = vmatprep.subr.bf16.mxu0 %v6507_v29  ;;  %6002 = vmatpush3.bf16.msra.mxu1 %v6546_v46  ;;  %v6573_v29 = vld [vmem:[%s7309_s5 + $0xe0] ss:$16 sps:$4 sm:$0xff]  }
 0x2fc   :  { %6003 = vmatprep.subr.bf16.mxu1 %v6547_v47 }
 0x2fe   :  { %5982 = vmatpush3.bf16.msra.mxu0 %v6508_v30  ;;  %v7340_v30 = vpack.c.bf16 %v7187_v38, %v7187_v38 }
 0x2ff   :  { %3047 = vmatprep.subr.bf16.mxu0 %v6511_v31  ;;  %6004 = vmatpush3.bf16.msra.mxu1 %v6548_v48  ;;  %v6578_v31 = vld [vmem:[%s7309_s5 + $0xc4] ss:$16 sps:$4 sm:$0xff]  }
 0x300   :  { %3088 = vmatprep.subr.bf16.mxu1 %v6551_v49 }
 0x361   :  { %v2343_v53 = vpop.f32.mrf.mxu0 }
 0x362   :  { %v2344_v54 = vadd.f32 %v2343_v53, %v1652_v51  ;;  %v2384_v57 = vpop.f32.mrf.mxu1 }
 0x363   :  { %v2345_v60 = vpop.f32.mrf.mxu0 }
 0x364   :  { %v2385_v61 = vadd.f32 %v2384_v57, %v2344_v54  ;;  %v2346_v62 = vadd.f32 %v2345_v60, %v1656_v52  ;;  %v2386_v63 = vpop.f32.mrf.mxu1 }
 0x365   :  { %v2347_v1 = vpop.f32.mrf.mxu0 }
 0x366   :  { %vm2473_vm7 = vcmp.ge.f32.partialorder %v2385_v61, 0.0  ;;  %v2477_v2 = vmul.f32 0.01, %v2385_v61  ;;  %v2387_v3 = vadd.f32 %v2386_v63, %v2346_v62  ;;  %v2388_v4 = vpop.f32.mrf.mxu1 }
 0x367   :  { %v2348_v5 = vpop.f32.mrf.mxu0  ;;  %v6554_v4 = vld [vmem:[%s7277_s1 + $0xcc] ss:$16 sps:$4 sm:$0xff]  }
 0x368   :  { %vm2474_vm8 = vcmp.ge.f32.partialorder %v2387_v3, 0.0  ;;  %v2478_v6 = vmul.f32 0.01, %v2387_v3  ;;  %v2389_v12 = vpop.f32.mrf.mxu1  ;;  %v2481_v13 = vsel %vm2473_vm7, %v2385_v61, %v2477_v2  ;;  %v6549_v2 = vld [vmem:[%s7277_s1 + $0xe8] ss:$16 sps:$4 sm:$0xff]   ;;  %vm5269_vm7 = vcmask 523648  }
 0x369   :  { %v2485_v17 = vpack.c.bf16 %v2481_v13, %v2481_v13  ;;  %v6591_v5 = vld [vmem:[%s7309_s5 + $0x20] ss:$16 sps:$4 sm:$0xff]   ;;  %v6552_v12 = vld [vmem:[%s7277_s1 + $0xc8] ss:$16 sps:$4 sm:$0xff]   ;;  %v6557_v13 = vld [vmem:[%s7277_s1 + $0xac] ss:$16 sps:$4 sm:$0xff]  }
 0x36a   :  { %v2482_v8 = vsel %vm2474_vm8, %v2387_v3, %v2478_v6  ;;  %v6593_v6 = vld [vmem:[%s7309_s5 + $0x24] ss:$16 sps:$4 sm:$0xff]   ;;  %vm5275_vm8 = vcmask 654848  }
 0x36b   :  { %v2486_v16 = vpack.c.bf16 %v2482_v8, %v2482_v8  ;;  %v6594_v8 = vld [vmem:[%s7309_s5] ss:$16 sps:$4 sm:$0xff]  }
 0x36d   :  { %2784 = vmatprep.mubr.bf16.mxu0 %v2486_v16  ;;  %v6560_v16 = vld [vmem:[%s7277_s1 + $0x8c] ss:$16 sps:$4 sm:$0xff]  }
 0x36e   :  { %2785 = vmatmul.mubr.bf16.vlgmr.msra.gmra.mxu0 %v2485_v17  ;;  %v6599_v17 = vld [vmem:[%s7309_s5 + $0x1e4] ss:$16 sps:$4 sm:$0xff]  }
 0x36f   :  { %3048 = vmatpush1.bf16.msra.mxu0 %v6509_v15  ;;  %3079 = vmatprep.mubr.bf16.mxu0 %v6880_v0  ;;  %v6555_v15 = vld [vmem:[%s7277_s1 + $0xa8] ss:$16 sps:$4 sm:$0xff]  }
 0x370   :  { %3049 = vmatprep.subr.bf16.mxu0 %v6514_v10  ;;  %v6596_v10 = vld [vmem:[%s7309_s5 + $0x4] ss:$16 sps:$4 sm:$0xff]  }
 0x373   :  { %3050 = vmatpush1.bf16.msra.mxu0 %v6512_v19  ;;  %v6597_v19 = vld [vmem:[%s7309_s5 + $0x1e0] ss:$16 sps:$4 sm:$0xff]  }
 0x374   :  { %3051 = vmatprep.subr.bf16.mxu0 %v6517_v20  ;;  %v6558_v20 = vld [vmem:[%s7277_s1 + $0x88] ss:$16 sps:$4 sm:$0xff]  }
 0x377   :  { %3052 = vmatpush1.bf16.msra.mxu0 %v6515_v21  ;;  %v6602_v21 = vld [vmem:[%s7309_s5 + $0x1c4] ss:$16 sps:$4 sm:$0xff]  }
 0x378   :  { %3053 = vmatprep.subr.bf16.mxu0 %v6520_v9  ;;  %v6563_v9 = vld [vmem:[%s7277_s1 + $0x6c] ss:$16 sps:$4 sm:$0xff]  }
 0x37b   :  { %3054 = vmatpush1.bf16.msra.mxu0 %v6518_v11  ;;  %v6600_v11 = vld [vmem:[%s7309_s5 + $0x1c0] ss:$16 sps:$4 sm:$0xff]  }
 0x37c   :  { %3055 = vmatprep.subr.bf16.mxu0 %v6523_v22  ;;  %v6561_v22 = vld [vmem:[%s7277_s1 + $0x68] ss:$16 sps:$4 sm:$0xff]  }
 0x37f   :  { %3056 = vmatpush1.bf16.msra.mxu0 %v6521_v23  ;;  %v6605_v23 = vld [vmem:[%s7309_s5 + $0x1a4] ss:$16 sps:$4 sm:$0xff]  }
 0x380   :  { %3057 = vmatprep.subr.bf16.mxu0 %v6526_v7  ;;  %v6566_v7 = vld [vmem:[%s7277_s1 + $0x4c] ss:$16 sps:$4 sm:$0xff]  }
 0x383   :  { %3058 = vmatpush1.bf16.msra.mxu0 %v6524_v14  ;;  %v6603_v14 = vld [vmem:[%s7309_s5 + $0x1a0] ss:$16 sps:$4 sm:$0xff]  }
 0x384   :  { %3059 = vmatprep.subr.bf16.mxu0 %v6529_v24  ;;  %v6564_v24 = vld [vmem:[%s7277_s1 + $0x48] ss:$16 sps:$4 sm:$0xff]  }
 0x387   :  { %3060 = vmatpush1.bf16.msra.mxu0 %v6527_v25  ;;  %v6608_v25 = vld [vmem:[%s7309_s5 + $0x184] ss:$16 sps:$4 sm:$0xff]  }
 0x388   :  { %3061 = vmatprep.subr.bf16.mxu0 %v6532_v26  ;;  %v6569_v26 = vld [vmem:[%s7277_s1 + $0x2c] ss:$16 sps:$4 sm:$0xff]  }
 0x38b   :  { %3062 = vmatpush1.bf16.msra.mxu0 %v6530_v27  ;;  %v6606_v27 = vld [vmem:[%s7309_s5 + $0x180] ss:$16 sps:$4 sm:$0xff]  }
 0x38c   :  { %3935 = vmatprep.subr.bf16.mxu0 %v6575_v28  ;;  %v6567_v28 = vld [vmem:[%s7277_s1 + $0x28] ss:$16 sps:$4 sm:$0xff]  }
 0x38e   :  { %3080 = vmatmul.mubr.bf16.vlgmr.msra.gmra.mxu0 %v7340_v30 }
 0x38f   :  { %3936 = vmatpush1.bf16.msra.mxu0 %v6573_v29  ;;  %v6611_v29 = vld [vmem:[%s7309_s5 + $0x164] ss:$16 sps:$4 sm:$0xff]  }
 0x390   :  { %3937 = vmatprep.subr.bf16.mxu0 %v6578_v31  ;;  %v6572_v31 = vld [vmem:[%s7277_s1 + $0xc] ss:$16 sps:$4 sm:$0xff]  }
 0x393   :  { %3938 = vmatpush1.bf16.msra.mxu0 %v6576_v32  ;;  %v6609_v32 = vld [vmem:[%s7309_s5 + $0x160] ss:$16 sps:$4 sm:$0xff]  }
 0x394   :  { %3939 = vmatprep.subr.bf16.mxu0 %v6581_v33  ;;  %v6570_v33 = vld [vmem:[%s7277_s1 + $0x8] ss:$16 sps:$4 sm:$0xff]   ;;  %s6901_s1 = smov 26  }
 0x395   :  { %s7583_s4 = sld [smem:[%s7693_s0 + %s6901_s1]]  }
 0x397   :  { %3940 = vmatpush1.bf16.msra.mxu0 %v6579_v34  ;;  %v6614_v34 = vld [vmem:[%s7309_s5 + $0x144] ss:$16 sps:$4 sm:$0xff]  }
 0x398   :  { %3941 = vmatprep.subr.bf16.mxu0 %v6584_v35  ;;  %v6612_v35 = vld [vmem:[%s7309_s5 + $0x140] ss:$16 sps:$4 sm:$0xff]  }
 0x39b   :  { %3942 = vmatpush1.bf16.msra.mxu0 %v6582_v36  ;;  %v6617_v36 = vld [vmem:[%s7309_s5 + $0x124] ss:$16 sps:$4 sm:$0xff]  }
 0x39c   :  { %3943 = vmatprep.subr.bf16.mxu0 %v6587_v37  ;;  %v6615_v37 = vld [vmem:[%s7309_s5 + $0x120] ss:$16 sps:$4 sm:$0xff]  }
 0x39f   :  { %3944 = vmatpush1.bf16.msra.mxu0 %v6585_v39  ;;  %v6620_v39 = vld [vmem:[%s7309_s5 + $0x104] ss:$16 sps:$4 sm:$0xff]  }
 0x3a0   :  { %3945 = vmatprep.subr.bf16.mxu0 %v6590_v40  ;;  %v6618_v40 = vld [vmem:[%s7309_s5 + $0x100] ss:$16 sps:$4 sm:$0xff]  }
 0x3a1   :  { %v2425_v44 = vpop.f32.mrf.mxu0 }
 0x3a2   :  { %v2426_v45 = vadd.f32 %v2425_v44, %v1660_v41  ;;  %v2466_v46 = vpop.f32.mrf.mxu1  ;;  %v6621_v41 = vld [vmem:[%s7309_s5 + $0x2e0] ss:$16 sps:$4 sm:$0xff]   ;;  %v6629_v44 = vld [vmem:[%s7309_s5 + $0x2c4] ss:$16 sps:$4 sm:$0xff]  }
 0x3a3   :  { %v2427_v47 = vpop.f32.mrf.mxu0  ;;  %3946 = vmatpush1.bf16.msra.mxu0 %v6588_v42  ;;  %v6623_v42 = vld [vmem:[%s7309_s5 + $0x2e4] ss:$16 sps:$4 sm:$0xff]  }
 0x3a4   :  { %v2467_v48 = vadd.f32 %v2466_v46, %v2426_v45  ;;  %v2428_v49 = vadd.f32 %v2427_v47, %v1664_v43  ;;  %v2468_v51 = vpop.f32.mrf.mxu1  ;;  %3947 = vmatprep.subr.bf16.mxu0 %v6593_v6  ;;  %v6627_v43 = vld [vmem:[%s7309_s5 + $0x2c0] ss:$16 sps:$4 sm:$0xff]   ;;  %v6635_v46 = vld [vmem:[%s7309_s5 + $0x2a4] ss:$16 sps:$4 sm:$0xff]  }
 0x3a5   :  { %v2429_v52 = vpop.f32.mrf.mxu0  ;;  %v6633_v45 = vld [vmem:[%s7309_s5 + $0x2a0] ss:$16 sps:$4 sm:$0xff]  }
 0x3a6   :  { %vm2475_vm9 = vcmp.ge.f32.partialorder %v2467_v48, 0.0  ;;  %v2479_v53 = vmul.f32 0.01, %v2467_v48  ;;  %v2469_v54 = vadd.f32 %v2468_v51, %v2428_v49  ;;  %v2470_v57 = vpop.f32.mrf.mxu1  ;;  %v6639_v47 = vld [vmem:[%s7309_s5 + $0x280] ss:$16 sps:$4 sm:$0xff]  }
 0x3a7   :  { %v2430_v50 = vpop.f32.mrf.mxu0  ;;  %3948 = vmatpush1.bf16.msra.mxu0 %v6591_v5  ;;  %v6645_v49 = vld [vmem:[%s7309_s5 + $0x260] ss:$16 sps:$4 sm:$0xff]   ;;  %v6647_v51 = vld [vmem:[%s7309_s5 + $0x264] ss:$16 sps:$4 sm:$0xff]  }
 0x3a8   :  { %vm2476_vm10 = vcmp.ge.f32.partialorder %v2469_v54, 0.0  ;;  %v2480_v60 = vmul.f32 0.01, %v2469_v54  ;;  %v2471_v61 = vpop.f32.mrf.mxu1  ;;  %v2483_v62 = vsel %vm2475_vm9, %v2467_v48, %v2479_v53  ;;  %3949 = vmatprep.subr.bf16.mxu0 %v6596_v10  ;;  %v6641_v48 = vld [vmem:[%s7309_s5 + $0x284] ss:$16 sps:$4 sm:$0xff]   ;;  %vm5281_vm9 = vcmask 786048  }
 0x3a9   :  { %v2487_v3 = vpack.c.bf16 %v2483_v62, %v2483_v62  ;;  %v6651_v52 = vld [vmem:[%s7309_s5 + $0x240] ss:$16 sps:$4 sm:$0xff]   ;;  %v6653_v53 = vld [vmem:[%s7309_s5 + $0x244] ss:$16 sps:$4 sm:$0xff]  }
 0x3aa   :  { %v2484_v63 = vsel %vm2476_vm10, %v2469_v54, %v2480_v60  ;;  %v6657_v54 = vld [vmem:[%s7309_s5 + $0x220] ss:$16 sps:$4 sm:$0xff]   ;;  %v6659_v57 = vld [vmem:[%s7309_s5 + $0x224] ss:$16 sps:$4 sm:$0xff]   ;;  %vm5287_vm10 = vcmask 917248  }
 0x3ab   :  { %v2488_v1 = vpack.c.bf16 %v2484_v63, %v2484_v63  ;;  %3950 = vmatpush1.bf16.msra.mxu0 %v6594_v8  ;;  %v6665_v50 = vld [vmem:[%s7309_s5 + $0x204] ss:$16 sps:$4 sm:$0xff]   ;;  %v6663_v60 = vld [vmem:[%s7309_s5 + $0x200] ss:$16 sps:$4 sm:$0xff]  }
 0x3ac   :  { %3951 = vmatprep.subr.bf16.mxu0 %v6599_v17  ;;  %v6669_v61 = vld [vmem:[%s7309_s5 + $0x3e0] ss:$16 sps:$4 sm:$0xff]   ;;  %v6671_v62 = vld [vmem:[%s7309_s5 + $0x3e4] ss:$16 sps:$4 sm:$0xff]  }
 0x3ad   :  { %2824 = vmatprep.mubr.bf16.mxu1 %v2488_v1  ;;  %v6675_v63 = vld [vmem:[%s7309_s5 + $0x3c0] ss:$16 sps:$4 sm:$0xff]   ;;  %v6677_v1 = vld [vmem:[%s7309_s5 + $0x3c4] ss:$16 sps:$4 sm:$0xff]  }
 0x3ae   :  { %2825 = vmatmul.mubr.bf16.vlgmr.msra.gmra.mxu1 %v2487_v3  ;;  %v6683_v3 = vld [vmem:[%s7309_s5 + $0x3a4] ss:$16 sps:$4 sm:$0xff]   ;;  %v6693_v6 = vld [vmem:[%s7309_s5 + $0x360] ss:$16 sps:$4 sm:$0xff]  }
 0x3af   :  { %3089 = vmatpush1.bf16.msra.mxu1 %v6549_v2  ;;  %3120 = vmatprep.mubr.bf16.mxu1 %v6880_v0  ;;  %v6681_v2 = vld [vmem:[%s7309_s5 + $0x3a0] ss:$16 sps:$4 sm:$0xff]   ;;  %v6689_v5 = vld [vmem:[%s7309_s5 + $0x384] ss:$16 sps:$4 sm:$0xff]  }
 0x3b0   :  { %3090 = vmatprep.subr.bf16.mxu1 %v6554_v4  ;;  %3952 = vmatpush2.bf16.msra.mxu0 %v6597_v19  ;;  %v6687_v4 = vld [vmem:[%s7309_s5 + $0x380] ss:$16 sps:$4 sm:$0xff]   ;;  %v6707_v8 = vld [vmem:[%s7309_s5 + $0x324] ss:$16 sps:$4 sm:$0xff]   ;;  %v6719_v19 = vld [vmem:[%s7309_s5 + $0x2ec] ss:$16 sps:$4 sm:$0xff]  }
 0x3b1   :  { %3953 = vmatprep.subr.bf16.mxu0 %v6602_v21  ;;  %v6705_v10 = vld [vmem:[%s7309_s5 + $0x320] ss:$16 sps:$4 sm:$0xff]  }
 0x3b2   :  { %v6711_v17 = vld [vmem:[%s7309_s5 + $0x300] ss:$16 sps:$4 sm:$0xff]  }
 0x3b3   :  { %3091 = vmatpush1.bf16.msra.mxu1 %v6552_v12  ;;  %v6695_v12 = vld [vmem:[%s7309_s5 + $0x364] ss:$16 sps:$4 sm:$0xff]  }
 0x3b4   :  { %3092 = vmatprep.subr.bf16.mxu1 %v6557_v13  ;;  %3954 = vmatpush2.bf16.msra.mxu0 %v6600_v11  ;;  %v6699_v13 = vld [vmem:[%s7309_s5 + $0x340] ss:$16 sps:$4 sm:$0xff]  }
 0x3b5   :  { %3955 = vmatprep.subr.bf16.mxu0 %v6605_v23  ;;  %v7431_v23 = vld [vmem:[%s5309_s13] sm:$0xf]  ;;  %s6904_s13 = smov 28  }
 0x3b6   :  { %s7632_s16 = sld [smem:[%s7693_s0 + %s6904_s13]]  }
 0x3b7   :  { %3093 = vmatpush1.bf16.msra.mxu1 %v6555_v15  ;;  %v6701_v15 = vld [vmem:[%s7309_s5 + $0x344] ss:$16 sps:$4 sm:$0xff]  }
 0x3b8   :  { %3094 = vmatprep.subr.bf16.mxu1 %v6560_v16  ;;  %3956 = vmatpush2.bf16.msra.mxu0 %v6603_v14  ;;  %v6713_v16 = vld [vmem:[%s7309_s5 + $0x304] ss:$16 sps:$4 sm:$0xff]   ;;  %v2874_v14 = vrot.slane %v7431_v23, %v6988_v58 }
 0x3b9   :  { %3957 = vmatprep.subr.bf16.mxu0 %v6608_v25 }
 0x3bb   :  { %3095 = vmatpush1.bf16.msra.mxu1 %v6558_v20 }
 0x3bc   :  { %3096 = vmatprep.subr.bf16.mxu1 %v6563_v9  ;;  %3958 = vmatpush2.bf16.msra.mxu0 %v6606_v27 }
 0x3bd   :  { %3959 = vmatprep.subr.bf16.mxu0 %v6611_v29 }
 0x3bf   :  { %3097 = vmatpush1.bf16.msra.mxu1 %v6561_v22 }
 0x3c0   :  { %3098 = vmatprep.subr.bf16.mxu1 %v6566_v7  ;;  %3960 = vmatpush2.bf16.msra.mxu0 %v6609_v32  ;;  %v2870_v7 = vrot.slane %v7431_v23, %v6984_v55 }
 0x3c1   :  { %3961 = vmatprep.subr.bf16.mxu0 %v6614_v34 }
 0x3c3   :  { %3099 = vmatpush1.bf16.msra.mxu1 %v6564_v24 }
 0x3c4   :  { %3100 = vmatprep.subr.bf16.mxu1 %v6569_v26  ;;  %3962 = vmatpush2.bf16.msra.mxu0 %v6612_v35 }
 0x3c5   :  { %3963 = vmatprep.subr.bf16.mxu0 %v6617_v36  ;;  %v6624_v36 = vld [vmem:[%s7309_s5 + $0xe8] ss:$16 sps:$4 sm:$0xff]  }
 0x3c7   :  { %3101 = vmatpush1.bf16.msra.mxu1 %v6567_v28 }
 0x3c8   :  { %3102 = vmatprep.subr.bf16.mxu1 %v6572_v31  ;;  %3964 = vmatpush2.bf16.msra.mxu0 %v6615_v37 }
 0x3c9   :  { %3965 = vmatprep.subr.bf16.mxu0 %v6620_v39  ;;  %v6632_v39 = vld [vmem:[%s7309_s5 + $0xcc] ss:$16 sps:$4 sm:$0xff]  }
 0x3cb   :  { %3103 = vmatpush1.bf16.msra.mxu1 %v6570_v33 }
 0x3cc   :  { %3966 = vmatpush2.bf16.msra.mxu0 %v6618_v40  ;;  %3976 = vmatprep.subr.bf16.mxu1 %v6623_v42  ;;  %v6630_v40 = vld [vmem:[%s7309_s5 + $0xc8] ss:$16 sps:$4 sm:$0xff]  }
 0x3cd   :  { %v6636_v42 = vld [vmem:[%s7309_s5 + $0xa8] ss:$16 sps:$4 sm:$0xff]  }
 0x3ce   :  { %3121 = vmatmul.mubr.bf16.vlgmr.msra.gmra.mxu1 %v7340_v30  ;;  %v6626_v30 = vld [vmem:[%s7309_s5 + $0xec] ss:$16 sps:$4 sm:$0xff]  }
 0x3cf   :  { %3977 = vmatpush1.bf16.msra.mxu1 %v6621_v41  ;;  %4017 = vmatprep.subr.bf16.mxu0 %v6626_v30  ;;  %v6638_v41 = vld [vmem:[%s7309_s5 + $0xac] ss:$16 sps:$4 sm:$0xff]  }
 0x3d0   :  { %3978 = vmatprep.subr.bf16.mxu1 %v6629_v44  ;;  %v6644_v30 = vld [vmem:[%s7309_s5 + $0x8c] ss:$16 sps:$4 sm:$0xff]  }
 0x3d1   :  { %v6650_v44 = vld [vmem:[%s7309_s5 + $0x6c] ss:$16 sps:$4 sm:$0xff]  }
 0x3d3   :  { %3979 = vmatpush1.bf16.msra.mxu1 %v6627_v43  ;;  %v6642_v43 = vld [vmem:[%s7309_s5 + $0x88] ss:$16 sps:$4 sm:$0xff]  }
 0x3d4   :  { %3980 = vmatprep.subr.bf16.mxu1 %v6635_v46  ;;  %v6656_v46 = vld [vmem:[%s7309_s5 + $0x4c] ss:$16 sps:$4 sm:$0xff]  }
 0x3d7   :  { %3981 = vmatpush1.bf16.msra.mxu1 %v6633_v45  ;;  %v6648_v45 = vld [vmem:[%s7309_s5 + $0x68] ss:$16 sps:$4 sm:$0xff]  }
 0x3d8   :  { %3982 = vmatprep.subr.bf16.mxu1 %v6641_v48  ;;  %v6662_v48 = vld [vmem:[%s7309_s5 + $0x2c] ss:$16 sps:$4 sm:$0xff]  }
 0x3db   :  { %3983 = vmatpush1.bf16.msra.mxu1 %v6639_v47  ;;  %v6654_v47 = vld [vmem:[%s7309_s5 + $0x48] ss:$16 sps:$4 sm:$0xff]  }
 0x3dc   :  { %3984 = vmatprep.subr.bf16.mxu1 %v6647_v51 }
 0x3df   :  { %3985 = vmatpush1.bf16.msra.mxu1 %v6645_v49  ;;  %v5582_v49 = vld [vmem:[%s5307_s17] ss:$0 sm:$0xff]  ;;  %s6905_s17 = smov 23  }
 0x3e0   :  { %3986 = vmatprep.subr.bf16.mxu1 %v6653_v53  ;;  %v6668_v53 = vld [vmem:[%s7309_s5 + $0xc] ss:$16 sps:$4 sm:$0xff]   ;;  %s5315_s20 = sld [smem:[%s7693_s0 + %s6905_s17]]  }
 0x3e3   :  { %3987 = vmatpush1.bf16.msra.mxu1 %v6651_v52  ;;  %v6660_v52 = vld [vmem:[%s7309_s5 + $0x28] ss:$16 sps:$4 sm:$0xff]  }
 0x3e4   :  { %3988 = vmatprep.subr.bf16.mxu1 %v6659_v57 }
 0x3e7   :  { %3989 = vmatpush1.bf16.msra.mxu1 %v6657_v54 }
 0x3e8   :  { %3990 = vmatprep.subr.bf16.mxu1 %v6665_v50 }
 0x3eb   :  { %3991 = vmatpush1.bf16.msra.mxu1 %v6663_v60 }
 0x3ec   :  { %3992 = vmatprep.subr.bf16.mxu1 %v6671_v62 }
 0x3ef   :  { %3993 = vmatpush2.bf16.msra.mxu1 %v6669_v61  ;;  %v6666_v61 = vld [vmem:[%s7309_s5 + $0x8] ss:$16 sps:$4 sm:$0xff]  }
 0x3f0   :  { %3994 = vmatprep.subr.bf16.mxu1 %v6677_v1 }
 0x3f3   :  { %3995 = vmatpush2.bf16.msra.mxu1 %v6675_v63  ;;  %v6674_v63 = vld [vmem:[%s7309_s5 + $0x1ec] ss:$16 sps:$4 sm:$0xff]  }
 0x3f4   :  { %3996 = vmatprep.subr.bf16.mxu1 %v6683_v3  ;;  %v6680_v3 = vld [vmem:[%s7309_s5 + $0x1cc] ss:$16 sps:$4 sm:$0xff]  }
 0x3f7   :  { %3997 = vmatpush2.bf16.msra.mxu1 %v6681_v2  ;;  %v6672_v2 = vld [vmem:[%s7309_s5 + $0x1e8] ss:$16 sps:$4 sm:$0xff]  }
 0x3f8   :  { %3998 = vmatprep.subr.bf16.mxu1 %v6689_v5  ;;  %v6686_v5 = vld [vmem:[%s7309_s5 + $0x1ac] ss:$16 sps:$4 sm:$0xff]  }
 0x3fb   :  { %3999 = vmatpush2.bf16.msra.mxu1 %v6687_v4  ;;  %v6678_v4 = vld [vmem:[%s7309_s5 + $0x1c8] ss:$16 sps:$4 sm:$0xff]  }
 0x3fc   :  { %4000 = vmatprep.subr.bf16.mxu1 %v6695_v12  ;;  %v6692_v12 = vld [vmem:[%s7309_s5 + $0x18c] ss:$16 sps:$4 sm:$0xff]  }
 0x3ff   :  { %4001 = vmatpush2.bf16.msra.mxu1 %v6693_v6  ;;  %v6684_v6 = vld [vmem:[%s7309_s5 + $0x1a8] ss:$16 sps:$4 sm:$0xff]  }
 0x400   :  { %4002 = vmatprep.subr.bf16.mxu1 %v6701_v15  ;;  %v6698_v15 = vld [vmem:[%s7309_s5 + $0x16c] ss:$16 sps:$4 sm:$0xff]  }
 0x403   :  { %4003 = vmatpush2.bf16.msra.mxu1 %v6699_v13  ;;  %v6690_v13 = vld [vmem:[%s7309_s5 + $0x188] ss:$16 sps:$4 sm:$0xff]  }
 0x404   :  { %4004 = vmatprep.subr.bf16.mxu1 %v6707_v8  ;;  %v6696_v8 = vld [vmem:[%s7309_s5 + $0x168] ss:$16 sps:$4 sm:$0xff]  }
 0x407   :  { %4005 = vmatpush2.bf16.msra.mxu1 %v6705_v10  ;;  %v6704_v10 = vld [vmem:[%s7309_s5 + $0x14c] ss:$16 sps:$4 sm:$0xff]  }
 0x408   :  { %4006 = vmatprep.subr.bf16.mxu1 %v6713_v16  ;;  %v6702_v16 = vld [vmem:[%s7309_s5 + $0x148] ss:$16 sps:$4 sm:$0xff]  }
 0x40b   :  { %4007 = vmatpush2.bf16.msra.mxu1 %v6711_v17  ;;  %v2878_v17 = vrot.slane %v7431_v23, %v6986_v56 }
 0x40c   :  { %4058 = vmatprep.subr.bf16.mxu1 %v6719_v19  ;;  %v6710_v19 = vld [vmem:[%s7309_s5 + $0x12c] ss:$16 sps:$4 sm:$0xff]  }
 0x42e   :  { %v5983_v20 = vpop.f32.mrf.mxu0 }
 0x430   :  { %v5984_v21 = vpop.f32.mrf.mxu0 }
 0x431   :  { %v5985_v9 = vadd.f32 %v5984_v21, %v5983_v20  ;;  %v2882_v20 = vrot.slane %v7431_v23, %v6990_v59 }
 0x432   :  { %v5986_v11 = vpop.f32.mrf.mxu0 }
 0x433   :  { %v2787_v57 = vadd.f32 %v5985_v9, %v5582_v49  ;;  %v6708_v9 = vld [vmem:[%s7309_s5 + $0x128] ss:$16 sps:$4 sm:$0xff]   ;;  %v6737_v49 = vld [vmem:[%s7309_s5 + $0x22c] ss:$16 sps:$4 sm:$0xff]  }
 0x434   :  { %v5987_v22 = vpop.f32.mrf.mxu0 }
 0x435   :  { %v6716_v22 = vld [vmem:[%s7309_s5 + $0x10c] ss:$16 sps:$4 sm:$0xff]  }
 0x44e   :  { %v3081_v24 = vpop.f32.mrf.mxu0 }
 0x44f   :  { %v3082_v25 = vadd.f32 %v3081_v24, %v2870_v7 }
 0x450   :  { %v3083_v26 = vpop.f32.mrf.mxu0 }
 0x451   :  { %vm3129_vm11 = vcmp.ge.f32.partialorder %v3082_v25, 0.0  ;;  %v3133_v27 = vmul.f32 0.01, %v3082_v25  ;;  %v3084_v28 = vadd.f32 %v3083_v26, %v2874_v14  ;;  %v6714_v26 = vld [vmem:[%s7309_s5 + $0x108] ss:$16 sps:$4 sm:$0xff]  }
 0x452   :  { %v3085_v29 = vpop.f32.mrf.mxu0 }
 0x453   :  { %vm3130_vm12 = vcmp.ge.f32.partialorder %v3084_v28, 0.0  ;;  %v3134_v31 = vmul.f32 0.01, %v3084_v28  ;;  %v3137_v32 = vsel %vm3129_vm11, %v3082_v25, %v3133_v27 }
 0x454   :  { %v3086_v33 = vpop.f32.mrf.mxu0  ;;  %v7438_v37 = vpack.c.bf16 %v3137_v32, %v3137_v32  ;;  %v6717_v32 = vld [vmem:[%s7309_s5 + $0x2e8] ss:$16 sps:$4 sm:$0xff]  }
 0x455   :  { %v3138_v34 = vsel %vm3130_vm12, %v3084_v28, %v3134_v31 }
 0x456   :  { %v3142_v35 = vpack.c.bf16 %v3138_v34, %v3138_v34  ;;  %v6722_v34 = vld [vmem:[%s7309_s5 + $0x2cc] ss:$16 sps:$4 sm:$0xff]  }
 0x458   :  { %3967 = vmatprep.mubr.bf16.mxu0 %v3142_v35 }
 0x459   :  { %3968 = vmatmul.mubr.bf16.vlgmr.msra.gmra.mxu0 %v7438_v37 }
 0x45a   :  { %4018 = vmatpush1.bf16.msra.mxu0 %v6624_v36  ;;  %4049 = vmatprep.mubr.bf16.mxu0 %v3142_v35  ;;  %v6720_v35 = vld [vmem:[%s7309_s5 + $0x2c8] ss:$16 sps:$4 sm:$0xff]   ;;  %v6725_v36 = vld [vmem:[%s7309_s5 + $0x2ac] ss:$16 sps:$4 sm:$0xff]  }
 0x45b   :  { %4019 = vmatprep.subr.bf16.mxu0 %v6632_v39  ;;  %v6723_v39 = vld [vmem:[%s7309_s5 + $0x2a8] ss:$16 sps:$4 sm:$0xff]  }
 0x45e   :  { %4020 = vmatpush1.bf16.msra.mxu0 %v6630_v40  ;;  %v6728_v40 = vld [vmem:[%s7309_s5 + $0x28c] ss:$16 sps:$4 sm:$0xff]  }
 0x45f   :  { %4021 = vmatprep.subr.bf16.mxu0 %v6638_v41  ;;  %v6731_v41 = vld [vmem:[%s7309_s5 + $0x26c] ss:$16 sps:$4 sm:$0xff]  }
 0x462   :  { %4022 = vmatpush1.bf16.msra.mxu0 %v6636_v42  ;;  %v6729_v42 = vld [vmem:[%s7309_s5 + $0x268] ss:$16 sps:$4 sm:$0xff]  }
 0x463   :  { %4023 = vmatprep.subr.bf16.mxu0 %v6644_v30  ;;  %v6734_v30 = vld [vmem:[%s7309_s5 + $0x24c] ss:$16 sps:$4 sm:$0xff]  }
 0x466   :  { %4024 = vmatpush1.bf16.msra.mxu0 %v6642_v43  ;;  %v6765_v43 = vld [vmem:[%s7493_s21 + $0x78] sm:$0xff]  }
 0x467   :  { %4025 = vmatprep.subr.bf16.mxu0 %v6650_v44  ;;  %v6766_v44 = vld [vmem:[%s7493_s21 + $0x38] sm:$0xff]  }
 0x46a   :  { %4026 = vmatpush1.bf16.msra.mxu0 %v6648_v45  ;;  %v6732_v45 = vld [vmem:[%s7309_s5 + $0x248] ss:$16 sps:$4 sm:$0xff]  }
 0x46b   :  { %4027 = vmatprep.subr.bf16.mxu0 %v6656_v46  ;;  %v6767_v46 = vld [vmem:[%s7493_s21 + $0x70] sm:$0xff]  }
 0x46e   :  { %4028 = vmatpush1.bf16.msra.mxu0 %v6654_v47  ;;  %v6005_v51 = vpop.f32.mrf.mxu1  ;;  %v6768_v47 = vld [vmem:[%s7493_s21 + $0x30] sm:$0xff]  }
 0x46f   :  { %4029 = vmatprep.subr.bf16.mxu0 %v6662_v48  ;;  %v6769_v48 = vld [vmem:[%s7493_s21 + $0x68] sm:$0xff]  }
 0x470   :  { %v6006_v54 = vpop.f32.mrf.mxu1 }
 0x471   :  { %v6007_v50 = vadd.f32 %v6006_v54, %v6005_v51  ;;  %v6735_v51 = vld [vmem:[%s7309_s5 + $0x228] ss:$16 sps:$4 sm:$0xff]   ;;  %v6771_v54 = vld [vmem:[%s7493_s21 + $0x60] sm:$0xff]  }
 0x472   :  { %4030 = vmatpush1.bf16.msra.mxu0 %v6660_v52  ;;  %v6008_v60 = vpop.f32.mrf.mxu1  ;;  %v6740_v52 = vld [vmem:[%s7309_s5 + $0x20c] ss:$16 sps:$4 sm:$0xff]  }
 0x473   :  { %v7458_v62 = vadd.f32 %v6007_v50, %v2787_v57  ;;  %4031 = vmatprep.subr.bf16.mxu0 %v6668_v53  ;;  %v6770_v53 = vld [vmem:[%s7493_s21 + $0x28] sm:$0xff]   ;;  %v6772_v57 = vld [vmem:[%s7493_s21 + $0x20] sm:$0xff]   ;;  %v6773_v60 = vld [vmem:[%s7493_s21 + $0x58] sm:$0xff]  }
 0x474   :  { %v6009_v1 = vpop.f32.mrf.mxu1  ;;  %v6738_v50 = vld [vmem:[%s7309_s5 + $0x208] ss:$16 sps:$4 sm:$0xff]  }
 0x475   :  { %v6741_v1 = vld [vmem:[%s7309_s5 + $0x3e8] ss:$16 sps:$4 sm:$0xff]  }
 0x476   :  { %4032 = vmatpush1.bf16.msra.mxu0 %v6666_v61  ;;  %v6743_v61 = vld [vmem:[%s7309_s5 + $0x3ec] ss:$16 sps:$4 sm:$0xff]  }
 0x477   :  { %4033 = vmatprep.subr.bf16.mxu0 %v6674_v63  ;;  %v6774_v63 = vld [vmem:[%s7493_s21 + $0x18] sm:$0xff]  }
 0x47a   :  { %4034 = vmatpush2.bf16.msra.mxu0 %v6672_v2  ;;  %v6775_v2 = vld [vmem:[%s7493_s21 + $0x50] sm:$0xff]  }
 0x47b   :  { %4035 = vmatprep.subr.bf16.mxu0 %v6680_v3  ;;  %v6746_v3 = vld [vmem:[%s7309_s5 + $0x3cc] ss:$16 sps:$4 sm:$0xff]  }
 0x47e   :  { %4036 = vmatpush2.bf16.msra.mxu0 %v6678_v4  ;;  %v6744_v4 = vld [vmem:[%s7309_s5 + $0x3c8] ss:$16 sps:$4 sm:$0xff]  }
 0x47f   :  { %4037 = vmatprep.subr.bf16.mxu0 %v6686_v5  ;;  %v6749_v5 = vld [vmem:[%s7309_s5 + $0x3ac] ss:$16 sps:$4 sm:$0xff]  }
 0x482   :  { %4038 = vmatpush2.bf16.msra.mxu0 %v6684_v6  ;;  %v6747_v6 = vld [vmem:[%s7309_s5 + $0x3a8] ss:$16 sps:$4 sm:$0xff]  }
 0x483   :  { %4039 = vmatprep.subr.bf16.mxu0 %v6692_v12  ;;  %v6752_v12 = vld [vmem:[%s7309_s5 + $0x38c] ss:$16 sps:$4 sm:$0xff]  }
 0x486   :  { %4040 = vmatpush2.bf16.msra.mxu0 %v6690_v13  ;;  %v6750_v13 = vld [vmem:[%s7309_s5 + $0x388] ss:$16 sps:$4 sm:$0xff]  }
 0x487   :  { %4041 = vmatprep.subr.bf16.mxu0 %v6698_v15  ;;  %v6755_v15 = vld [vmem:[%s7309_s5 + $0x36c] ss:$16 sps:$4 sm:$0xff]  }
 0x48a   :  { %4042 = vmatpush2.bf16.msra.mxu0 %v6696_v8  ;;  %v6753_v8 = vld [vmem:[%s7309_s5 + $0x368] ss:$16 sps:$4 sm:$0xff]  }
 0x48b   :  { %4043 = vmatprep.subr.bf16.mxu0 %v6704_v10  ;;  %v6758_v10 = vld [vmem:[%s7309_s5 + $0x34c] ss:$16 sps:$4 sm:$0xff]  }
 0x48e   :  { %v3122_v21 = vpop.f32.mrf.mxu1  ;;  %4044 = vmatpush2.bf16.msra.mxu0 %v6702_v16  ;;  %v6756_v16 = vld [vmem:[%s7309_s5 + $0x348] ss:$16 sps:$4 sm:$0xff]  }
 0x48f   :  { %v3123_v11 = vadd.f32 %v3122_v21, %v2878_v17  ;;  %4045 = vmatprep.subr.bf16.mxu0 %v6710_v19  ;;  %v6761_v17 = vld [vmem:[%s7309_s5 + $0x32c] ss:$16 sps:$4 sm:$0xff]   ;;  %v6759_v19 = vld [vmem:[%s7309_s5 + $0x328] ss:$16 sps:$4 sm:$0xff]  }
 0x490   :  { %v3124_v7 = vpop.f32.mrf.mxu1  ;;  %v6762_v21 = vld [vmem:[%s7309_s5 + $0x308] ss:$16 sps:$4 sm:$0xff]  }
 0x491   :  { %vm3131_vm13 = vcmp.ge.f32.partialorder %v3123_v11, 0.0  ;;  %v3135_v14 = vmul.f32 0.01, %v3123_v11  ;;  %v3125_v24 = vadd.f32 %v3124_v7, %v2882_v20  ;;  %v6764_v20 = vld [vmem:[%s7309_s5 + $0x30c] ss:$16 sps:$4 sm:$0xff]   ;;  %v6779_v7 = vld [vmem:[%s7493_s21 + $0x40] sm:$0xff]  }
 0x492   :  { %v3126_v25 = vpop.f32.mrf.mxu1  ;;  %4046 = vmatpush2.bf16.msra.mxu0 %v6708_v9  ;;  %v6776_v9 = vld [vmem:[%s7493_s21 + $0x10] sm:$0xff]  }
 0x493   :  { %vm3132_vm14 = vcmp.ge.f32.partialorder %v3125_v24, 0.0  ;;  %v3136_v27 = vmul.f32 0.01, %v3125_v24  ;;  %4047 = vmatprep.subr.bf16.mxu0 %v6716_v22  ;;  %v3139_v23 = vsel %vm3131_vm13, %v3123_v11, %v3135_v14  ;;  %v6777_v11 = vld [vmem:[%s7493_s21 + $0x48] sm:$0xff]   ;;  %v6780_v14 = vld [vmem:[%s7493_s21] sm:$0xff]   ;;  %v6782_v25 = vld [vmem:[%s7493_s21 + $0xb8] sm:$0xff]  }
 0x494   :  { %v3127_v28 = vpop.f32.mrf.mxu1  ;;  %v7481_v33 = vpack.c.bf16 %v3139_v23, %v3139_v23  ;;  %v6778_v22 = vld [vmem:[%s7493_s21 + $0x8] sm:$0xff]  }
 0x495   :  { %v3140_v29 = vsel %vm3132_vm14, %v3125_v24, %v3136_v27  ;;  %v6781_v24 = vld [vmem:[%s7493_s21 + $0xf8] sm:$0xff]   ;;  %v6784_v27 = vld [vmem:[%s7493_s21 + $0xb0] sm:$0xff]   ;;  %v6785_v23 = vld [vmem:[%s7493_s21 + $0xe8] sm:$0xff]  }
 0x496   :  { %4048 = vmatpush2.bf16.msra.mxu0 %v6714_v26  ;;  %v3144_v31 = vpack.c.bf16 %v3140_v29, %v3140_v29  ;;  %v6783_v26 = vld [vmem:[%s7493_s21 + $0xf0] sm:$0xff]   ;;  %v6786_v28 = vld [vmem:[%s7493_s21 + $0xa8] sm:$0xff]   ;;  %v6787_v29 = vld [vmem:[%s7493_s21 + $0xe0] sm:$0xff]  }
 0x497   :  { %6011 = vmatprep.subr.bf16.mxu0 %v6765_v43  ;;  %v6796_v43 = vld [vmem:[%s7493_s21 + $0x80] sm:$0xff]  }
 0x498   :  { %4008 = vmatprep.mubr.bf16.mxu1 %v3144_v31 }
 0x499   :  { %4009 = vmatmul.mubr.bf16.vlgmr.msra.gmra.mxu1 %v7481_v33  ;;  %4050 = vmatmul.mubr.bf16.vlgmr.msra.gmra.mxu0 %v7438_v37  ;;  %v6726_v37 = vld [vmem:[%s7309_s5 + $0x288] ss:$16 sps:$4 sm:$0xff]   ;;  %s6902_s5 = smov 24  }
 0x49a   :  { %4059 = vmatpush1.bf16.msra.mxu1 %v6717_v32  ;;  %4090 = vmatprep.mubr.bf16.mxu1 %v3144_v31  ;;  %v6788_v31 = vld [vmem:[%s7493_s21 + $0xa0] sm:$0xff]   ;;  %v6789_v32 = vld [vmem:[%s7493_s21 + $0xd8] sm:$0xff]   ;;  %s7591_s8 = sld [smem:[%s7693_s0 + %s6902_s5]]  }
 0x49b   :  { %4060 = vmatprep.subr.bf16.mxu1 %v6722_v34  ;;  %6012 = vmatpush3.bf16.msra.mxu0 %v6766_v44  ;;  %v6791_v34 = vld [vmem:[%s7493_s21 + $0xd0] sm:$0xff]   ;;  %v3273_v44 = vld [vmem:[%s5311_s25] sm:$0xf]  ;;  %s6907_s25 = smov 30  }
 0x49c   :  { %6013 = vmatprep.subr.bf16.mxu0 %v6767_v46  ;;  %v3282_v46 = vrot.slane %v3273_v44, %v6988_v58  ;;  %s5322_s29 = sld [smem:[%s7693_s0 + %s6907_s25]]  }
 0x49e   :  { %4061 = vmatpush1.bf16.msra.mxu1 %v6720_v35  ;;  %v6792_v35 = vld [vmem:[%s7493_s21 + $0x90] sm:$0xff]  }
 0x49f   :  { %4062 = vmatprep.subr.bf16.mxu1 %v6725_v36  ;;  %6014 = vmatpush3.bf16.msra.mxu0 %v6768_v47 }
 0x4a0   :  { %6015 = vmatprep.subr.bf16.mxu0 %v6769_v48 }
 0x4a2   :  { %4063 = vmatpush1.bf16.msra.mxu1 %v6723_v39  ;;  %v6793_v39 = vld [vmem:[%s7493_s21 + $0xc8] sm:$0xff]  }
 0x4a3   :  { %4064 = vmatprep.subr.bf16.mxu1 %v6728_v40  ;;  %6016 = vmatpush3.bf16.msra.mxu0 %v6770_v53 }
 0x4a4   :  { %6017 = vmatprep.subr.bf16.mxu0 %v6771_v54 }
 0x4a6   :  { %4065 = vmatpush1.bf16.msra.mxu1 %v6726_v37  ;;  %v6794_v37 = vld [vmem:[%s7493_s21 + $0x88] sm:$0xff]  }
 0x4a7   :  { %4066 = vmatprep.subr.bf16.mxu1 %v6731_v41  ;;  %6018 = vmatpush3.bf16.msra.mxu0 %v6772_v57 }
 0x4a8   :  { %6019 = vmatprep.subr.bf16.mxu0 %v6773_v60 }
 0x4aa   :  { %4067 = vmatpush1.bf16.msra.mxu1 %v6729_v42  ;;  %v6795_v42 = vld [vmem:[%s7493_s21 + $0xc0] sm:$0xff]  }
 0x4ab   :  { %4068 = vmatprep.subr.bf16.mxu1 %v6734_v30  ;;  %6020 = vmatpush3.bf16.msra.mxu0 %v6774_v63 }
 0x4ac   :  { %6021 = vmatprep.subr.bf16.mxu0 %v6775_v2 }
 0x4ae   :  { %4069 = vmatpush1.bf16.msra.mxu1 %v6732_v45  ;;  %v3278_v45 = vrot.slane %v3273_v44, %v6984_v55 }
 0x4af   :  { %4070 = vmatprep.subr.bf16.mxu1 %v6737_v49  ;;  %6022 = vmatpush3.bf16.msra.mxu0 %v6776_v9 }
 0x4b0   :  { %6023 = vmatprep.subr.bf16.mxu0 %v6777_v11 }
 0x4b2   :  { %4071 = vmatpush1.bf16.msra.mxu1 %v6735_v51 }
 0x4b3   :  { %4072 = vmatprep.subr.bf16.mxu1 %v6740_v52  ;;  %6024 = vmatpush3.bf16.msra.mxu0 %v6778_v22 }
 0x4b4   :  { %6025 = vmatprep.subr.bf16.mxu0 %v6779_v7 }
 0x4b6   :  { %4073 = vmatpush1.bf16.msra.mxu1 %v6738_v50 }
 0x4b7   :  { %4074 = vmatprep.subr.bf16.mxu1 %v6743_v61  ;;  %6026 = vmatpush3.bf16.msra.mxu0 %v6780_v14 }
 0x4ba   :  { %4075 = vmatpush2.bf16.msra.mxu1 %v6741_v1 }
 0x4bb   :  { %4076 = vmatprep.subr.bf16.mxu1 %v6746_v3 }
 0x4be   :  { %4077 = vmatpush2.bf16.msra.mxu1 %v6744_v4 }
 0x4bf   :  { %4078 = vmatprep.subr.bf16.mxu1 %v6749_v5 }
 0x4c2   :  { %4079 = vmatpush2.bf16.msra.mxu1 %v6747_v6 }
 0x4c3   :  { %4080 = vmatprep.subr.bf16.mxu1 %v6752_v12  ;;  %v3286_v12 = vrot.slane %v3273_v44, %v6986_v56  ;;  %v6797_v56 = vld [vmem:[%s7564_s30 + $0x70] ss:$8 sps:$4 sm:$0xff]  }
 0x4c6   :  { %4081 = vmatpush2.bf16.msra.mxu1 %v6750_v13  ;;  %v3290_v13 = vrot.slane %v3273_v44, %v6990_v59  ;;  %v6799_v59 = vld [vmem:[%s7564_s30 + $0x74] ss:$8 sps:$4 sm:$0xff]   ;;  %v6849_v44 = vld [vmem:[%s7591_s8 + $0x68] sm:$0xff]  }
 0x4c7   :  { %4082 = vmatprep.subr.bf16.mxu1 %v6755_v15  ;;  %4567 = vmatprep.subr.bf16.mxu0 %v6799_v59  ;;  %v6859_v59 = vld [vmem:[%s7591_s8 + $0x40] sm:$0xff]  }
 0x4ca   :  { %4083 = vmatpush2.bf16.msra.mxu1 %v6753_v8 }
 0x4cb   :  { %4084 = vmatprep.subr.bf16.mxu1 %v6758_v10 }
 0x4ce   :  { %4085 = vmatpush2.bf16.msra.mxu1 %v6756_v16 }
 0x4cf   :  { %4086 = vmatprep.subr.bf16.mxu1 %v6761_v17 }
 0x4d2   :  { %4087 = vmatpush2.bf16.msra.mxu1 %v6759_v19 }
 0x4d3   :  { %4088 = vmatprep.subr.bf16.mxu1 %v6764_v20 }
 0x4d6   :  { %4089 = vmatpush2.bf16.msra.mxu1 %v6762_v21 }
 0x4d7   :  { %6033 = vmatprep.subr.bf16.mxu1 %v6781_v24 }
 0x4d9   :  { %4091 = vmatmul.mubr.bf16.vlgmr.msra.gmra.mxu1 %v7481_v33  ;;  %v6790_v33 = vld [vmem:[%s7493_s21 + $0x98] sm:$0xff]   ;;  %s6906_s21 = smov 27  }
 0x4da   :  { %6034 = vmatpush3.bf16.msra.mxu1 %v6782_v25  ;;  %v6802_v25 = vld [vmem:[%s7564_s30 + $0x64] ss:$8 sps:$4 sm:$0xff]   ;;  %s5319_s24 = sld [smem:[%s7693_s0 + %s6906_s21]]   ;;  %s6917_s21 = smov 64  }
 0x4db   :  { %6035 = vmatprep.subr.bf16.mxu1 %v6783_v26  ;;  %v6800_v26 = vld [vmem:[%s7564_s30 + $0x60] ss:$8 sps:$4 sm:$0xff]  }
 0x4de   :  { %6036 = vmatpush3.bf16.msra.mxu1 %v6784_v27  ;;  %v6805_v27 = vld [vmem:[%s7564_s30 + $0x54] ss:$8 sps:$4 sm:$0xff]  }
 0x4df   :  { %6037 = vmatprep.subr.bf16.mxu1 %v6785_v23  ;;  %v6803_v23 = vld [vmem:[%s7564_s30 + $0x50] ss:$8 sps:$4 sm:$0xff]  }
 0x4e2   :  { %6038 = vmatpush3.bf16.msra.mxu1 %v6786_v28  ;;  %v6808_v28 = vld [vmem:[%s7564_s30 + $0x44] ss:$8 sps:$4 sm:$0xff]  }
 0x4e3   :  { %6039 = vmatprep.subr.bf16.mxu1 %v6787_v29  ;;  %v6806_v29 = vld [vmem:[%s7564_s30 + $0x40] ss:$8 sps:$4 sm:$0xff]  }
 0x4e6   :  { %6040 = vmatpush3.bf16.msra.mxu1 %v6788_v31  ;;  %v6811_v31 = vld [vmem:[%s7564_s30 + $0x34] ss:$8 sps:$4 sm:$0xff]  }
 0x4e7   :  { %6041 = vmatprep.subr.bf16.mxu1 %v6789_v32  ;;  %v6809_v32 = vld [vmem:[%s7564_s30 + $0x30] ss:$8 sps:$4 sm:$0xff]  }
 0x4ea   :  { %6042 = vmatpush3.bf16.msra.mxu1 %v6790_v33  ;;  %v6814_v33 = vld [vmem:[%s7564_s30 + $0x24] ss:$8 sps:$4 sm:$0xff]  }
 0x4eb   :  { %6043 = vmatprep.subr.bf16.mxu1 %v6791_v34  ;;  %v6812_v34 = vld [vmem:[%s7564_s30 + $0x20] ss:$8 sps:$4 sm:$0xff]  }
 0x4ee   :  { %6044 = vmatpush3.bf16.msra.mxu1 %v6792_v35  ;;  %v6817_v35 = vld [vmem:[%s7564_s30 + $0x14] ss:$8 sps:$4 sm:$0xff]  }
 0x4ef   :  { %6045 = vmatprep.subr.bf16.mxu1 %v6793_v39  ;;  %v6820_v39 = vld [vmem:[%s7564_s30 + $0x4] ss:$8 sps:$4 sm:$0xff]  }
 0x4f2   :  { %6046 = vmatpush3.bf16.msra.mxu1 %v6794_v37  ;;  %v6823_v37 = vld [vmem:[%s7583_s4 + $0x74] ss:$8 sps:$4 sm:$0xff]  }
 0x4f3   :  { %6047 = vmatprep.subr.bf16.mxu1 %v6795_v42  ;;  %v6846_v42 = vld [vmem:[%s7591_s8 + $0x38] sm:$0xff]  }
 0x4f6   :  { %6048 = vmatpush3.bf16.msra.mxu1 %v6796_v43  ;;  %v6848_v43 = vld [vmem:[%s7591_s8 + $0x30] sm:$0xff]  }
 0x519   :  { %v3969_v36 = vpop.f32.mrf.mxu0 }
 0x51a   :  { %v3970_v47 = vadd.f32 %v3969_v36, %v3278_v45  ;;  %v6815_v36 = vld [vmem:[%s7564_s30 + $0x10] ss:$8 sps:$4 sm:$0xff]   ;;  %v6850_v45 = vld [vmem:[%s7591_s8 + $0x28] sm:$0xff]  }
 0x51b   :  { %v3971_v40 = vpop.f32.mrf.mxu0 }
 0x51c   :  { %v3972_v51 = vadd.f32 %v3971_v40, %v3282_v46  ;;  %v6818_v40 = vld [vmem:[%s7564_s30] ss:$8 sps:$4 sm:$0xff]   ;;  %s6910_s30 = smov 31  }
 0x51d   :  { %v3973_v41 = vpop.f32.mrf.mxu0  ;;  %v6851_v46 = vld [vmem:[%s7591_s8 + $0x60] sm:$0xff]   ;;  %s5323_s3 = sld [smem:[%s7693_s0 + %s6910_s30]]  }
 0x51e   :  { %v6845_v41 = vld [vmem:[%s7591_s8 + $0x78] sm:$0xff]  }
 0x51f   :  { %v3974_v30 = vpop.f32.mrf.mxu0  ;;  %6055 = vmatprep.subr.bf16.mxu1 %v6845_v41 }
 0x520   :  { %v6847_v30 = vld [vmem:[%s7591_s8 + $0x70] sm:$0xff]  }
 0x559   :  { %v4010_v48 = vpop.f32.mrf.mxu1  ;;  %v4051_v49 = vpop.f32.mrf.mxu0 }
 0x55a   :  { %v4011_v52 = vadd.f32 %v4010_v48, %v3970_v47  ;;  %v4052_v15 = vadd.f32 %v4051_v49, %v3286_v12  ;;  %v6852_v47 = vld [vmem:[%s7591_s8 + $0x20] sm:$0xff]   ;;  %v6853_v48 = vld [vmem:[%s7591_s8 + $0x58] sm:$0xff]  }
 0x55b   :  { %v4012_v53 = vpop.f32.mrf.mxu1  ;;  %v4053_v54 = vpop.f32.mrf.mxu0  ;;  %v6854_v49 = vld [vmem:[%s7591_s8 + $0x18] sm:$0xff]   ;;  %v6826_v12 = vld [vmem:[%s7583_s4 + $0x64] ss:$8 sps:$4 sm:$0xff]  }
 0x55c   :  { %vm4099_vm15 = vcmp.ge.f32.partialorder %v4011_v52, 0.0  ;;  %v4103_v57 = vmul.f32 0.01, %v4011_v52  ;;  %v4013_v50 = vadd.f32 %v4012_v53, %v3972_v51  ;;  %v4054_v10 = vadd.f32 %v4053_v54, %v3290_v13  ;;  %v6824_v13 = vld [vmem:[%s7583_s4 + $0x60] ss:$8 sps:$4 sm:$0xff]  }
 0x55d   :  { %v4014_v60 = vpop.f32.mrf.mxu1  ;;  %v4055_v61 = vpop.f32.mrf.mxu0 }
 0x55e   :  { %vm4100_vm0 = vcmp.ge.f32.partialorder %v4013_v50, 0.0  ;;  %v4104_v63 = vmul.f32 0.01, %v4013_v50  ;;  %v4107_v1 = vsel %vm4099_vm15, %v4011_v52, %v4103_v57 }
 0x55f   :  { %v4015_v2 = vpop.f32.mrf.mxu1  ;;  %v4056_v3 = vpop.f32.mrf.mxu0  ;;  %v4111_v6 = vpack.c.bf16 %v4107_v1, %v4107_v1 }
 0x560   :  { %v4108_v4 = vsel %vm4100_vm0, %v4013_v50, %v4104_v63  ;;  %v5775_v50 = vld [vmem:[%s5313_s12] ss:$0 sm:$0xff]  ;;  %s6913_s12 = smov 29  }
 0x561   :  { %v4112_v5 = vpack.c.bf16 %v4108_v4, %v4108_v4  ;;  %s5321_s15 = sld [smem:[%s7693_s0 + %s6913_s12]]  }
 0x563   :  { %4410 = vmatprep.mubr.bf16.mxu0 %v4112_v5  ;;  %v6821_v5 = vld [vmem:[%s7583_s4 + $0x70] ss:$8 sps:$4 sm:$0xff]  }
 0x564   :  { %4411 = vmatmul.mubr.bf16.vlgmr.msra.gmra.mxu0 %v4111_v6 }
 0x565   :  { %4599 = vmatprep.mubr.bf16.mxu0 %v6880_v0  ;;  %4568 = vmatpush1.bf16.msra.mxu0 %v6797_v56  ;;  %v6858_v56 = vld [vmem:[%s7591_s8 + $0x8] sm:$0xff]  }
 0x566   :  { %4569 = vmatprep.subr.bf16.mxu0 %v6802_v25  ;;  %v6860_v25 = vld [vmem:[%s7591_s8] sm:$0xff]  }
 0x569   :  { %4570 = vmatpush1.bf16.msra.mxu0 %v6800_v26 }
 0x56a   :  { %4571 = vmatprep.subr.bf16.mxu0 %v6805_v27 }
 0x56d   :  { %4572 = vmatpush1.bf16.msra.mxu0 %v6803_v23 }
 0x56e   :  { %4573 = vmatprep.subr.bf16.mxu0 %v6808_v28 }
 0x571   :  { %4574 = vmatpush1.bf16.msra.mxu0 %v6806_v29 }
 0x572   :  { %4575 = vmatprep.subr.bf16.mxu0 %v6811_v31 }
 0x575   :  { %4576 = vmatpush1.bf16.msra.mxu0 %v6809_v32 }
 0x576   :  { %4577 = vmatprep.subr.bf16.mxu0 %v6814_v33 }
 0x579   :  { %4578 = vmatpush1.bf16.msra.mxu0 %v6812_v34 }
 0x57a   :  { %4579 = vmatprep.subr.bf16.mxu0 %v6817_v35 }
 0x57d   :  { %4580 = vmatpush1.bf16.msra.mxu0 %v6815_v36 }
 0x57e   :  { %4581 = vmatprep.subr.bf16.mxu0 %v6820_v39 }
 0x581   :  { %4582 = vmatpush1.bf16.msra.mxu0 %v6818_v40 }
 0x582   :  { %4901 = vmatprep.subr.bf16.mxu0 %v6823_v37 }
 0x599   :  { %v4092_v8 = vpop.f32.mrf.mxu1 }
 0x59a   :  { %v4093_v16 = vadd.f32 %v4092_v8, %v4052_v15  ;;  %v6829_v15 = vld [vmem:[%s7583_s4 + $0x54] ss:$8 sps:$4 sm:$0xff]   ;;  %v6827_v8 = vld [vmem:[%s7583_s4 + $0x50] ss:$8 sps:$4 sm:$0xff]  }
 0x59b   :  { %v4094_v17 = vpop.f32.mrf.mxu1 }
 0x59c   :  { %vm4101_vm1 = vcmp.ge.f32.partialorder %v4093_v16, 0.0  ;;  %v4105_v19 = vmul.f32 0.01, %v4093_v16  ;;  %v4095_v20 = vadd.f32 %v4094_v17, %v4054_v10  ;;  %v6832_v10 = vld [vmem:[%s7583_s4 + $0x44] ss:$8 sps:$4 sm:$0xff]  }
 0x59d   :  { %v4096_v21 = vpop.f32.mrf.mxu1  ;;  %v6833_v17 = vld [vmem:[%s7583_s4 + $0x30] ss:$8 sps:$4 sm:$0xff]  }
 0x59e   :  { %vm4102_vm2 = vcmp.ge.f32.partialorder %v4095_v20, 0.0  ;;  %v4106_v9 = vmul.f32 0.01, %v4095_v20  ;;  %v4109_v11 = vsel %vm4101_vm1, %v4093_v16, %v4105_v19  ;;  %v6835_v16 = vld [vmem:[%s7583_s4 + $0x34] ss:$8 sps:$4 sm:$0xff]  }
 0x59f   :  { %v4097_v22 = vpop.f32.mrf.mxu1  ;;  %v4113_v24 = vpack.c.bf16 %v4109_v11, %v4109_v11  ;;  %v6836_v19 = vld [vmem:[%s7583_s4 + $0x20] ss:$8 sps:$4 sm:$0xff]   ;;  %v6839_v21 = vld [vmem:[%s7583_s4 + $0x10] ss:$8 sps:$4 sm:$0xff]  }
 0x5a0   :  { %v4110_v7 = vsel %vm4102_vm2, %v4095_v20, %v4106_v9  ;;  %v6841_v20 = vld [vmem:[%s7583_s4 + $0x14] ss:$8 sps:$4 sm:$0xff]   ;;  %v6844_v9 = vld [vmem:[%s7583_s4 + $0x4] ss:$8 sps:$4 sm:$0xff]   ;;  %v6842_v11 = vld [vmem:[%s7583_s4] ss:$8 sps:$4 sm:$0xff]   ;;  %v4792_v22 = vpack.c.bf16 %v7458_v62, %v7187_v38 }
 0x5a1   :  { %v4114_v14 = vpack.c.bf16 %v4110_v7, %v4110_v7  ;;  %v6855_v7 = vld [vmem:[%s7591_s8 + $0x50] sm:$0xff]   ;;  %v6861_v38 = vld [vmem:[%s7632_s16 + $0x78] sm:$0xff]   ;;  %v4475_v62 = vld [vmem:[%s5315_s20] sm:$0x3]  ;;  %s6916_s20 = smov 80  }
 0x5a2   :  { %v4484_v27 = vrot.slane %v4475_v62, %v6988_v58  ;;  %v4480_v23 = vrot.slane %v4475_v62, %v6984_v55 }
 0x5a3   :  { %4450 = vmatprep.mubr.bf16.mxu1 %v4114_v14  ;;  %v6856_v14 = vld [vmem:[%s7591_s8 + $0x10] sm:$0xff]  }
 0x5a4   :  { %4451 = vmatmul.mubr.bf16.vlgmr.msra.gmra.mxu1 %v4113_v24  ;;  %v6857_v24 = vld [vmem:[%s7591_s8 + $0x48] sm:$0xff]   ;;  %s6912_s8 = smov 33  }
 0x5a5   :  { %6056 = vmatpush3.bf16.msra.mxu1 %v6846_v42  ;;  %v6862_v42 = vld [vmem:[%s7632_s16 + $0x38] sm:$0xff]   ;;  %s7674_s11 = sld [smem:[%s7693_s0 + %s6912_s8]]  }
 0x5a6   :  { %6057 = vmatprep.subr.bf16.mxu1 %v6847_v30 }
 0x5a9   :  { %6058 = vmatpush3.bf16.msra.mxu1 %v6848_v43  ;;  %v6863_v43 = vld [vmem:[%s7632_s16 + $0x70] sm:$0xff]  }
 0x5aa   :  { %6059 = vmatprep.subr.bf16.mxu1 %v6849_v44  ;;  %v6864_v44 = vld [vmem:[%s7632_s16 + $0x30] sm:$0xff]  }
 0x5ad   :  { %6060 = vmatpush3.bf16.msra.mxu1 %v6850_v45  ;;  %v6865_v45 = vld [vmem:[%s7632_s16 + $0x68] sm:$0xff]  }
 0x5ae   :  { %6061 = vmatprep.subr.bf16.mxu1 %v6851_v46  ;;  %v6866_v46 = vld [vmem:[%s7632_s16 + $0x28] sm:$0xff]  }
 0x5b1   :  { %6062 = vmatpush3.bf16.msra.mxu1 %v6852_v47  ;;  %v6867_v47 = vld [vmem:[%s7632_s16 + $0x60] sm:$0xff]  }
 0x5b2   :  { %6063 = vmatprep.subr.bf16.mxu1 %v6853_v48  ;;  %v6868_v48 = vld [vmem:[%s7632_s16 + $0x20] sm:$0xff]  }
 0x5b5   :  { %6064 = vmatpush3.bf16.msra.mxu1 %v6854_v49  ;;  %v6869_v49 = vld [vmem:[%s7632_s16 + $0x58] sm:$0xff]  }
 0x5b6   :  { %6065 = vmatprep.subr.bf16.mxu1 %v6855_v7 }
 0x5b9   :  { %6066 = vmatpush3.bf16.msra.mxu1 %v6856_v14 }
 0x5ba   :  { %6067 = vmatprep.subr.bf16.mxu1 %v6857_v24 }
 0x5bd   :  { %6068 = vmatpush3.bf16.msra.mxu1 %v6858_v56 }
 0x5be   :  { %6069 = vmatprep.subr.bf16.mxu1 %v6859_v59 }
 0x5c1   :  { %6070 = vmatpush3.bf16.msra.mxu1 %v6860_v25 }
 0x5c2   :  { %6077 = vmatprep.subr.bf16.mxu1 %v6861_v38  ;;  %v5857_v38 = vld [vmem:[%s5321_s15] ss:$0 sm:$0xff] }
 0x624   :  { %v6027_v51 = vpop.f32.mrf.mxu0 }
 0x626   :  { %v6028_v52 = vpop.f32.mrf.mxu0 }
 0x627   :  { %v6029_v57 = vadd.f32 %v6028_v52, %v6027_v51  ;;  %v6870_v51 = vld [vmem:[%s7632_s16 + $0x18] sm:$0xff]   ;;  %v6871_v52 = vld [vmem:[%s7632_s16 + $0x50] sm:$0xff]  }
 0x628   :  { %v6030_v53 = vpop.f32.mrf.mxu0 }
 0x629   :  { %v4413_v63 = vadd.f32 %v6029_v57, %v5775_v50  ;;  %v4809_v53 = vld [vmem:[%s5319_s24] sm:$0x3]  ;;  %v6873_v50 = vld [vmem:[%s7632_s16 + $0x48] sm:$0xff]  }
 0x62a   :  { %v6031_v54 = vpop.f32.mrf.mxu0 }
 0x62b   :  { %v6872_v54 = vld [vmem:[%s7632_s16 + $0x10] sm:$0xff]  }
 0x664   :  { %v6049_v60 = vpop.f32.mrf.mxu1 }
 0x666   :  { %v6050_v61 = vpop.f32.mrf.mxu1 }
 0x667   :  { %v6051_v1 = vadd.f32 %v6050_v61, %v6049_v60  ;;  %v4818_v60 = vrot.slane %v4809_v53, %v6988_v58  ;;  %v4814_v61 = vrot.slane %v4809_v53, %v6984_v55 }
 0x668   :  { %v6052_v2 = vpop.f32.mrf.mxu1 }
 0x669   :  { %v4453_v3 = vadd.f32 %v6051_v1, %v4413_v63  ;;  %v6874_v1 = vld [vmem:[%s7632_s16 + $0x8] sm:$0xff]  }
 0x66a   :  { %v6053_v4 = vpop.f32.mrf.mxu1 }
 0x66b   :  { %v4458_v6 = vpack.c.bf16 %v4453_v3, %v7109_v18  ;;  %v6830_v18 = vld [vmem:[%s7583_s4 + $0x40] ss:$8 sps:$4 sm:$0xff]  }
 0x66c   :  { %v6875_v3 = vld [vmem:[%s7632_s16 + $0x40] sm:$0xff]  }
 0x66d   :  { %4600 = vmatmul.mubr.bf16.vlgmr.msra.gmra.mxu0 %v4458_v6 }
 0x66e   :  { %4902 = vmatpush1.bf16.msra.mxu0 %v6821_v5  ;;  %4933 = vmatprep.mubr.bf16.mxu0 %v6880_v0  ;;  %v6838_v0 = vld [vmem:[%s7583_s4 + $0x24] ss:$8 sps:$4 sm:$0xff]   ;;  %s6911_s4 = smov 25  }
 0x66f   :  { %4903 = vmatprep.subr.bf16.mxu0 %v6826_v12  ;;  %s5317_s7 = sld [smem:[%s7693_s0 + %s6911_s4]]  }
 0x672   :  { %4904 = vmatpush1.bf16.msra.mxu0 %v6824_v13 }
 0x673   :  { %4905 = vmatprep.subr.bf16.mxu0 %v6829_v15  ;;  %v6876_v15 = vld [vmem:[%s7632_s16] sm:$0xff]   ;;  %s6914_s16 = smov 32  }
 0x674   :  { %s5324_s19 = sld [smem:[%s7693_s0 + %s6914_s16]]   ;;  %s6918_s0 = smov 96  }
 0x676   :  { %4906 = vmatpush1.bf16.msra.mxu0 %v6827_v8 }
 0x677   :  { %4907 = vmatprep.subr.bf16.mxu0 %v6832_v10 }
 0x67a   :  { %4908 = vmatpush1.bf16.msra.mxu0 %v6830_v18 }
 0x67b   :  { %4909 = vmatprep.subr.bf16.mxu0 %v6835_v16 }
 0x67e   :  { %4910 = vmatpush1.bf16.msra.mxu0 %v6833_v17  ;;  %v6877_v17 = vld [vmem:[%s5322_s29] sm:$0xff]  }
 0x67f   :  { %4911 = vmatprep.subr.bf16.mxu0 %v6838_v0  ;;  %v6908_v0 = vmov 0.0  }
 0x682   :  { %4912 = vmatpush1.bf16.msra.mxu0 %v6836_v19  ;;  %v6878_v19 = vld [vmem:[%s5323_s3] sm:$0xff]  }
 0x683   :  { %4913 = vmatprep.subr.bf16.mxu0 %v6841_v20 }
 0x686   :  { %4914 = vmatpush1.bf16.msra.mxu0 %v6839_v21  ;;  %v5824_v21 = vld [vmem:[%s5317_s7] ss:$0 sm:$0xff] }
 0x687   :  { %4915 = vmatprep.subr.bf16.mxu0 %v6844_v9 }
 0x68a   :  { %4916 = vmatpush1.bf16.msra.mxu0 %v6842_v11 }
 0x68b   :  { %6103 = vmatprep.subr.bf16.mxu0 %v6908_v0 }
 0x68d   :  { %4934 = vmatmul.mubr.bf16.vlgmr.msra.gmra.mxu0 %v4792_v22 }
 0x68e   :  { %6104 = vmatpush3.bf16.msra.mxu0 %v6877_v17  ;;  %6105 = vmatprep.mubr.msk.bf16.mxu0 %vm6909_vm3, %v6908_v0 }
 0x72d   :  { %v4601_v26 = vpop.f32.mrf.mxu0 }
 0x72e   :  { %v4602_v33 = vadd.f32 %v4601_v26, %v4480_v23 }
 0x72f   :  { %v4603_v28 = vpop.f32.mrf.mxu0 }
 0x730   :  { %v4604_v31 = vadd.f32 %v4603_v28, %v4484_v27  ;;  %v4610_v37 = vmax.f32 %v4602_v33, 0.0 }
 0x731   :  { %v4605_v29 = vpop.f32.mrf.mxu0 }
 0x732   :  { %v4606_v32 = vadd.f32 %v4605_v29, %v4480_v23  ;;  %v4611_v39 = vmax.f32 %v4604_v31, 0.0 }
 0x733   :  { %v4607_v34 = vpop.f32.mrf.mxu0 }
 0x734   :  { %v4608_v35 = vadd.f32 %v4607_v34, %v4484_v27  ;;  %v4612_v36 = vmax.f32 %v4606_v32, 0.0 }
 0x736   :  { %v4613_v40 = vmax.f32 %v4608_v35, 0.0  ;;  %v4614_v30 = vpack.c.bf16 %v4612_v36, %v4610_v37 }
 0x738   :  { %v4615_v41 = vpack.c.bf16 %v4613_v40, %v4611_v39 }
 0x73a   :  { %4783 = vmatprep.mubr.bf16.mxu1 %v4615_v41 }
 0x73b   :  { %4784 = vmatmul.mubr.bf16.vlgmr.msra.gmra.mxu1 %v4614_v30 }
 0x73c   :  { %6078 = vmatpush3.bf16.msra.mxu1 %v6862_v42 }
 0x73d   :  { %6079 = vmatprep.subr.bf16.mxu1 %v6863_v43  ;;  %v5878_v43 = vld [vmem:[%s5324_s19] ss:$0 sm:$0xff] }
 0x740   :  { %6080 = vmatpush3.bf16.msra.mxu1 %v6864_v44 }
 0x741   :  { %6081 = vmatprep.subr.bf16.mxu1 %v6865_v45 }
 0x744   :  { %6082 = vmatpush3.bf16.msra.mxu1 %v6866_v46 }
 0x745   :  { %6083 = vmatprep.subr.bf16.mxu1 %v6867_v47 }
 0x748   :  { %6084 = vmatpush3.bf16.msra.mxu1 %v6868_v48 }
 0x749   :  { %6085 = vmatprep.subr.bf16.mxu1 %v6869_v49 }
 0x74c   :  { %6086 = vmatpush3.bf16.msra.mxu1 %v6870_v51 }
 0x74d   :  { %v4935_v57 = vpop.f32.mrf.mxu0  ;;  %6087 = vmatprep.subr.bf16.mxu1 %v6871_v52 }
 0x74e   :  { %v4936_v6 = vadd.f32 %v4935_v57, %v4814_v61 }
 0x74f   :  { %v4937_v63 = vpop.f32.mrf.mxu0 }
 0x750   :  { %6088 = vmatpush3.bf16.msra.mxu1 %v6872_v54  ;;  %v4938_v4 = vadd.f32 %v4937_v63, %v4818_v60  ;;  %v4944_v58 = vmax.f32 %v4936_v6, 0.0 }
 0x751   :  { %v4939_v2 = vpop.f32.mrf.mxu0  ;;  %6089 = vmatprep.subr.bf16.mxu1 %v6873_v50 }
 0x752   :  { %v4940_v5 = vadd.f32 %v4939_v2, %v4814_v61  ;;  %v4945_v10 = vmax.f32 %v4938_v4, 0.0 }
 0x753   :  { %v4941_v12 = vpop.f32.mrf.mxu0 }
 0x754   :  { %v4942_v13 = vadd.f32 %v4941_v12, %v4818_v60  ;;  %6090 = vmatpush3.bf16.msra.mxu1 %v6874_v1  ;;  %v4946_v8 = vmax.f32 %v4940_v5, 0.0 }
 0x755   :  { %6091 = vmatprep.subr.bf16.mxu1 %v6875_v3 }
 0x756   :  { %v4947_v18 = vmax.f32 %v4942_v13, 0.0  ;;  %v4948_v55 = vpack.c.bf16 %v4946_v8, %v4944_v58 }
 0x758   :  { %v4949_v16 = vpack.c.bf16 %v4947_v18, %v4945_v10  ;;  %6092 = vmatpush3.bf16.msra.mxu1 %v6876_v15 }
 0x759   :  { %6109 = vmatprep.subr.bf16.mxu1 %v6908_v0 }
 0x75a   :  { %5117 = vmatprep.mubr.bf16.mxu1 %v4949_v16 }
 0x75b   :  { %5118 = vmatmul.mubr.bf16.vlgmr.msra.gmra.mxu1 %v4948_v55 }
 0x75c   :  { %6111 = vmatprep.mubr.msk.bf16.mxu1 %vm6909_vm3, %v6908_v0  ;;  %6110 = vmatpush3.bf16.msra.mxu1 %v6878_v19 }
 0x7fb   :  { %v6071_v20 = vpop.f32.mrf.mxu1 }
 0x7fd   :  { %v6072_v9 = vpop.f32.mrf.mxu1 }
 0x7fe   :  { %v6073_v11 = vadd.f32 %v6072_v9, %v6071_v20 }
 0x7ff   :  { %v6074_v22 = vpop.f32.mrf.mxu1 }
 0x800   :  { %v4786_v7 = vadd.f32 %v6073_v11, %v5824_v21 }
 0x801   :  { %v6075_v14 = vpop.f32.mrf.mxu1 }
 0x802   :  { %v6076_v24 = vadd.f32 %v6075_v14, %v6074_v22  ;;  %5252 = vst.msk [vmem:[%s7674_s11] sm:$0xff] %vm5135_vm4, %v4786_v7 }
 0x804   :  { %v4789_v56 = vadd.f32 %v6076_v24, %v5824_v21 }
 0x806   :  { %v5126_v59 = vpack.c.bf16 %v4789_v56, %v4786_v7  ;;  %5254 = vrot.lane.b32.xlu0 %v4789_v56, %s6893_s28  ;;  %s6915_s28 = smov 48  }
 0x808   :  { %6106 = vmatmul.mubr.msk.bf16.vlgmr.msra.gmra.mxu0 %vm5135_vm4, %v5126_v59 }
 0x81b   :  { %v6093_v25 = vpop.f32.mrf.mxu1 }
 0x81d   :  { %v6094_v62 = vpop.f32.mrf.mxu1 }
 0x81e   :  { %v6095_v26 = vadd.f32 %v6094_v62, %v6093_v25 }
 0x81f   :  { %v6096_v27 = vpop.f32.mrf.mxu1 }
 0x820   :  { %v5120_v23 = vadd.f32 %v6095_v26, %v5857_v38 }
 0x821   :  { %v6097_v28 = vpop.f32.mrf.mxu1 }
 0x822   :  { %v6098_v29 = vadd.f32 %v6097_v28, %v6096_v27  ;;  %5260 = vrot.lane.b32.xlu0 %v5120_v23, %s6914_s16  ;;  %v5246_v31 = vadd.f32 %v5120_v23, %v4789_v56  ;;  %v5242_v32 = vadd.f32 %v5120_v23, %v4786_v7 }
 0x824   :  { %v5123_v33 = vadd.f32 %v6098_v29, %v5857_v38 }
 0x826   :  { %v5180_v34 = vpack.c.bf16 %v5123_v33, %v5120_v23  ;;  %5266 = vrot.lane.b32.xlu1 %v5123_v33, %s6915_s28  ;;  %v5250_v35 = vadd.f32 %v5123_v33, %v4786_v7 }
 0x828   :  { %6112 = vmatmul.mubr.msk.bf16.vlgmr.msra.gmra.mxu1 %vm5135_vm4, %v5180_v34 }
 0x878   :  { %v5255_v36 = vpop.permute.xlu0 %5254 }
 0x879   :  { %5258 = vst.msk [vmem:[%s7674_s11] sm:$0xff] %vm5257_vm5, %v5255_v36 }
 0x894   :  { %v5261_v39 = vpop.permute.xlu0 %5260 }
 0x895   :  { %5264 = vst.msk [vmem:[%s7674_s11] sm:$0xff] %vm5263_vm6, %v5261_v39 }
 0x898   :  { %v5267_v40 = vpop.permute.xlu1 %5266 }
 0x899   :  { %5270 = vst.msk [vmem:[%s7674_s11] sm:$0xff] %vm5269_vm7, %v5267_v40 }
 0x8c8   :  { %v5173_v37 = vpop.f32.mrf.mxu0 }
 0x8ca   :  { %v6107_v41 = vpop.f32.mrf.mxu0 }
 0x8cc   :  { %v5176_v42 = vpop.f32.mrf.mxu0 }
 0x8ce   :  { %v6108_v30 = vpop.f32.mrf.mxu0 }
 0x8e8   :  { %v5226_v44 = vpop.f32.mrf.mxu1 }
 0x8e9   :  { %v5234_v45 = vadd.f32 %v5226_v44, %v5173_v37  ;;  %v5244_v46 = vadd.f32 %v5226_v44, %v5176_v42 }
 0x8ea   :  { %v6113_v47 = vpop.f32.mrf.mxu1 }
 0x8eb   :  { %v5241_v48 = vadd.f32 %v5878_v43, %v5234_v45  ;;  %v5245_v49 = vadd.f32 %v5878_v43, %v5244_v46 }
 0x8ec   :  { %v5229_v51 = vpop.f32.mrf.mxu1 }
 0x8ed   :  { %v5248_v52 = vadd.f32 %v5229_v51, %v5173_v37  ;;  %v5247_v53 = vmul.f32 %v5246_v31, %v5245_v49  ;;  %v5243_v54 = vmul.f32 %v5242_v32, %v5241_v48 }
 0x8ee   :  { %v6114_v57 = vpop.f32.mrf.mxu1 }
 0x8ef   :  { %v5249_v50 = vadd.f32 %v5878_v43, %v5248_v52  ;;  %5278 = vrot.lane.b32.xlu0 %v5247_v53, %s6916_s20  ;;  %5272 = vrot.lane.b32.xlu1 %v5243_v54, %s6917_s21 }
 0x8f1   :  { %v5251_v60 = vmul.f32 %v5250_v35, %v5249_v50 }
 0x8f3   :  { %5284 = vrot.lane.b32.xlu1 %v5251_v60, %s6918_s0 }
 0x961   :  { %v5279_v61 = vpop.permute.xlu0 %5278  ;;  %v5273_v63 = vpop.permute.xlu1 %5272 }
 0x962   :  { %5276 = vst.msk [vmem:[%s7674_s11] sm:$0xff] %vm5275_vm8, %v5273_v63 }
 0x963   :  { %5282 = vst.msk [vmem:[%s7674_s11] sm:$0xff] %vm5281_vm9, %v5279_v61 }
 0x965   :  { %v5285_v1 = vpop.permute.xlu1 %5284 }
 0x966   :  { %5288 = vst.msk [vmem:[%s7674_s11] sm:$0xff] %vm5287_vm10, %v5285_v1 }

</bundles_post_ra>
